<compile_context>
chip_gen: v7x
topology: tpu7x:2x2x1
jax: 0.10.0
libtpu: 0.0.40
codegen_flags: <defaults>
</compile_context>

<pallas_src>
import jax
import jax.numpy as jnp
from jax import lax
from jax.experimental import pallas as pl
from jax.experimental.pallas import tpu as pltpu

KS = 3               # kernel size
PAD = 1              # padding
LEAKY_SLOPE = 0.01   # torch.nn.LeakyReLU default
BN_EPS = 1e-5        # torch.nn.BatchNorm2d default
LANE = 128


def _round_up(v, m):
    return (v + m - 1) // m * m


def _pad_channels(c):
    # Lane-dense when large; for small channel counts do NOT inflate to 128 --
    # the block simply covers the full array dim (allowed by the (8,128) rule).
    return c if c <= LANE else _round_up(c, LANE)


def _pick_row_block(H, W, tco, acc_budget_bytes=2 << 20):
    """Largest divisor of H whose (TH, W, TCO) f32 accumulator fits the budget."""
    max_rows = max(1, acc_budget_bytes // max(1, W * tco * 4))
    th = 1
    for d in range(1, H + 1):
        if H % d == 0 and d <= max_rows:
            th = d
    return th


def _vmem_limit_bytes():
    cap = 64 * 1024 * 1024  # conservative default: v7x per-core VMEM
    try:
        info = pltpu.get_tpu_info()
        cap = int(getattr(info, "vmem_capacity_bytes", cap))
    except Exception:
        pass
    # ~25% headroom: -> 48 MiB on v7x, ~96-100 MiB on v5e/v6e.
    return min(cap * 3 // 4, 100 * 1024 * 1024)


def _conv_bn_lrelu_kernel(x_ref, w_ref, sb_ref, o_ref, acc_ref):
    """One grid step = (image n, Cout block c, H-row block h).

    x_ref  : (1, Hp, Wp, Cin_p)  bf16  zero-padded image, VMEM-resident per n
    w_ref  : (9, Cin_p, TCO)     bf16  conv taps (whole Cout slab when Cb == 1)
    sb_ref : (2, TCO)            f32   row 0 = BN scale, row 1 = BN bias
    o_ref  : (1, TH, W, TCO)     f32   output tile
    acc_ref: (TH, W, TCO)        f32   VMEM scratch accumulator
    """
    TH = o_ref.shape[1]
    W = o_ref.shape[2]

    row0 = pl.multiple_of(pl.program_id(2) * TH, TH)

    # 3 row-slab loads (one per kh); the kw = 0/1/2 windows are static value
    # slices of the slab, so the vld slot only sees 3 loads instead of 9.
    for kh in range(KS):
        slab = x_ref[0, pl.ds(row0 + kh, TH), :, :]        # (TH, Wp, Cin_p)
        part = None
        for kw in range(KS):
            patch = slab[:, kw:kw + W, :]                  # (TH, W, Cin_p)
            d = lax.dot_general(
                patch, w_ref[kh * KS + kw],
                dimension_numbers=(((2,), (0,)), ((), ())),
                preferred_element_type=jnp.float32)
            part = d if part is None else part + d
        if kh == 0:
            acc_ref[...] = part
        else:
            acc_ref[...] += part

    # BN (eval) on the f32 accumulator, then LeakyReLU, then store.
    y = acc_ref[...] * sb_ref[0] + sb_ref[1]
    y = jnp.where(y > 0, y, LEAKY_SLOPE * y)
    o_ref[0] = y.astype(o_ref.dtype)


@jax.jit
def conv_bn_lrelu(x_nchw, w_oihw, gamma, beta, run_mean, run_var):
    """Forward pass of the PyTorch `Conv` module (eval mode).

    x_nchw : (N, Cin, H, W) f32; w_oihw : (Cout, Cin, 3, 3) f32;
    gamma, beta, run_mean, run_var : (Cout,) f32.  Returns (N, Cout, H, W) f32.
    """
    N, Cin, H, W = x_nchw.shape
    Cout = w_oihw.shape[0]

    Cin_p = _pad_channels(Cin)
    Cout_p = _pad_channels(Cout)

    # Cout tiling: keep the entire weight slab VMEM-resident when it is small
    # (one weight DMA for the whole kernel); otherwise tile Cout lane-densely.
    w_slab_bytes = KS * KS * Cin_p * Cout_p * 2
    if w_slab_bytes <= (4 << 20) or Cout_p <= 256:
        TCO = Cout_p
    elif Cout_p % 256 == 0:
        TCO = 256   # TODO(synk): prefer TCO=128 on v5e (4x128^2 MXU).
    else:
        TCO = 128
    Cb = Cout_p // TCO

    TH = _pick_row_block(H, W, TCO)
    Hb = H // TH

    # ---- BN fold (eval mode). Scale stays f32 and is applied in the kernel
    # epilogue (not folded into bf16 weights).
    scale = gamma / jnp.sqrt(run_var + BN_EPS)              # (Cout,)
    bias = beta - run_mean * scale                          # (Cout,)
    sb = jnp.stack([scale, bias]).astype(jnp.float32)       # (2, Cout)
    if Cout_p != Cout:
        sb = jnp.pad(sb, ((0, 0), (0, Cout_p - Cout)))

    # ---- input: NCHW -> NHWC, bf16, spatial (+ optional channel) pad, one pass
    x = jnp.transpose(x_nchw, (0, 2, 3, 1)).astype(jnp.bfloat16)
    x = jnp.pad(x, ((0, 0), (PAD, PAD), (PAD, PAD), (0, Cin_p - Cin)))

    # ---- weights: OIHW -> (9, Cin_p, Cout_p), bf16 (no BN scale folded in)
    w = jnp.transpose(w_oihw, (2, 3, 1, 0))                 # (3, 3, Cin, Cout)
    w = jnp.pad(w, ((0, 0), (0, 0), (0, Cin_p - Cin), (0, Cout_p - Cout)))
    w = w.reshape(KS * KS, Cin_p, Cout_p).astype(jnp.bfloat16)

    Hp, Wp = H + 2 * PAD, W + 2 * PAD

    out_nhwc = pl.pallas_call(
        _conv_bn_lrelu_kernel,
        out_shape=jax.ShapeDtypeStruct((N, H, W, Cout_p), jnp.float32),
        grid_spec=pltpu.PrefetchScalarGridSpec(
            num_scalar_prefetch=0,
            # H rows innermost: weight / sb block index is constant across the
            # inner sweep; the padded image only re-DMAs when n changes.
            grid=(N, Cb, Hb),
            in_specs=[
                pl.BlockSpec((1, Hp, Wp, Cin_p), lambda n, c, h: (n, 0, 0, 0)),
                pl.BlockSpec((KS * KS, Cin_p, TCO), lambda n, c, h: (0, 0, c)),
                pl.BlockSpec((2, TCO), lambda n, c, h: (0, c)),
            ],
            out_specs=pl.BlockSpec((1, TH, W, TCO), lambda n, c, h: (n, h, 0, c)),
            scratch_shapes=[pltpu.VMEM((TH, W, TCO), jnp.float32)],
        ),
        compiler_params=pltpu.CompilerParams(
            dimension_semantics=("parallel", "parallel", "parallel"),
            vmem_limit_bytes=_vmem_limit_bytes()),
    )(x, w, sb)

    out = out_nhwc if Cout_p == Cout else out_nhwc[..., :Cout]
    return jnp.transpose(out, (0, 3, 1, 2))                 # NHWC -> NCHW


def _reference(x_nchw, w_oihw, gamma, beta, run_mean, run_var):
    """Pure-JAX f32 reference (same semantics) for a correctness check."""
    y = lax.conv_general_dilated(
        x_nchw, w_oihw, window_strides=(1, 1), padding=((PAD, PAD), (PAD, PAD)),
        dimension_numbers=("NCHW", "OIHW", "NCHW"))
    scale = gamma / jnp.sqrt(run_var + BN_EPS)
    bias = beta - run_mean * scale
    y = y * scale[None, :, None, None] + bias[None, :, None, None]
    return jnp.where(y > 0, y, LEAKY_SLOPE * y)


if __name__ == "__main__":
    key = jax.random.PRNGKey(0)
    k_x, k_w, k_g, k_b, k_m, k_v = jax.random.split(key, 6)

    N, Cin, Cout, H, W = 2, 4, 8, 16, 16

    x = jax.random.normal(k_x, (N, Cin, H, W), jnp.float32)

    # Deterministic synthetic parameters (not a checkpoint).
    w = jax.random.normal(k_w, (Cout, Cin, KS, KS), jnp.float32) * 0.1
    gamma = 1.0 + 0.1 * jax.random.normal(k_g, (Cout,), jnp.float32)
    beta = 0.1 * jax.random.normal(k_b, (Cout,), jnp.float32)
    run_mean = 0.1 * jax.random.normal(k_m, (Cout,), jnp.float32)
    run_var = jnp.abs(jax.random.normal(k_v, (Cout,), jnp.float32)) + 0.5

    # NOTE: BatchNorm is eval-mode (running stats); Dropout is defined in the
    # PyTorch module but never applied in forward(), so it is omitted.
    # TODO(synk): training-mode BatchNorm (batch statistics) not implemented.

    out = conv_bn_lrelu(x, w, gamma, beta, run_mean, run_var)
    out = jax.block_until_ready(out)

    ref = _reference(x, w, gamma, beta, run_mean, run_var)
    assert out.shape == (N, Cout, H, W)
    # bf16 MXU operands (f32 accumulate + f32 BN epilogue) => loose tolerance.
    assert jnp.allclose(out, ref, atol=5e-2, rtol=5e-2), "mismatch vs reference"

    print("KERNEL_OK")
</pallas_src>

<mosaic_0001>
module attributes {stable_mosaic.version = 11 : i64} {
  func.func @_conv_bn_lrelu_kernel(%arg0: i32, %arg1: i32, %arg2: i32, %arg3: memref<1x18x18x4xbf16, #tpu.memory_space<vmem>>, %arg4: memref<9x4x8xbf16, #tpu.memory_space<vmem>>, %arg5: memref<2x8xf32, #tpu.memory_space<vmem>>, %arg6: memref<1x16x16x8xf32, #tpu.memory_space<vmem>>, %arg7: memref<16x16x8xf32, #tpu.memory_space<vmem>>) attributes {dimension_semantics = [#tpu.dimension_semantics<parallel>, #tpu.dimension_semantics<parallel>, #tpu.dimension_semantics<parallel>], iteration_bounds = array<i64: 2, 1, 1>, scalar_prefetch = 0 : i64, scratch_operands = 1 : i64, tpu.core_type = #tpu.core_type<tc>, window_params = [{transform_indices = @transform_0, window_bounds = array<i64: 1, 18, 18, 4>}, {transform_indices = @transform_1, window_bounds = array<i64: 9, 4, 8>}, {transform_indices = @transform_2, window_bounds = array<i64: 2, 8>}, {transform_indices = @transform_3, window_bounds = array<i64: 1, 16, 16, 8>}]} {
    %c16_i32 = arith.constant 16 : i32
    %0 = arith.muli %arg2, %c16_i32 : i32
    %1 = tpu.assume_multiple %0, 16 : i32
    %c0_i32 = arith.constant 0 : i32
    %2 = arith.addi %1, %c0_i32 : i32
    %c0 = arith.constant 0 : index
    %3 = arith.index_cast %2 : i32 to index
    %c0_0 = arith.constant 0 : index
    %c0_1 = arith.constant 0 : index
    %4 = vector.load %arg3[%c0, %3, %c0_0, %c0_1] : memref<1x18x18x4xbf16, #tpu.memory_space<vmem>>, vector<1x16x18x4xbf16>
    %5 = vector.shape_cast %4 : vector<1x16x18x4xbf16> to vector<16x18x4xbf16>
    %6 = vector.extract_strided_slice %5 {offsets = [0, 0, 0], sizes = [16, 16, 4], strides = [1, 1, 1]} : vector<16x18x4xbf16> to vector<16x16x4xbf16>
    %c0_2 = arith.constant 0 : index
    %c0_3 = arith.constant 0 : index
    %c0_4 = arith.constant 0 : index
    %7 = vector.load %arg4[%c0_2, %c0_3, %c0_4] : memref<9x4x8xbf16, #tpu.memory_space<vmem>>, vector<1x4x8xbf16>
    %8 = vector.shape_cast %7 : vector<1x4x8xbf16> to vector<4x8xbf16>
    %cst = arith.constant dense<0.000000e+00> : vector<16x16x8xf32>
    %9 = tpu.matmul %6, %8, %cst {dimension_numbers = #tpu.dot_dimension_numbers<[2], [0], [0, 1], [1], [0, 0, 0, 1, 1, 1], [], []>} : vector<16x16x4xbf16>, vector<4x8xbf16>, vector<16x16x8xf32> -> vector<16x16x8xf32>
    %10 = vector.extract_strided_slice %5 {offsets = [0, 1, 0], sizes = [16, 16, 4], strides = [1, 1, 1]} : vector<16x18x4xbf16> to vector<16x16x4xbf16>
    %c1 = arith.constant 1 : index
    %c0_5 = arith.constant 0 : index
    %c0_6 = arith.constant 0 : index
    %11 = vector.load %arg4[%c1, %c0_5, %c0_6] : memref<9x4x8xbf16, #tpu.memory_space<vmem>>, vector<1x4x8xbf16>
    %12 = vector.shape_cast %11 : vector<1x4x8xbf16> to vector<4x8xbf16>
    %cst_7 = arith.constant dense<0.000000e+00> : vector<16x16x8xf32>
    %13 = tpu.matmul %10, %12, %cst_7 {dimension_numbers = #tpu.dot_dimension_numbers<[2], [0], [0, 1], [1], [0, 0, 0, 1, 1, 1], [], []>} : vector<16x16x4xbf16>, vector<4x8xbf16>, vector<16x16x8xf32> -> vector<16x16x8xf32>
    %14 = arith.addf %9, %13 : vector<16x16x8xf32>
    %15 = vector.extract_strided_slice %5 {offsets = [0, 2, 0], sizes = [16, 16, 4], strides = [1, 1, 1]} : vector<16x18x4xbf16> to vector<16x16x4xbf16>
    %c2 = arith.constant 2 : index
    %c0_8 = arith.constant 0 : index
    %c0_9 = arith.constant 0 : index
    %16 = vector.load %arg4[%c2, %c0_8, %c0_9] : memref<9x4x8xbf16, #tpu.memory_space<vmem>>, vector<1x4x8xbf16>
    %17 = vector.shape_cast %16 : vector<1x4x8xbf16> to vector<4x8xbf16>
    %cst_10 = arith.constant dense<0.000000e+00> : vector<16x16x8xf32>
    %18 = tpu.matmul %15, %17, %cst_10 {dimension_numbers = #tpu.dot_dimension_numbers<[2], [0], [0, 1], [1], [0, 0, 0, 1, 1, 1], [], []>} : vector<16x16x4xbf16>, vector<4x8xbf16>, vector<16x16x8xf32> -> vector<16x16x8xf32>
    %19 = arith.addf %14, %18 : vector<16x16x8xf32>
    %c0_11 = arith.constant 0 : index
    %c0_12 = arith.constant 0 : index
    %c0_13 = arith.constant 0 : index
    %20 = vector.load %arg7[%c0_11, %c0_12, %c0_13] : memref<16x16x8xf32, #tpu.memory_space<vmem>>, vector<16x16x8xf32>
    tpu.vector_store %arg7[%c0_11, %c0_12, %c0_13], %19 {strides = array<i32>} : memref<16x16x8xf32, #tpu.memory_space<vmem>>, vector<16x16x8xf32>,
    %c1_i32 = arith.constant 1 : i32
    %21 = arith.addi %1, %c1_i32 : i32
    %c0_14 = arith.constant 0 : index
    %22 = arith.index_cast %21 : i32 to index
    %c0_15 = arith.constant 0 : index
    %c0_16 = arith.constant 0 : index
    %23 = vector.load %arg3[%c0_14, %22, %c0_15, %c0_16] : memref<1x18x18x4xbf16, #tpu.memory_space<vmem>>, vector<1x16x18x4xbf16>
    %24 = vector.shape_cast %23 : vector<1x16x18x4xbf16> to vector<16x18x4xbf16>
    %25 = vector.extract_strided_slice %24 {offsets = [0, 0, 0], sizes = [16, 16, 4], strides = [1, 1, 1]} : vector<16x18x4xbf16> to vector<16x16x4xbf16>
    %c3 = arith.constant 3 : index
    %c0_17 = arith.constant 0 : index
    %c0_18 = arith.constant 0 : index
    %26 = vector.load %arg4[%c3, %c0_17, %c0_18] : memref<9x4x8xbf16, #tpu.memory_space<vmem>>, vector<1x4x8xbf16>
    %27 = vector.shape_cast %26 : vector<1x4x8xbf16> to vector<4x8xbf16>
    %cst_19 = arith.constant dense<0.000000e+00> : vector<16x16x8xf32>
    %28 = tpu.matmul %25, %27, %cst_19 {dimension_numbers = #tpu.dot_dimension_numbers<[2], [0], [0, 1], [1], [0, 0, 0, 1, 1, 1], [], []>} : vector<16x16x4xbf16>, vector<4x8xbf16>, vector<16x16x8xf32> -> vector<16x16x8xf32>
    %29 = vector.extract_strided_slice %24 {offsets = [0, 1, 0], sizes = [16, 16, 4], strides = [1, 1, 1]} : vector<16x18x4xbf16> to vector<16x16x4xbf16>
    %c4 = arith.constant 4 : index
    %c0_20 = arith.constant 0 : index
    %c0_21 = arith.constant 0 : index
    %30 = vector.load %arg4[%c4, %c0_20, %c0_21] : memref<9x4x8xbf16, #tpu.memory_space<vmem>>, vector<1x4x8xbf16>
    %31 = vector.shape_cast %30 : vector<1x4x8xbf16> to vector<4x8xbf16>
    %cst_22 = arith.constant dense<0.000000e+00> : vector<16x16x8xf32>
    %32 = tpu.matmul %29, %31, %cst_22 {dimension_numbers = #tpu.dot_dimension_numbers<[2], [0], [0, 1], [1], [0, 0, 0, 1, 1, 1], [], []>} : vector<16x16x4xbf16>, vector<4x8xbf16>, vector<16x16x8xf32> -> vector<16x16x8xf32>
    %33 = arith.addf %28, %32 : vector<16x16x8xf32>
    %34 = vector.extract_strided_slice %24 {offsets = [0, 2, 0], sizes = [16, 16, 4], strides = [1, 1, 1]} : vector<16x18x4xbf16> to vector<16x16x4xbf16>
    %c5 = arith.constant 5 : index
    %c0_23 = arith.constant 0 : index
    %c0_24 = arith.constant 0 : index
    %35 = vector.load %arg4[%c5, %c0_23, %c0_24] : memref<9x4x8xbf16, #tpu.memory_space<vmem>>, vector<1x4x8xbf16>
    %36 = vector.shape_cast %35 : vector<1x4x8xbf16> to vector<4x8xbf16>
    %cst_25 = arith.constant dense<0.000000e+00> : vector<16x16x8xf32>
    %37 = tpu.matmul %34, %36, %cst_25 {dimension_numbers = #tpu.dot_dimension_numbers<[2], [0], [0, 1], [1], [0, 0, 0, 1, 1, 1], [], []>} : vector<16x16x4xbf16>, vector<4x8xbf16>, vector<16x16x8xf32> -> vector<16x16x8xf32>
    %38 = arith.addf %33, %37 : vector<16x16x8xf32>
    %c0_26 = arith.constant 0 : index
    %c0_27 = arith.constant 0 : index
    %c0_28 = arith.constant 0 : index
    %39 = vector.load %arg7[%c0_26, %c0_27, %c0_28] : memref<16x16x8xf32, #tpu.memory_space<vmem>>, vector<16x16x8xf32>
    %40 = arith.addf %39, %38 : vector<16x16x8xf32>
    %c0_29 = arith.constant 0 : index
    %c0_30 = arith.constant 0 : index
    %c0_31 = arith.constant 0 : index
    %41 = vector.load %arg7[%c0_29, %c0_30, %c0_31] : memref<16x16x8xf32, #tpu.memory_space<vmem>>, vector<16x16x8xf32>
    tpu.vector_store %arg7[%c0_29, %c0_30, %c0_31], %40 {strides = array<i32>} : memref<16x16x8xf32, #tpu.memory_space<vmem>>, vector<16x16x8xf32>,
    %c2_i32 = arith.constant 2 : i32
    %42 = arith.addi %1, %c2_i32 : i32
    %c0_32 = arith.constant 0 : index
    %43 = arith.index_cast %42 : i32 to index
    %c0_33 = arith.constant 0 : index
    %c0_34 = arith.constant 0 : index
    %44 = vector.load %arg3[%c0_32, %43, %c0_33, %c0_34] : memref<1x18x18x4xbf16, #tpu.memory_space<vmem>>, vector<1x16x18x4xbf16>
    %45 = vector.shape_cast %44 : vector<1x16x18x4xbf16> to vector<16x18x4xbf16>
    %46 = vector.extract_strided_slice %45 {offsets = [0, 0, 0], sizes = [16, 16, 4], strides = [1, 1, 1]} : vector<16x18x4xbf16> to vector<16x16x4xbf16>
    %c6 = arith.constant 6 : index
    %c0_35 = arith.constant 0 : index
    %c0_36 = arith.constant 0 : index
    %47 = vector.load %arg4[%c6, %c0_35, %c0_36] : memref<9x4x8xbf16, #tpu.memory_space<vmem>>, vector<1x4x8xbf16>
    %48 = vector.shape_cast %47 : vector<1x4x8xbf16> to vector<4x8xbf16>
    %cst_37 = arith.constant dense<0.000000e+00> : vector<16x16x8xf32>
    %49 = tpu.matmul %46, %48, %cst_37 {dimension_numbers = #tpu.dot_dimension_numbers<[2], [0], [0, 1], [1], [0, 0, 0, 1, 1, 1], [], []>} : vector<16x16x4xbf16>, vector<4x8xbf16>, vector<16x16x8xf32> -> vector<16x16x8xf32>
    %50 = vector.extract_strided_slice %45 {offsets = [0, 1, 0], sizes = [16, 16, 4], strides = [1, 1, 1]} : vector<16x18x4xbf16> to vector<16x16x4xbf16>
    %c7 = arith.constant 7 : index
    %c0_38 = arith.constant 0 : index
    %c0_39 = arith.constant 0 : index
    %51 = vector.load %arg4[%c7, %c0_38, %c0_39] : memref<9x4x8xbf16, #tpu.memory_space<vmem>>, vector<1x4x8xbf16>
    %52 = vector.shape_cast %51 : vector<1x4x8xbf16> to vector<4x8xbf16>
    %cst_40 = arith.constant dense<0.000000e+00> : vector<16x16x8xf32>
    %53 = tpu.matmul %50, %52, %cst_40 {dimension_numbers = #tpu.dot_dimension_numbers<[2], [0], [0, 1], [1], [0, 0, 0, 1, 1, 1], [], []>} : vector<16x16x4xbf16>, vector<4x8xbf16>, vector<16x16x8xf32> -> vector<16x16x8xf32>
    %54 = arith.addf %49, %53 : vector<16x16x8xf32>
    %55 = vector.extract_strided_slice %45 {offsets = [0, 2, 0], sizes = [16, 16, 4], strides = [1, 1, 1]} : vector<16x18x4xbf16> to vector<16x16x4xbf16>
    %c8 = arith.constant 8 : index
    %c0_41 = arith.constant 0 : index
    %c0_42 = arith.constant 0 : index
    %56 = vector.load %arg4[%c8, %c0_41, %c0_42] : memref<9x4x8xbf16, #tpu.memory_space<vmem>>, vector<1x4x8xbf16>
    %57 = vector.shape_cast %56 : vector<1x4x8xbf16> to vector<4x8xbf16>
    %cst_43 = arith.constant dense<0.000000e+00> : vector<16x16x8xf32>
    %58 = tpu.matmul %55, %57, %cst_43 {dimension_numbers = #tpu.dot_dimension_numbers<[2], [0], [0, 1], [1], [0, 0, 0, 1, 1, 1], [], []>} : vector<16x16x4xbf16>, vector<4x8xbf16>, vector<16x16x8xf32> -> vector<16x16x8xf32>
    %59 = arith.addf %54, %58 : vector<16x16x8xf32>
    %c0_44 = arith.constant 0 : index
    %c0_45 = arith.constant 0 : index
    %c0_46 = arith.constant 0 : index
    %60 = vector.load %arg7[%c0_44, %c0_45, %c0_46] : memref<16x16x8xf32, #tpu.memory_space<vmem>>, vector<16x16x8xf32>
    %61 = arith.addf %60, %59 : vector<16x16x8xf32>
    %c0_47 = arith.constant 0 : index
    %c0_48 = arith.constant 0 : index
    %c0_49 = arith.constant 0 : index
    %62 = vector.load %arg7[%c0_47, %c0_48, %c0_49] : memref<16x16x8xf32, #tpu.memory_space<vmem>>, vector<16x16x8xf32>
    tpu.vector_store %arg7[%c0_47, %c0_48, %c0_49], %61 {strides = array<i32>} : memref<16x16x8xf32, #tpu.memory_space<vmem>>, vector<16x16x8xf32>,
    %c0_50 = arith.constant 0 : index
    %c0_51 = arith.constant 0 : index
    %c0_52 = arith.constant 0 : index
    %63 = vector.load %arg7[%c0_50, %c0_51, %c0_52] : memref<16x16x8xf32, #tpu.memory_space<vmem>>, vector<16x16x8xf32>
    %c0_53 = arith.constant 0 : index
    %c0_54 = arith.constant 0 : index
    %64 = vector.load %arg5[%c0_53, %c0_54] : memref<2x8xf32, #tpu.memory_space<vmem>>, vector<1x8xf32>
    %65 = vector.shape_cast %64 : vector<1x8xf32> to vector<8xf32>
    %66 = vector.shape_cast %65 : vector<8xf32> to vector<1x1x8xf32>
    %67 = vector.broadcast %66 : vector<1x1x8xf32> to vector<16x16x8xf32>
    %68 = arith.mulf %63, %67 : vector<16x16x8xf32>
    %c1_55 = arith.constant 1 : index
    %c0_56 = arith.constant 0 : index
    %69 = vector.load %arg5[%c1_55, %c0_56] : memref<2x8xf32, #tpu.memory_space<vmem>>, vector<1x8xf32>
    %70 = vector.shape_cast %69 : vector<1x8xf32> to vector<8xf32>
    %71 = vector.shape_cast %70 : vector<8xf32> to vector<1x1x8xf32>
    %72 = vector.broadcast %71 : vector<1x1x8xf32> to vector<16x16x8xf32>
    %73 = arith.addf %68, %72 : vector<16x16x8xf32>
    %cst_57 = arith.constant 0.000000e+00 : f32
    %74 = vector.broadcast %cst_57 : f32 to vector<16x16x8xf32>
    %75 = arith.cmpf ogt, %73, %74 : vector<16x16x8xf32>
    %cst_58 = arith.constant 0.00999999977 : f32
    %76 = vector.broadcast %cst_58 : f32 to vector<16x16x8xf32>
    %77 = arith.mulf %76, %73 : vector<16x16x8xf32>
    %78 = arith.select %75, %73, %77 : vector<16x16x8xi1>, vector<16x16x8xf32>
    %c0_59 = arith.constant 0 : index
    %c0_60 = arith.constant 0 : index
    %c0_61 = arith.constant 0 : index
    %c0_62 = arith.constant 0 : index
    %79 = vector.load %arg6[%c0_59, %c0_60, %c0_61, %c0_62] : memref<1x16x16x8xf32, #tpu.memory_space<vmem>>, vector<1x16x16x8xf32>
    %80 = vector.shape_cast %79 : vector<1x16x16x8xf32> to vector<16x16x8xf32>
    %81 = vector.shape_cast %78 : vector<16x16x8xf32> to vector<1x16x16x8xf32>
    tpu.vector_store %arg6[%c0_59, %c0_60, %c0_61, %c0_62], %81 {strides = array<i32>} : memref<1x16x16x8xf32, #tpu.memory_space<vmem>>, vector<1x16x16x8xf32>,
    return
  }
  func.func @transform_0(%arg0: i32, %arg1: i32, %arg2: i32) -> (i32, i32, i32, i32) {
    %c0_i32 = arith.constant 0 : i32
    %c0_i32_0 = arith.constant 0 : i32
    %c0_i32_1 = arith.constant 0 : i32
    %c0_i32_2 = arith.constant 0 : i32
    return %arg0, %c0_i32, %c0_i32_0, %c0_i32_1 : i32, i32, i32, i32
  }
  func.func @transform_1(%arg0: i32, %arg1: i32, %arg2: i32) -> (i32, i32, i32) {
    %c0_i32 = arith.constant 0 : i32
    %c0_i32_0 = arith.constant 0 : i32
    %c0_i32_1 = arith.constant 0 : i32
    return %c0_i32, %c0_i32_0, %arg1 : i32, i32, i32
  }
  func.func @transform_2(%arg0: i32, %arg1: i32, %arg2: i32) -> (i32, i32) {
    %c0_i32 = arith.constant 0 : i32
    %c0_i32_0 = arith.constant 0 : i32
    return %c0_i32, %arg1 : i32, i32
  }
  func.func @transform_3(%arg0: i32, %arg1: i32, %arg2: i32) -> (i32, i32, i32, i32) {
    %c0_i32 = arith.constant 0 : i32
    %c0_i32_0 = arith.constant 0 : i32
    return %arg0, %arg2, %c0_i32, %arg1 : i32, i32, i32, i32
  }
}

</mosaic_0001>

<bundles_post_ra>
// kernel: conv_bn_lrelu.1
= control target key start
LH: loop header
LB: loop body
LE: loop exit
PB: predicated region body
PF: predicated region fallthrough
CT: control target
= control target key end

     0   :  { %s6415_s12 = smov 0   ;;  %s6417_s13 = smov 0   ;;  %s8400_s0 = inlined_call_operand.vmem [shape: bf16[2,18,18,4], index: 0, kind: input, shape index: {}]   ;;  %s8401_s1 = inlined_call_operand.vmem [shape: bf16[9,4,8], index: 1, kind: input, shape index: {}]   ;;  %s8402_s2 = inlined_call_operand.vmem [shape: f32[2,8], index: 2, kind: input, shape index: {}]   ;;  %s8403_s3 = inlined_call_operand.vmem [shape: f32[2,16,16,8], index: 3, kind: output, shape index: {}]  }
   0x1   :  { %s6419_s14 = smov 0  }
   0x2 LB: > { %s32_s15 = sadd.s32 1, %s6389_s13  ;;  %p5100_p0 = scmp.ge.s32.totalorder %s6393_s14, 1  ;;  %s6393_s14 = sphi %s6419_s14, %s13_s14   ;;  %s6389_s13 = sphi %s6417_s13, %s8506_s13   ;;  %s6385_s12 = sphi %s6415_s12, %s8505_s12  }
   0x3   : > { %p34_p1 = scmp.ge.s32.totalorder %s32_s15, 2  ;;  %p178_p2 = scmp.lt.s32.totalorder %s6393_s14, 3 }
   0x5   : > { %s8508_s15 = smov (%p34_p1, %s32_s15), 0  ;;  %p179_p3 = pnand %p5100_p0, %p178_p2 }
   0x7   : > { %182 = sbr.rel (%p179_p3) target bundleno = 640 (0x280), region = 32 }
   0xe   : > { %v298_v0 = vld [vmem:[%s8401_s1] sm:$0x3]  ;;  %vm785_vm0 = vcmask 1041408   ;;  %p218_p4 = scmp.lt.s32.totalorder %s6385_s12, 1  ;;  %v5104_v2 = vld [vmem:[%s8401_s1 + $0x2] sm:$0x3] }
   0xf   : > { %6203 = vmatprep.subr.msk.bf16.mxu0 %vm785_vm0, %v298_v0  ;;  %v6438_v1 = vsel %vm785_vm0, %v298_v0, 0  ;;  %6202 = vmatprep.subr.msk.bf16.mxu1 %vm785_vm0, %v5104_v2  ;;  %v787_v3 = vsel %vm785_vm0, %v5104_v2, 0  ;;  %v5169_v4 = vld [vmem:[%s8401_s1 + $0x4] sm:$0x3]  ;;  %v5430_v5 = vld [vmem:[%s8401_s1 + $0xe] sm:$0x3] }
  0x10   : > { %5737 = vmatpush3.bf16.msra.mxu0 %v6438_v1  ;;  %s8510_s12 = smov (!%p218_p4, %s6385_s12), 1  ;;  %5703 = vmatpush3.bf16.msra.mxu1 %v787_v3  ;;  %v6458_v6 = vld [vmem:[%s8401_s1 + $0x8] sm:$0x3]  ;;  %vm736_vm1 = vcmask 31744   ;;  %vm301_vm2 = vsmask.f32 3328 }
  0x11   : > { %6205 = vmatprep.subr.msk.bf16.mxu0 %vm785_vm0, %v5169_v4  ;;  %s6212_s26 = smul.u32 216, %s8510_s12  ;;  %6204 = vmatprep.subr.msk.bf16.mxu1 %vm785_vm0, %v298_v0  ;;  %vm302_vm3 = vsmask.f32 7440  ;;  %v1472_v7 = vsel %vm785_vm0, %v5169_v4, 0  ;;  %v6469_v8 = vsel %vm785_vm0, %v5430_v5, 0  ;;  %v6473_v9 = vsel %vm785_vm0, %v6458_v6, 0 }
  0x12   : > { %vm6544_vm4 = vmor %vm301_vm2, %vm302_vm3  ;;  %vm1260_vm5 = vcmask 1042432   ;;  %vm1261_vm6 = vcmask 1046532   ;;  %vm1667_vm8 = vcmask 64512   ;;  %s5548_s21 = sshll.u32 %s8510_s12, 8 }
  0x13   : > { %s6465_s29 = scalar_lea.vmem %s8400_s0, %s6212_s26  ;;  %vm6645_vm7 = vmor %vm1260_vm5, %vm1261_vm6  ;;  %s8164_s23 = scalar_lea.vmem %s8403_s3, %s5548_s21 }
  0x14   : > { %v6476_v10 = vld [vmem:[%s6465_s29] sm:$0xf]  ;;  %v6479_v11 = vld [vmem:[%s6465_s29 + $0x4] sm:$0xf]  ;;  %v6482_v12 = vld [vmem:[%s6465_s29 + $0xc] sm:$0xf] }
  0x15   : > { %v305_v13 = vshrl.u32 %v6476_v10, 16  ;;  %v308_v14 = vshll.u32 %v6476_v10, 16  ;;  %v318_v15 = vshrl.u32 %v6479_v11, 16  ;;  %v5137_v16 = vcombine.low %v6476_v10, %v6479_v11  ;;  %v6490_v17 = vld [vmem:[%s6465_s29 + $0x10] sm:$0xf] }
  0x16   : > { %v5170_v18 = vrot.slane %v6476_v10, 9  ;;  %v1265_v19 = vrot.slane %v6479_v11, 5  ;;  %v329_v20 = vshrl.u32 %v6482_v12, 16  ;;  %v332_v21 = vshll.u32 %v6482_v12, 16  ;;  %v6497_v22 = vld [vmem:[%s6465_s29 + $0x18] sm:$0xf] }
  0x17   : > { %5738 = vmatprep.mubr.msk.bf16.mxu0 %vm736_vm1, %v5137_v16  ;;  %v342_v23 = vshrl.u32 %v6490_v17, 16  ;;  %v5138_v24 = vcombine.low %v6482_v12, %v6490_v17  ;;  %v5171_v25 = vrot.slane %v6482_v12, 9  ;;  %v1272_v26 = vrot.slane %v6490_v17, 5  ;;  %v6506_v27 = vld [vmem:[%s6465_s29 + $0x1c] sm:$0xf] }
  0x18   : > { %v6510_v28 = vrot.slane %v1265_v19, 4  ;;  %v353_v29 = vshrl.u32 %v6497_v22, 16  ;;  %v356_v30 = vshll.u32 %v6497_v22, 16  ;;  %v366_v31 = vshrl.u32 %v6506_v27, 16  ;;  %v6516_v32 = vld [vmem:[%s6465_s29 + $0x8] sm:$0x1] }
  0x19   : > { %5739 = vmatmul.mubr.msk.bf16.vlgmr.msra.gmra.mrb[0].mxu0 %vm736_vm1, %v5138_v24  ;;  %v6521_v33 = vrot.slane %v1272_v26, 4  ;;  %v5139_v34 = vcombine.low %v6497_v22, %v6506_v27  ;;  %v307_v35 = vrot.slane %v305_v13, 4  ;;  %v310_v36 = vrot.slane %v308_v14, 5  ;;  %v6526_v37 = vld [vmem:[%s6465_s29 + $0x24] sm:$0xf] }
  0x1a   : > { %v314_v38 = vshll.u32 %v6479_v11, 16  ;;  %v320_v39 = vrot.slane %v318_v15, 4  ;;  %v324_v40 = vshll.u32 %v6516_v32, 16  ;;  %v1268_v41 = vrot.slane %v6516_v32, 5  ;;  %v6532_v42 = vld [vmem:[%s6465_s29 + $0x28] sm:$0xf]  ;;  %5771 = vmatpush3.bf16.msra.mxu0 %v1472_v7 }
  0x1b   : > { %5742 = vmatprep.mubr.msk.bf16.mxu0 %vm736_vm1, %v5139_v34  ;;  %v311_v43 = vor.u32 %v310_v36, %v307_v35  ;;  %v377_v44 = vshrl.u32 %v6526_v37, 16  ;;  %v380_v45 = vshll.u32 %v6526_v37, 16  ;;  %v390_v46 = vshrl.u32 %v6532_v42, 16  ;;  %v6539_v47 = vld [vmem:[%s6465_s29 + $0x14] sm:$0x1]  ;;  %6209 = vmatprep.subr.msk.bf16.mxu0 %vm785_vm0, %v5430_v5 }
  0x1c   : > { %v316_v49 = vrot.slane %v314_v38, 5  ;;  %v326_v50 = vrot.slane %v324_v40, 5  ;;  %v5140_v51 = vcombine.low %v6526_v37, %v6532_v42  ;;  %v331_v52 = vrot.slane %v329_v20, 4  ;;  %v6551_v53 = vld [vmem:[%s6465_s29 + $0x30] sm:$0xf] }
  0x1d   : > { %v312_v54 = vrot.slane %v311_v43, 4  ;;  %v334_v55 = vrot.slane %v332_v21, 5  ;;  %v338_v56 = vshll.u32 %v6490_v17, 16  ;;  %v344_v57 = vrot.slane %v342_v23, 4  ;;  %v6555_v58 = vld [vmem:[%s6465_s29 + $0x34] sm:$0xf] }
  0x1e   : > { %v321_v59 = vor.u32 %v320_v39, %v316_v49  ;;  %v348_v60 = vshll.u32 %v6539_v47, 16  ;;  %v1275_v61 = vrot.slane %v6539_v47, 5  ;;  %v401_v62 = vshrl.u32 %v6551_v53, 16  ;;  %v6564_v4 = vld [vmem:[%s6465_s29 + $0x20] sm:$0x1] }
  0x1f   : > { %v317_v63 = vsel %vm6544_vm4, %v312_v54, %v316_v49  ;;  %v335_v0 = vor.u32 %v334_v55, %v331_v52  ;;  %v340_v2 = vrot.slane %v338_v56, 5  ;;  %v404_v3 = vshll.u32 %v6551_v53, 16  ;;  %v6571_v23 = vld [vmem:[%s6465_s29 + $0x3c] sm:$0xf]  ;;  %v6579_v38 = vld [vmem:[%s6465_s29 + $0x40] sm:$0xf] }
  0x20   : > { %v322_v5 = vrot.slane %v321_v59, 4  ;;  %v350_v7 = vrot.slane %v348_v60, 5  ;;  %v414_v13 = vshrl.u32 %v6555_v58, 16  ;;  %v5141_v14 = vcombine.low %v6551_v53, %v6555_v58 }
  0x21   : > { %5743 = vmatmul.mubr.msk.bf16.gmra.mrb[4].mxu0 %vm736_vm1, %v5140_v51  ;;  %v336_v15 = vrot.slane %v335_v0, 4  ;;  %v345_v16 = vor.u32 %v344_v57, %v340_v2  ;;  %v355_v20 = vrot.slane %v353_v29, 4  ;;  %v358_v21 = vrot.slane %v356_v30, 5  ;;  %v6586_v51 = vld [vmem:[%s6465_s29 + $0x2c] sm:$0x1] }
  0x22   : > { %v327_v24 = vsel %vm6544_vm4, %v322_v5, %v326_v50  ;;  %5746 = vmatprep.mubr.msk.bf16.mxu0 %vm736_vm1, %v5141_v14  ;;  %v362_v34 = vshll.u32 %v6506_v27, 16  ;;  %v368_v35 = vrot.slane %v366_v31, 4  ;;  %v372_v36 = vshll.u32 %v6564_v4, 16  ;;  %v6595_v57 = vld [vmem:[%s6465_s29 + $0x48] sm:$0xf] }
  0x23   : > { %v5105_v39 = vcombine.low %v317_v63, %v327_v24  ;;  %v341_v29 = vsel %vm6544_vm4, %v336_v15, %v340_v2  ;;  %v346_v30 = vrot.slane %v345_v16, 4  ;;  %v359_v40 = vor.u32 %v358_v21, %v355_v20  ;;  %v6598_v2 = vld [vmem:[%s6465_s29 + $0x4c] sm:$0xf]  ;;  %v6610_v21 = vld [vmem:[%s6465_s29 + $0x38] sm:$0x1] }
  0x24   : > { %v364_v43 = vrot.slane %v362_v34, 5  ;;  %v374_v49 = vrot.slane %v372_v36, 5  ;;  %v425_v50 = vshrl.u32 %v6571_v23, 16  ;;  %v428_v31 = vshll.u32 %v6571_v23, 16  ;;  %v6618_v36 = vld [vmem:[%s6465_s29 + $0x54] sm:$0xf] }
  0x25   : > { %5704 = vmatprep.mubr.msk.bf16.mxu1 %vm736_vm1, %v5105_v39  ;;  %v351_v52 = vsel %vm6544_vm4, %v346_v30, %v350_v7  ;;  %v360_v54 = vrot.slane %v359_v40, 4  ;;  %v438_v55 = vshrl.u32 %v6579_v38, 16  ;;  %v5142_v56 = vcombine.low %v6571_v23, %v6579_v38 }
  0x26   : > { %v5106_v59 = vcombine.low %v341_v29, %v351_v52  ;;  %v369_v60 = vor.u32 %v368_v35, %v364_v43  ;;  %v379_v63 = vrot.slane %v377_v44, 4  ;;  %v382_v0 = vrot.slane %v380_v45, 5 }
  0x27   : > { %v365_v5 = vsel %vm6544_vm4, %v360_v54, %v364_v43  ;;  %v386_v7 = vshll.u32 %v6532_v42, 16  ;;  %v392_v14 = vrot.slane %v390_v46, 4  ;;  %v396_v15 = vshll.u32 %v6586_v51, 16 }
  0x28   : > { %5705 = vmatmul.mubr.msk.bf16.vlgmr.msra.gmra.mrb[0].mxu1 %vm736_vm1, %v5106_v59  ;;  %v370_v16 = vrot.slane %v369_v60, 4  ;;  %v383_v20 = vor.u32 %v382_v0, %v379_v63  ;;  %v449_v44 = vshrl.u32 %v6595_v57, 16  ;;  %v452_v45 = vshll.u32 %v6595_v57, 16 }
  0x29   : > { %6009 = vmatpush3.bf16.msra.mxu1 %v6438_v1  ;;  %5747 = vmatmul.mubr.msk.bf16.gmra.mrb[8].mxu0 %vm736_vm1, %v5142_v56  ;;  %v388_v24 = vrot.slane %v386_v7, 5  ;;  %v398_v34 = vrot.slane %v396_v15, 5  ;;  %v462_v46 = vshrl.u32 %v6598_v2, 16  ;;  %v5143_v35 = vcombine.low %v6595_v57, %v6598_v2  ;;  %v6625_v1 = vld [vmem:[%s6465_s29 + $0x58] sm:$0xf] }
  0x2a   : > { %v375_v39 = vsel %vm6544_vm4, %v370_v16, %v374_v49  ;;  %v384_v29 = vrot.slane %v383_v20, 4  ;;  %v403_v30 = vrot.slane %v401_v62, 4  ;;  %v406_v40 = vrot.slane %v404_v3, 5  ;;  %6206 = vmatprep.subr.msk.bf16.mxu1 %vm785_vm0, %v6458_v6 }
  0x2b   : > { %v5107_v43 = vcombine.low %v365_v5, %v375_v39  ;;  %v393_v52 = vor.u32 %v392_v14, %v388_v24  ;;  %5750 = vmatprep.mubr.msk.bf16.mxu0 %vm736_vm1, %v5143_v35  ;;  %v410_v54 = vshll.u32 %v6555_v58, 16  ;;  %v416_v56 = vrot.slane %v414_v13, 4  ;;  %v6639_v5 = vld [vmem:[%s6465_s29 + $0x44] sm:$0x1] }
  0x2c   : > { %v389_v49 = vsel %vm6544_vm4, %v384_v29, %v388_v24  ;;  %v407_v59 = vor.u32 %v406_v40, %v403_v30  ;;  %v420_v62 = vshll.u32 %v6610_v21, 16  ;;  %v473_v3 = vshrl.u32 %v6618_v36, 16 }
  0x2d   : > { %5708 = vmatprep.mubr.msk.bf16.mxu1 %vm736_vm1, %v5107_v43  ;;  %v394_v60 = vrot.slane %v393_v52, 4  ;;  %v412_v63 = vrot.slane %v410_v54, 5  ;;  %v476_v6 = vshll.u32 %v6618_v36, 16  ;;  %v486_v0 = vshrl.u32 %v6625_v1, 16 }
  0x2e   : > { %v408_v7 = vrot.slane %v407_v59, 4  ;;  %v422_v13 = vrot.slane %v420_v62, 5  ;;  %v5144_v14 = vcombine.low %v6618_v36, %v6625_v1  ;;  %v427_v15 = vrot.slane %v425_v50, 4 }
  0x2f   : > { %v8443_v16 = vmov 0  ;;  %v399_v20 = vsel %vm6544_vm4, %v394_v60, %v398_v34  ;;  %v417_v24 = vor.u32 %v416_v56, %v412_v63  ;;  %v430_v35 = vrot.slane %v428_v31, 5  ;;  %v6669_v56 = vld [vmem:[%s6465_s29 + $0x50] sm:$0x1] }
  0x30   : > { %v8444_v16 = vsel %vm6645_vm7, 4294967295, %v8443_v16  ;;  %v434_v39 = vshll.u32 %v6579_v38, 16  ;;  %v5108_v29 = vcombine.low %v389_v49, %v399_v20  ;;  %v413_v30 = vsel %vm6544_vm4, %v408_v7, %v412_v63 }
  0x31   : > { %8445 = vst [vmem:[#allocation3_spill] sm:$0xff] %v8444_v16  ;;  %v440_v40 = vrot.slane %v438_v55, 4  ;;  %v444_v50 = vshll.u32 %v6639_v5, 16  ;;  %v418_v43 = vrot.slane %v417_v24, 4  ;;  %5751 = vmatmul.mubr.msk.bf16.gmra.mrb[12].mxu0 %vm736_vm1, %v5144_v14  ;;  %v431_v52 = vor.u32 %v430_v35, %v427_v15  ;;  %v6691_v14 = vld [vmem:[%s6465_s29 + $0x5c] sm:$0x1] }
  0x32   : > { %v436_v54 = vrot.slane %v434_v39, 5  ;;  %v1266_v31 = vsel %vm6645_vm7, %v5170_v18, %v1265_v19  ;;  %5709 = vmatmul.mubr.msk.bf16.gmra.mrb[4].mxu1 %vm736_vm1, %v5108_v29  ;;  %v1269_v55 = vsel %vm6645_vm7, %v6510_v28, %v1268_v41  ;;  %v451_v49 = vrot.slane %v449_v44, 4  ;;  %v6699_v39 = vld [vmem:[%s6465_s29 + $0x60] sm:$0xf] }
  0x33   : > { %v446_v34 = vrot.slane %v444_v50, 5  ;;  %v454_v59 = vrot.slane %v452_v45, 5  ;;  %v423_v11 = vsel %vm6544_vm4, %v418_v43, %v422_v13  ;;  %v432_v10 = vrot.slane %v431_v52, 4 }
  0x34   : > { %v441_v62 = vor.u32 %v440_v40, %v436_v54  ;;  %v5186_v18 = vcombine.low %v1266_v31, %v1269_v55  ;;  %v5109_v19 = vcombine.low %v413_v30, %v423_v11  ;;  %v458_v63 = vshll.u32 %v6598_v2, 16 }
  0x35   : > { %v455_v60 = vor.u32 %v454_v59, %v451_v49  ;;  %v464_v32 = vrot.slane %v462_v46, 4  ;;  %v437_v7 = vsel %vm6544_vm4, %v432_v10, %v436_v54  ;;  %v468_v41 = vshll.u32 %v6669_v56, 16  ;;  %v6709_v54 = vld [vmem:[%s6465_s29 + $0x64] sm:$0xf] }
  0x36   : > { %v442_v28 = vrot.slane %v441_v62, 4  ;;  %5772 = vmatprep.mubr.msk.bf16.mxu0 %vm736_vm1, %v5186_v18  ;;  %v1273_v44 = vsel %vm6645_vm7, %v5171_v25, %v1272_v26  ;;  %5712 = vmatprep.mubr.msk.bf16.mxu1 %vm736_vm1, %v5109_v19  ;;  %v460_v46 = vrot.slane %v458_v63, 5  ;;  %v1276_v13 = vsel %vm6645_vm7, %v6521_v33, %v1275_v61 }
  0x37   : > { %v456_v45 = vrot.slane %v455_v60, 4  ;;  %v475_v15 = vrot.slane %v473_v3, 4  ;;  %v470_v17 = vrot.slane %v468_v41, 5  ;;  %v5187_v20 = vcombine.low %v1273_v44, %v1276_v13  ;;  %v6736_v13 = vld [vmem:[%s6465_s29 + $0x70] sm:$0xf] }
  0x38   : > { %v447_v12 = vsel %vm6544_vm4, %v442_v28, %v446_v34  ;;  %v478_v24 = vrot.slane %v476_v6, 5  ;;  %v465_v35 = vor.u32 %v464_v32, %v460_v46  ;;  %v482_v47 = vshll.u32 %v6625_v1, 16  ;;  %v6730_v28 = vld [vmem:[%s6465_s29 + $0x6c] sm:$0xf] }
  0x39   : > { %v5110_v25 = vcombine.low %v437_v7, %v447_v12  ;;  %v461_v26 = vsel %vm6544_vm4, %v456_v45, %v460_v46  ;;  %5773 = vmatmul.mubr.msk.bf16.vlgmr.msra.gmra.mrb[0].mxu0 %vm736_vm1, %v5187_v20  ;;  %v488_v61 = vrot.slane %v486_v0, 4  ;;  %v492_v3 = vshll.u32 %v6691_v14, 16 }
  0x3a   : > { %v479_v33 = vor.u32 %v478_v24, %v475_v15  ;;  %v5172_v29 = vrot.slane %v6497_v22, 9  ;;  %v466_v6 = vrot.slane %v465_v35, 4  ;;  %v484_v30 = vrot.slane %v482_v47, 5  ;;  %5907 = vmatpush3.bf16.msra.mxu0 %v6469_v8  ;;  %v6741_v24 = vld [vmem:[%s6465_s29 + $0x74] sm:$0x1] }
  0x3b   : > { %5713 = vmatmul.mubr.msk.bf16.gmra.mrb[8].mxu1 %vm736_vm1, %v5110_v25  ;;  %v1279_v40 = vrot.slane %v6506_v27, 5  ;;  %v1282_v50 = vrot.slane %v6564_v4, 5  ;;  %v494_v52 = vrot.slane %v492_v3, 5  ;;  %v497_v0 = vshrl.u32 %v6699_v39, 16  ;;  %v6718_v4 = vld [vmem:[%s6465_s29 + $0x68] sm:$0x1] }
  0x3c   : > { %v480_v43 = vrot.slane %v479_v33, 4  ;;  %v500_v31 = vshll.u32 %v6699_v39, 16  ;;  %v471_v22 = vsel %vm6544_vm4, %v466_v6, %v470_v17  ;;  %v489_v34 = vor.u32 %v488_v61, %v484_v30 }
  0x3d   : > { %v1280_v55 = vsel %vm6645_vm7, %v5172_v29, %v1279_v40  ;;  %v1281_v27 = vrot.slane %v1279_v40, 4  ;;  %v5111_v8 = vcombine.low %v461_v26, %v471_v22  ;;  %v499_v59 = vrot.slane %v497_v0, 4 }
  0x3e   : > { %v485_v49 = vsel %vm6544_vm4, %v480_v43, %v484_v30  ;;  %v502_v11 = vrot.slane %v500_v31, 5  ;;  %v490_v10 = vrot.slane %v489_v34, 4  ;;  %v506_v18 = vshll.u32 %v6709_v54, 16 }
  0x3f   : > { %v1283_v62 = vsel %vm6645_vm7, %v1281_v27, %v1282_v50  ;;  %v510_v19 = vshrl.u32 %v6709_v54, 16  ;;  %5716 = vmatprep.mubr.msk.bf16.mxu1 %vm736_vm1, %v5111_v8  ;;  %v516_v32 = vshll.u32 %v6718_v4, 16  ;;  %v5173_v7 = vrot.slane %v6526_v37, 9 }
  0x40   : > { %v5188_v60 = vcombine.low %v1280_v55, %v1283_v62  ;;  %v503_v63 = vor.u32 %v502_v11, %v499_v59  ;;  %v495_v41 = vsel %vm6544_vm4, %v490_v10, %v494_v52  ;;  %v508_v44 = vrot.slane %v506_v18, 5  ;;  %v6756_v52 = vld [vmem:[%s6465_s29 + $0x78] sm:$0xf]  ;;  %v6763_v55 = vld [vmem:[%s6465_s29 + $0x7c] sm:$0xf] }
  0x41   : > { %v512_v45 = vrot.slane %v510_v19, 4  ;;  %v1286_v46 = vrot.slane %v6532_v42, 5  ;;  %v5112_v15 = vcombine.low %v485_v49, %v495_v41  ;;  %v518_v17 = vrot.slane %v516_v32, 5  ;;  %v6768_v11 = vld [vmem:[%s6465_s29 + $0x80] sm:$0x1] }
  0x42   : > { %5776 = vmatprep.mubr.msk.bf16.mxu0 %vm736_vm1, %v5188_v60  ;;  %v504_v12 = vrot.slane %v503_v63, 4  ;;  %v1289_v20 = vrot.slane %v6586_v51, 5  ;;  %v521_v35 = vshrl.u32 %v6730_v28, 16  ;;  %v524_v47 = vshll.u32 %v6730_v28, 16 }
  0x43   : > { %v513_v37 = vor.u32 %v512_v45, %v508_v44  ;;  %v1287_v25 = vsel %vm6645_vm7, %v5173_v7, %v1286_v46  ;;  %v1288_v26 = vrot.slane %v1286_v46, 4  ;;  %5717 = vmatmul.mubr.msk.bf16.gmra.mrb[12].mxu1 %vm736_vm1, %v5112_v15  ;;  %v530_v51 = vshll.u32 %v6736_v13, 16 }
  0x44   : > { %v509_v42 = vsel %vm6544_vm4, %v504_v12, %v508_v44  ;;  %v534_v33 = vshrl.u32 %v6736_v13, 16  ;;  %v523_v29 = vrot.slane %v521_v35, 4  ;;  %v540_v6 = vshll.u32 %v6741_v24, 16  ;;  %v6781_v44 = vld [vmem:[%s6465_s29 + $0x84] sm:$0xf] }
  0x45   : > { %v514_v61 = vrot.slane %v513_v37, 4  ;;  %v1290_v3 = vsel %vm6645_vm7, %v1288_v26, %v1289_v20  ;;  %v526_v40 = vrot.slane %v524_v47, 5  ;;  %v532_v50 = vrot.slane %v530_v51, 5  ;;  %v6793_v35 = vld [vmem:[%s8401_s1 + $0xc] sm:$0x3] }
  0x46   : > { %v5189_v30 = vcombine.low %v1287_v25, %v1290_v3  ;;  %v536_v43 = vrot.slane %v534_v33, 4  ;;  %v542_v31 = vrot.slane %v540_v6, 5  ;;  %v5174_v22 = vrot.slane %v6551_v53, 9  ;;  %6210 = vmatprep.subr.msk.bf16.mxu0 %vm785_vm0, %v6793_v35 }
  0x47   : > { %v519_v0 = vsel %vm6544_vm4, %v514_v61, %v518_v17  ;;  %v1293_v34 = vrot.slane %v6555_v58, 5  ;;  %v527_v8 = vor.u32 %v526_v40, %v523_v29  ;;  %v1296_v59 = vrot.slane %v6610_v21, 5  ;;  %v6788_v17 = vld [vmem:[%s6465_s29 + $0x88] sm:$0xf]  ;;  %v6804_v29 = vld [vmem:[%s6465_s29 + $0x8c] sm:$0x1] }
  0x48   : > { %v5113_v27 = vcombine.low %v509_v42, %v519_v0  ;;  %5777 = vmatmul.mubr.msk.bf16.gmra.mrb[4].mxu0 %vm736_vm1, %v5189_v30  ;;  %v537_v49 = vor.u32 %v536_v43, %v532_v50  ;;  %v545_v53 = vshrl.u32 %v6756_v52, 16  ;;  %v548_v58 = vshll.u32 %v6756_v52, 16 }
  0x49   : > { %v1294_v10 = vsel %vm6645_vm7, %v5174_v22, %v1293_v34  ;;  %v1295_v62 = vrot.slane %v1293_v34, 4  ;;  %v528_v18 = vrot.slane %v527_v8, 4  ;;  %v554_v60 = vshll.u32 %v6763_v55, 16 }
  0x4a   : > { %5720 = vmatprep.mubr.msk.bf16.mxu1 %vm736_vm1, %v5113_v27  ;;  %v538_v19 = vrot.slane %v537_v49, 4  ;;  %v558_v63 = vshrl.u32 %v6763_v55, 16  ;;  %v547_v32 = vrot.slane %v545_v53, 4  ;;  %v550_v7 = vrot.slane %v548_v58, 5  ;;  %v6818_v49 = vld [vmem:[%s6465_s29 + $0x90] sm:$0xf] }
  0x4b   : > { %v1297_v21 = vsel %vm6645_vm7, %v1295_v62, %v1296_v59  ;;  %v564_v41 = vshll.u32 %v6768_v11, 16  ;;  %v533_v45 = vsel %vm6544_vm4, %v528_v18, %v532_v50  ;;  %v556_v12 = vrot.slane %v554_v60, 5  ;;  %v6824_v58 = vld [vmem:[%s6465_s29 + $0x94] sm:$0xf] }
  0x4c   : > { %v543_v46 = vsel %vm6544_vm4, %v538_v19, %v542_v31  ;;  %v5190_v15 = vcombine.low %v1294_v10, %v1297_v21  ;;  %v551_v37 = vor.u32 %v550_v7, %v547_v32  ;;  %v560_v25 = vrot.slane %v558_v63, 4  ;;  %v6828_v21 = vld [vmem:[%s6465_s29 + $0x98] sm:$0x1] }
  0x4d   : > { %v5114_v20 = vcombine.low %v533_v45, %v543_v46  ;;  %v566_v26 = vrot.slane %v564_v41, 5  ;;  %v5175_v42 = vrot.slane %v6571_v23, 9  ;;  %v1300_v47 = vrot.slane %v6579_v38, 5 }
  0x4e   : > { %5780 = vmatprep.mubr.msk.bf16.mxu0 %vm736_vm1, %v5190_v15  ;;  %v1303_v51 = vrot.slane %v6639_v5, 5  ;;  %v569_v33 = vshrl.u32 %v6781_v44, 16  ;;  %v552_v61 = vrot.slane %v551_v37, 4  ;;  %v561_v3 = vor.u32 %v560_v25, %v556_v12  ;;  %v6844_v25 = vld [vmem:[%s6465_s29 + $0x9c] sm:$0xf] }
  0x4f   : > { %5721 = vmatmul.mubr.msk.bf16.gmra.mrb[16].mxu1 %vm736_vm1, %v5114_v20  ;;  %v572_v6 = vshll.u32 %v6781_v44, 16  ;;  %v578_v23 = vshll.u32 %v6788_v17, 16  ;;  %v1301_v38 = vsel %vm6645_vm7, %v5175_v42, %v1300_v47  ;;  %v1302_v5 = vrot.slane %v1300_v47, 4 }
  0x50   : > { %v571_v30 = vrot.slane %v569_v33, 4  ;;  %v582_v40 = vshrl.u32 %v6788_v17, 16  ;;  %v557_v50 = vsel %vm6544_vm4, %v552_v61, %v556_v12  ;;  %v562_v43 = vrot.slane %v561_v3, 4  ;;  %v6849_v33 = vld [vmem:[%s6465_s29 + $0xa0] sm:$0xf] }
  0x51   : > { %v574_v0 = vrot.slane %v572_v6, 5  ;;  %v580_v31 = vrot.slane %v578_v23, 5  ;;  %v1304_v22 = vsel %vm6645_vm7, %v1302_v5, %v1303_v51  ;;  %v588_v27 = vshll.u32 %v6804_v29, 16 }
  0x52   : > { %v584_v34 = vrot.slane %v582_v40, 4  ;;  %v5176_v8 = vrot.slane %v6595_v57, 9  ;;  %v567_v59 = vsel %vm6544_vm4, %v562_v43, %v566_v26  ;;  %v5191_v10 = vcombine.low %v1301_v38, %v1304_v22  ;;  %v6858_v43 = vld [vmem:[%s6465_s29 + $0xa4] sm:$0x1] }
  0x53   : > { %v575_v62 = vor.u32 %v574_v0, %v571_v30  ;;  %v1307_v53 = vrot.slane %v6598_v2, 5  ;;  %v5115_v18 = vcombine.low %v557_v50, %v567_v59  ;;  %v590_v60 = vrot.slane %v588_v27, 5 }
  0x54   : > { %v585_v19 = vor.u32 %v584_v34, %v580_v31  ;;  %v1310_v63 = vrot.slane %v6669_v56, 5  ;;  %5781 = vmatmul.mubr.msk.bf16.gmra.mrb[8].mxu0 %vm736_vm1, %v5191_v10  ;;  %v593_v2 = vshrl.u32 %v6818_v49, 16  ;;  %v596_v45 = vshll.u32 %v6818_v49, 16 }
  0x55   : > { %v576_v57 = vrot.slane %v575_v62, 4  ;;  %v1308_v32 = vsel %vm6645_vm7, %v5176_v8, %v1307_v53  ;;  %v1309_v7 = vrot.slane %v1307_v53, 4  ;;  %5724 = vmatprep.mubr.msk.bf16.mxu1 %vm736_vm1, %v5115_v18  ;;  %v602_v56 = vshll.u32 %v6824_v58, 16 }
  0x56   : > { %v586_v41 = vrot.slane %v585_v19, 4  ;;  %v606_v46 = vshrl.u32 %v6824_v58, 16  ;;  %v595_v20 = vrot.slane %v593_v2, 4  ;;  %v612_v37 = vshll.u32 %v6828_v21, 16  ;;  %v6877_v2 = vld [vmem:[%s6465_s29 + $0xac] sm:$0xf] }
  0x57   : > { %v581_v15 = vsel %vm6544_vm4, %v576_v57, %v580_v31  ;;  %v1311_v12 = vsel %vm6645_vm7, %v1309_v7, %v1310_v63  ;;  %v598_v47 = vrot.slane %v596_v45, 5  ;;  %v604_v51 = vrot.slane %v602_v56, 5 }
  0x58   : > { %v591_v26 = vsel %vm6544_vm4, %v586_v41, %v590_v60  ;;  %v5192_v42 = vcombine.low %v1308_v32, %v1311_v12  ;;  %v608_v3 = vrot.slane %v606_v46, 4  ;;  %v614_v6 = vrot.slane %v612_v37, 5  ;;  %v6872_v60 = vld [vmem:[%s6465_s29 + $0xa8] sm:$0xf] }
  0x59   : > { %v5116_v61 = vcombine.low %v581_v15, %v591_v26  ;;  %v5177_v23 = vrot.slane %v6618_v36, 9  ;;  %v599_v38 = vor.u32 %v598_v47, %v595_v20  ;;  %v1314_v5 = vrot.slane %v6625_v1, 5  ;;  %v6888_v47 = vld [vmem:[%s6465_s29 + $0xb0] sm:$0x1] }
  0x5a   : > { %5784 = vmatprep.mubr.msk.bf16.mxu0 %vm736_vm1, %v5192_v42  ;;  %v1317_v30 = vrot.slane %v6691_v14, 5  ;;  %v617_v40 = vshrl.u32 %v6844_v25, 16  ;;  %v609_v50 = vor.u32 %v608_v3, %v604_v51  ;;  %v620_v0 = vshll.u32 %v6844_v25, 16 }
  0x5b   : > { %5725 = vmatmul.mubr.msk.bf16.gmra.mrb[20].mxu1 %vm736_vm1, %v5116_v61  ;;  %v626_v31 = vshll.u32 %v6849_v33, 16  ;;  %v630_v36 = vshrl.u32 %v6849_v33, 16  ;;  %v600_v22 = vrot.slane %v599_v38, 4  ;;  %v1315_v1 = vsel %vm6645_vm7, %v5177_v23, %v1314_v5  ;;  %v6897_v38 = vld [vmem:[%s6465_s29 + $0xb4] sm:$0xf] }
  0x5c   : > { %v1316_v14 = vrot.slane %v1314_v5, 4  ;;  %v619_v34 = vrot.slane %v617_v40, 4  ;;  %v610_v27 = vrot.slane %v609_v50, 4  ;;  %v622_v8 = vrot.slane %v620_v0, 5  ;;  %v6902_v0 = vld [vmem:[%s6465_s29 + $0xb8] sm:$0xf] }
  0x5d   : > { %v628_v59 = vrot.slane %v626_v31, 5  ;;  %v632_v10 = vrot.slane %v630_v36, 4  ;;  %v605_v62 = vsel %vm6544_vm4, %v600_v22, %v604_v51  ;;  %v636_v18 = vshll.u32 %v6858_v43, 16 }
  0x5e   : > { %v1318_v53 = vsel %vm6645_vm7, %v1316_v14, %v1317_v30  ;;  %v5178_v19 = vrot.slane %v6699_v39, 9  ;;  %v615_v63 = vsel %vm6544_vm4, %v610_v27, %v614_v6  ;;  %v623_v32 = vor.u32 %v622_v8, %v619_v34 }
  0x5f   : > { %v5193_v57 = vcombine.low %v1315_v1, %v1318_v53  ;;  %v633_v7 = vor.u32 %v632_v10, %v628_v59  ;;  %v5117_v41 = vcombine.low %v605_v62, %v615_v63  ;;  %v638_v45 = vrot.slane %v636_v18, 5  ;;  %v6912_v62 = vld [vmem:[%s6465_s29 + $0xbc] sm:$0x1] }
  0x60   : > { %v1321_v56 = vrot.slane %v6709_v54, 5  ;;  %v1324_v46 = vrot.slane %v6718_v4, 5  ;;  %v624_v15 = vrot.slane %v623_v32, 4  ;;  %v641_v20 = vshrl.u32 %v6872_v60, 16 }
  0x61   : > { %5785 = vmatmul.mubr.msk.bf16.gmra.mrb[12].mxu0 %vm736_vm1, %v5193_v57  ;;  %v634_v12 = vrot.slane %v633_v7, 4  ;;  %v644_v37 = vshll.u32 %v6872_v60, 16  ;;  %5728 = vmatprep.mubr.msk.bf16.mxu1 %vm736_vm1, %v5117_v41  ;;  %v650_v4 = vshll.u32 %v6877_v2, 16  ;;  %v654_v51 = vshrl.u32 %v6877_v2, 16 }
  0x62   : > { %v1322_v26 = vsel %vm6645_vm7, %v5178_v19, %v1321_v56  ;;  %v1323_v42 = vrot.slane %v1321_v56, 4  ;;  %v629_v61 = vsel %vm6544_vm4, %v624_v15, %v628_v59  ;;  %v643_v6 = vrot.slane %v641_v20, 4 }
  0x63   : > { %v639_v3 = vsel %vm6544_vm4, %v634_v12, %v638_v45  ;;  %v646_v23 = vrot.slane %v644_v37, 5  ;;  %v652_v40 = vrot.slane %v650_v4, 5  ;;  %v656_v50 = vrot.slane %v654_v51, 4 }
  0x64   : > { %v5118_v5 = vcombine.low %v629_v61, %v639_v3  ;;  %v1325_v30 = vsel %vm6645_vm7, %v1323_v42, %v1324_v46  ;;  %v660_v22 = vshll.u32 %v6888_v47, 16  ;;  %v5179_v1 = vrot.slane %v6730_v28, 9 }
  0x65   : > { %v5194_v31 = vcombine.low %v1322_v26, %v1325_v30  ;;  %v647_v36 = vor.u32 %v646_v23, %v643_v6  ;;  %v657_v14 = vor.u32 %v656_v50, %v652_v40  ;;  %v1328_v34 = vrot.slane %v6736_v13, 5 }
  0x66   : > { %5729 = vmatmul.mubr.msk.bf16.gmra.mrb[24].mxu1 %vm736_vm1, %v5118_v5  ;;  %v1331_v27 = vrot.slane %v6741_v24, 5  ;;  %v665_v8 = vshrl.u32 %v6897_v38, 16  ;;  %v662_v10 = vrot.slane %v660_v22, 5  ;;  %v668_v53 = vshll.u32 %v6897_v38, 16 }
  0x67   : > { %5788 = vmatprep.mubr.msk.bf16.mxu0 %vm736_vm1, %v5194_v31  ;;  %v648_v59 = vrot.slane %v647_v36, 4  ;;  %v674_v18 = vshll.u32 %v6902_v0, 16  ;;  %v658_v19 = vrot.slane %v657_v14, 4  ;;  %v1329_v63 = vsel %vm6645_vm7, %v5179_v1, %v1328_v34 }
  0x68   : > { %v1330_v57 = vrot.slane %v1328_v34, 4  ;;  %v667_v32 = vrot.slane %v665_v8, 4  ;;  %v670_v7 = vrot.slane %v668_v53, 5  ;;  %v678_v45 = vshrl.u32 %v6902_v0, 16 }
  0x69   : > { %v653_v24 = vsel %vm6544_vm4, %v648_v59, %v652_v40  ;;  %v676_v41 = vrot.slane %v674_v18, 5  ;;  %v663_v56 = vsel %vm6544_vm4, %v658_v19, %v662_v10  ;;  %v684_v15 = vshll.u32 %v6912_v62, 16 }
  0x6a   : > { %v1332_v46 = vsel %vm6645_vm7, %v1330_v57, %v1331_v27  ;;  %v5180_v12 = vrot.slane %v6756_v52, 9  ;;  %v5119_v20 = vcombine.low %v653_v24, %v663_v56  ;;  %v671_v26 = vor.u32 %v670_v7, %v667_v32 }
  0x6b   : > { %v5195_v37 = vcombine.low %v1329_v63, %v1332_v46  ;;  %v680_v42 = vrot.slane %v678_v45, 4  ;;  %v686_v4 = vrot.slane %v684_v15, 5  ;;  %v1335_v51 = vrot.slane %v6763_v55, 5  ;;  %v5381_v45 = vld [vmem:[%s6465_s29 + $0x18] sm:$0xf] }
  0x6c   : > { %v1338_v61 = vrot.slane %v6768_v11, 5  ;;  %v5145_v3 = vcombine.low %v6699_v39, %v6709_v54  ;;  %5732 = vmatprep.mubr.msk.bf16.mxu1 %vm736_vm1, %v5119_v20  ;;  %v672_v6 = vrot.slane %v671_v26, 4  ;;  %v5181_v5 = vrot.slane %v6781_v44, 9  ;;  %v5382_v26 = vld [vmem:[%s6465_s29 + $0x1c] sm:$0xf] }
  0x6d   : > { %5789 = vmatmul.mubr.msk.bf16.gmra.mrb[16].mxu0 %vm736_vm1, %v5195_v37  ;;  %v681_v23 = vor.u32 %v680_v42, %v676_v41  ;;  %v1342_v30 = vrot.slane %v6788_v17, 5  ;;  %v1336_v40 = vsel %vm6645_vm7, %v5180_v12, %v1335_v51  ;;  %v1337_v50 = vrot.slane %v1335_v51, 4 }
  0x6e   : > { %v1345_v31 = vrot.slane %v6804_v29, 5  ;;  %v5146_v11 = vcombine.low %v6730_v28, %v6736_v13  ;;  %v677_v39 = vsel %vm6544_vm4, %v672_v6, %v676_v41  ;;  %v5182_v14 = vrot.slane %v6818_v49, 9 }
  0x6f   : > { %v682_v54 = vrot.slane %v681_v23, 4  ;;  %v1343_v36 = vsel %vm6645_vm7, %v5181_v5, %v1342_v30  ;;  %v1344_v22 = vrot.slane %v1342_v30, 4  ;;  %v1339_v1 = vsel %vm6645_vm7, %v1337_v50, %v1338_v61  ;;  %v5383_v61 = vld [vmem:[%s6465_s29 + $0x20] sm:$0x1] }
  0x70   : > { %v1349_v34 = vrot.slane %v6824_v58, 5  ;;  %v1352_v29 = vrot.slane %v6828_v21, 5  ;;  %v5196_v8 = vcombine.low %v1336_v40, %v1339_v1  ;;  %v5147_v10 = vcombine.low %v6756_v52, %v6763_v55  ;;  %v5384_v40 = vld [vmem:[%s6465_s29 + $0x24] sm:$0xf] }
  0x71   : > { %v687_v27 = vsel %vm6544_vm4, %v682_v54, %v686_v4  ;;  %v1346_v59 = vsel %vm6645_vm7, %v1344_v22, %v1345_v31  ;;  %v5183_v21 = vrot.slane %v6844_v25, 9  ;;  %v1356_v57 = vrot.slane %v6849_v33, 5  ;;  %v5385_v54 = vld [vmem:[%s6465_s29 + $0x28] sm:$0xf] }
  0x72   : > { %v5120_v53 = vcombine.low %v677_v39, %v687_v27  ;;  %v5197_v18 = vcombine.low %v1343_v36, %v1346_v59  ;;  %v1350_v19 = vsel %vm6645_vm7, %v5182_v14, %v1349_v34  ;;  %v1351_v63 = vrot.slane %v1349_v34, 4  ;;  %5792 = vmatprep.mubr.msk.bf16.mxu0 %vm736_vm1, %v5196_v8  ;;  %v5386_v34 = vld [vmem:[%s6465_s29 + $0x2c] sm:$0x1] }
  0x73   : > { %v1359_v32 = vrot.slane %v6858_v43, 5  ;;  %v5148_v24 = vcombine.low %v6781_v44, %v6788_v17  ;;  %v5184_v55 = vrot.slane %v6872_v60, 9  ;;  %v1363_v7 = vrot.slane %v6877_v2, 5 }
  0x74   : > { %5733 = vmatmul.mubr.msk.bf16.gmra.mrb[28].mxu1 %vm736_vm1, %v5120_v53  ;;  %v1353_v52 = vsel %vm6645_vm7, %v1351_v63, %v1352_v29  ;;  %v1366_v41 = vrot.slane %v6888_v47, 5  ;;  %v1357_v56 = vsel %vm6645_vm7, %v5183_v21, %v1356_v57  ;;  %v1358_v46 = vrot.slane %v1356_v57, 4  ;;  %v7008_v53 = vld [vmem:[%s8401_s1 + $0x6] sm:$0x3]  ;;  %v5387_v57 = vld [vmem:[%s6465_s29 + $0x30] sm:$0xf] }
  0x75   : > { %5754 = vmatprep.mubr.msk.bf16.mxu1 %vm736_vm1, %v5145_v3  ;;  %5793 = vmatmul.mubr.msk.bf16.gmra.mrb[20].mxu0 %vm736_vm1, %v5197_v18  ;;  %v5198_v43 = vcombine.low %v1350_v19, %v1353_v52  ;;  %v5149_v15 = vcombine.low %v6818_v49, %v6824_v58  ;;  %v1364_v12 = vsel %vm6645_vm7, %v5184_v55, %v1363_v7  ;;  %v1365_v20 = vrot.slane %v1363_v7, 4 }
  0x76   : > { %v5185_v47 = vrot.slane %v6897_v38, 9  ;;  %v1370_v37 = vrot.slane %v6902_v0, 5  ;;  %v1360_v42 = vsel %vm6645_vm7, %v1358_v46, %v1359_v32  ;;  %v1373_v4 = vrot.slane %v6912_v62, 5 }
  0x77   : > { %5796 = vmatprep.mubr.msk.bf16.mxu0 %vm736_vm1, %v5198_v43  ;;  %v5150_v51 = vcombine.low %v6844_v25, %v6849_v33  ;;  %v3267_v3 = vshrl.u32 %v5381_v45, 16  ;;  %v5199_v6 = vcombine.low %v1357_v56, %v1360_v42  ;;  %v1367_v23 = vsel %vm6645_vm7, %v1365_v20, %v1366_v41  ;;  %v5388_v41 = vld [vmem:[%s6465_s29 + $0x34] sm:$0xf]  ;;  %v5389_v20 = vld [vmem:[%s6465_s29 + $0x38] sm:$0x1] }
  0x78   : > { %v6992_v5 = vsel %vm6645_vm7, %v5185_v47, %v1370_v37  ;;  %v1372_v30 = vrot.slane %v1370_v37, 4  ;;  %v5200_v50 = vcombine.low %v1364_v12, %v1367_v23  ;;  %v3270_v39 = vshll.u32 %v5381_v45, 16 }
  0x79   : > { %v3269_v31 = vrot.slane %v3267_v3, 4  ;;  %v3276_v62 = vshll.u32 %v5382_v26, 16  ;;  %v3280_v22 = vshrl.u32 %v5382_v26, 16  ;;  %v3286_v1 = vshll.u32 %v5383_v61, 16  ;;  %v5218_v3 = vld [vmem:[%s6465_s29 + $0xc] sm:$0xf] }
  0x7a   : > { %v6998_v36 = vsel %vm6645_vm7, %v1372_v30, %v1373_v4  ;;  %v5151_v14 = vcombine.low %v6872_v60, %v6877_v2  ;;  %v3272_v27 = vrot.slane %v3270_v39, 5  ;;  %v3291_v59 = vshrl.u32 %v5384_v40, 16 }
  0x7b   : > { %v5201_v29 = vcombine.low %v6992_v5, %v6998_v36  ;;  %v3278_v8 = vrot.slane %v3276_v62, 5  ;;  %v3282_v18 = vrot.slane %v3280_v22, 4  ;;  %v3288_v19 = vrot.slane %v3286_v1, 5  ;;  %v5220_v22 = vld [vmem:[%s6465_s29 + $0x14] sm:$0x1] }
  0x7c   : > { %5755 = vmatmul.mubr.msk.bf16.vlgmr.msra.gmra.mrb[16].mxu1 %vm736_vm1, %v5146_v11  ;;  %v3294_v63 = vshll.u32 %v5384_v40, 16  ;;  %v3300_v21 = vshll.u32 %v5385_v54, 16  ;;  %v3273_v32 = vor.u32 %v3272_v27, %v3269_v31  ;;  %v3293_v52 = vrot.slane %v3291_v59, 4  ;;  %v5219_v40 = vld [vmem:[%s6465_s29 + $0x10] sm:$0xf] }
  0x7d   : > { %5805 = vmatpush3.bf16.msra.mxu1 %v6473_v9  ;;  %5758 = vmatprep.mubr.msk.bf16.mxu1 %vm736_vm1, %v5147_v10  ;;  %v3304_v55 = vshrl.u32 %v5385_v54, 16  ;;  %v3310_v7 = vshll.u32 %v5386_v34, 16  ;;  %v3283_v28 = vor.u32 %v3282_v18, %v3278_v8  ;;  %v5152_v45 = vcombine.low %v6897_v38, %v6902_v0 }
  0x7e   : > { %5797 = vmatmul.mubr.msk.bf16.gmra.mrb[24].mxu0 %vm736_vm1, %v5199_v6  ;;  %v3296_v13 = vrot.slane %v3294_v63, 5  ;;  %v3302_v11 = vrot.slane %v3300_v21, 5  ;;  %6207 = vmatprep.subr.msk.bf16.mxu1 %vm785_vm0, %v7008_v53  ;;  %v3274_v9 = vrot.slane %v3273_v32, 4  ;;  %v3315_v56 = vshrl.u32 %v5387_v57, 16  ;;  %v5391_v21 = vld [vmem:[%s6465_s29 + $0x40] sm:$0xf] }
  0x7f   : > { %5800 = vmatprep.mubr.msk.bf16.mxu0 %vm736_vm1, %v5200_v50  ;;  %v3306_v10 = vrot.slane %v3304_v55, 4  ;;  %v3312_v43 = vrot.slane %v3310_v7, 5  ;;  %v3284_v46 = vrot.slane %v3283_v28, 4  ;;  %v3318_v47 = vshll.u32 %v5387_v57, 16  ;;  %v5392_v55 = vld [vmem:[%s6465_s29 + $0x44] sm:$0x1] }
  0x80   : > { %v3297_v12 = vor.u32 %v3296_v13, %v3293_v52  ;;  %v3324_v37 = vshll.u32 %v5388_v41, 16  ;;  %v3279_v26 = vsel %vm6544_vm4, %v3274_v9, %v3278_v8  ;;  %v3317_v4 = vrot.slane %v3315_v56, 4  ;;  %v5221_v9 = vld [vmem:[%s6465_s29 + $0x18] sm:$0xf] }
  0x81   : > { %v3307_v42 = vor.u32 %v3306_v10, %v3302_v11  ;;  %v3328_v61 = vshrl.u32 %v5388_v41, 16  ;;  %v3289_v6 = vsel %vm6544_vm4, %v3284_v46, %v3288_v19  ;;  %v3320_v5 = vrot.slane %v3318_v47, 5 }
  0x82   : > { %v3298_v23 = vrot.slane %v3297_v12, 4  ;;  %v3326_v30 = vrot.slane %v3324_v37, 5  ;;  %v5431_v50 = vcombine.low %v3279_v26, %v3289_v6  ;;  %v3334_v62 = vshll.u32 %v5389_v20, 16  ;;  %v5222_v12 = vld [vmem:[%s6465_s29 + $0x1c] sm:$0xf] }
  0x83   : > { %v3308_v31 = vrot.slane %v3307_v42, 4  ;;  %v3330_v39 = vrot.slane %v3328_v61, 4  ;;  %v3321_v36 = vor.u32 %v3320_v5, %v3317_v4  ;;  %v1757_v1 = vshrl.u32 %v5218_v3, 16  ;;  %v5223_v61 = vld [vmem:[%s6465_s29 + $0x20] sm:$0x1] }
  0x84   : > { %5759 = vmatmul.mubr.msk.bf16.gmra.mrb[20].mxu1 %vm736_vm1, %v5148_v24  ;;  %v3303_v54 = vsel %vm6544_vm4, %v3298_v23, %v3302_v11  ;;  %v1760_v34 = vshll.u32 %v5218_v3, 16  ;;  %v3336_v44 = vrot.slane %v3334_v62, 5  ;;  %v1766_v17 = vshll.u32 %v5219_v40, 16  ;;  %v5390_v24 = vld [vmem:[%s6465_s29 + $0x3c] sm:$0xf] }
  0x85   : > { %5762 = vmatprep.mubr.msk.bf16.mxu1 %vm736_vm1, %v5149_v15  ;;  %v3313_v27 = vsel %vm6544_vm4, %v3308_v31, %v3312_v43  ;;  %v3331_v8 = vor.u32 %v3330_v39, %v3326_v30  ;;  %v3322_v18 = vrot.slane %v3321_v36, 4  ;;  %v1759_v19 = vrot.slane %v1757_v1, 4  ;;  %v5393_v31 = vld [vmem:[%s6465_s29 + $0x48] sm:$0xf]  ;;  %v5394_v62 = vld [vmem:[%s6465_s29 + $0x4c] sm:$0xf] }
  0x86   : > { %5801 = vmatmul.mubr.msk.bf16.gmra.mrb[28].mxu0 %vm736_vm1, %v5201_v29  ;;  %v5432_v59 = vcombine.low %v3303_v54, %v3313_v27  ;;  %v1762_v63 = vrot.slane %v1760_v34, 5  ;;  %v1768_v58 = vrot.slane %v1766_v17, 5  ;;  %v1770_v15 = vshrl.u32 %v5219_v40, 16  ;;  %v5395_v34 = vld [vmem:[%s6465_s29 + $0x50] sm:$0x1] }
  0x87   : > { %5908 = vmatprep.mubr.msk.bf16.mxu0 %vm736_vm1, %v5431_v50  ;;  %v3332_v49 = vrot.slane %v3331_v8, 4  ;;  %v1776_v57 = vshll.u32 %v5220_v22, 16  ;;  %v3327_v32 = vsel %vm6544_vm4, %v3322_v18, %v3326_v30  ;;  %v3339_v7 = vshrl.u32 %v5390_v24, 16 }
  0x88   : > { %v1763_v52 = vor.u32 %v1762_v63, %v1759_v19  ;;  %v3342_v29 = vshll.u32 %v5390_v24, 16  ;;  %v1772_v28 = vrot.slane %v1770_v15, 4  ;;  %v3348_v11 = vshll.u32 %v5391_v21, 16  ;;  %v5224_v63 = vld [vmem:[%s6465_s29 + $0x24] sm:$0xf] }
  0x89   : > { %v3337_v41 = vsel %vm6544_vm4, %v3332_v49, %v3336_v44  ;;  %v1778_v13 = vrot.slane %v1776_v57, 5  ;;  %v3341_v56 = vrot.slane %v3339_v7, 4  ;;  %v3352_v37 = vshrl.u32 %v5391_v21, 16  ;;  %v5225_v57 = vld [vmem:[%s6465_s29 + $0x28] sm:$0xf] }
  0x8a   : > { %v5433_v10 = vcombine.low %v3327_v32, %v3337_v41  ;;  %v1764_v43 = vrot.slane %v1763_v52, 4  ;;  %v3344_v46 = vrot.slane %v3342_v29, 5  ;;  %v1773_v20 = vor.u32 %v1772_v28, %v1768_v58  ;;  %v5226_v28 = vld [vmem:[%s6465_s29 + $0x2c] sm:$0x1] }
  0x8b   : > { %v3350_v47 = vrot.slane %v3348_v11, 5  ;;  %v3358_v26 = vshll.u32 %v5392_v55, 16  ;;  %v1781_v3 = vshrl.u32 %v5221_v9, 16  ;;  %v1784_v6 = vshll.u32 %v5221_v9, 16  ;;  %v5396_v9 = vld [vmem:[%s6465_s29 + $0x54] sm:$0xf] }
  0x8c   : > { %5763 = vmatmul.mubr.msk.bf16.gmra.mrb[24].mxu1 %vm736_vm1, %v5150_v51  ;;  %v1769_v42 = vsel %vm6544_vm4, %v1764_v43, %v1768_v58  ;;  %v3345_v4 = vor.u32 %v3344_v46, %v3341_v56  ;;  %v1774_v23 = vrot.slane %v1773_v20, 4  ;;  %v3354_v5 = vrot.slane %v3352_v37, 4 }
  0x8d   : > { %5766 = vmatprep.mubr.msk.bf16.mxu1 %vm736_vm1, %v5151_v14  ;;  %v3360_v30 = vrot.slane %v3358_v26, 5  ;;  %v1790_v25 = vshll.u32 %v5222_v12, 16  ;;  %v1783_v51 = vrot.slane %v1781_v3, 4  ;;  %v1786_v40 = vrot.slane %v1784_v6, 5 }
  0x8e   : > { %5909 = vmatmul.mubr.msk.bf16.vlgmr.msra.gmra.mrb[32].mxu0 %vm736_vm1, %v5432_v59  ;;  %v3346_v33 = vrot.slane %v3345_v4, 4  ;;  %v1794_v50 = vshrl.u32 %v5222_v12, 16  ;;  %v1779_v60 = vsel %vm6544_vm4, %v1774_v23, %v1778_v13  ;;  %v3355_v2 = vor.u32 %v3354_v5, %v3350_v47  ;;  %v5397_v12 = vld [vmem:[%s6465_s29 + $0x58] sm:$0xf] }
  0x8f   : > { %5912 = vmatprep.mubr.msk.bf16.mxu0 %vm736_vm1, %v5433_v10  ;;  %v1792_v14 = vrot.slane %v1790_v25, 5  ;;  %v1800_v39 = vshll.u32 %v5223_v61, 16  ;;  %v5268_v54 = vcombine.low %v1769_v42, %v1779_v60  ;;  %v1787_v22 = vor.u32 %v1786_v40, %v1783_v51  ;;  %v5228_v60 = vld [vmem:[%s6465_s29 + $0x34] sm:$0xf] }
  0x90   : > { %v3351_v36 = vsel %vm6544_vm4, %v3346_v33, %v3350_v47  ;;  %v1796_v1 = vrot.slane %v1794_v50, 4  ;;  %v3356_v27 = vrot.slane %v3355_v2, 4  ;;  %v2529_v44 = vsel %vm785_vm0, %v7008_v53, 0  ;;  %v5227_v33 = vld [vmem:[%s6465_s29 + $0x30] sm:$0xf] }
  0x91   : > { %v1802_v8 = vrot.slane %v1800_v39, 5  ;;  %v3363_v17 = vshrl.u32 %v5393_v31, 16  ;;  %v1788_v24 = vrot.slane %v1787_v22, 4  ;;  %v3366_v18 = vshll.u32 %v5393_v31, 16  ;;  %v5332_v2 = vld [vmem:[%s8401_s1 + $0xa] sm:$0x3] }
  0x92   : > { %v1797_v59 = vor.u32 %v1796_v1, %v1792_v14  ;;  %v3372_v19 = vshll.u32 %v5394_v62, 16  ;;  %v3361_v21 = vsel %vm6544_vm4, %v3356_v27, %v3360_v30  ;;  %v3376_v58 = vshrl.u32 %v5394_v62, 16  ;;  %v5398_v30 = vld [vmem:[%s6465_s29 + $0x5c] sm:$0x1] }
  0x93   : > { %v3365_v49 = vrot.slane %v3363_v17, 4  ;;  %v3382_v15 = vshll.u32 %v5395_v34, 16  ;;  %v5434_v53 = vcombine.low %v3351_v36, %v3361_v21  ;;  %v1793_v32 = vsel %vm6544_vm4, %v1788_v24, %v1792_v14  ;;  %v5229_v17 = vld [vmem:[%s6465_s29 + $0x38] sm:$0x1]  ;;  %v5399_v21 = vld [vmem:[%s6465_s29 + $0x60] sm:$0xf] }
  0x94   : > { %5767 = vmatmul.mubr.msk.bf16.gmra.mrb[28].mxu1 %vm736_vm1, %v5152_v45  ;;  %v1798_v52 = vrot.slane %v1797_v59, 4  ;;  %v3368_v55 = vrot.slane %v3366_v18, 5  ;;  %v3374_v7 = vrot.slane %v3372_v19, 5  ;;  %v3378_v29 = vrot.slane %v3376_v58, 4 }
  0x95   : > { %5806 = vmatprep.mubr.msk.bf16.mxu1 %vm736_vm1, %v5268_v54  ;;  %v3384_v41 = vrot.slane %v3382_v15, 5  ;;  %v1805_v13 = vshrl.u32 %v5224_v63, 16  ;;  %v1808_v45 = vshll.u32 %v5224_v63, 16  ;;  %v1814_v11 = vshll.u32 %v5225_v57, 16 }
  0x96   : > { %5913 = vmatmul.mubr.msk.bf16.gmra.mrb[36].mxu0 %vm736_vm1, %v5434_v53  ;;  %v1803_v38 = vsel %vm6544_vm4, %v1798_v52, %v1802_v8  ;;  %v3369_v0 = vor.u32 %v3368_v55, %v3365_v49  ;;  %v3379_v43 = vor.u32 %v3378_v29, %v3374_v7  ;;  %v1818_v46 = vshrl.u32 %v5225_v57, 16  ;;  %v5400_v53 = vld [vmem:[%s6465_s29 + $0x64] sm:$0xf] }
  0x97   : > { %v5269_v10 = vcombine.low %v1793_v32, %v1803_v38  ;;  %v1807_v56 = vrot.slane %v1805_v13, 4  ;;  %v1810_v47 = vrot.slane %v1808_v45, 5  ;;  %v1816_v37 = vrot.slane %v1814_v11, 5  ;;  %v7117_v32 = vld [vmem:[%s8401_s1 + $0x10] sm:$0x3] }
  0x98   : > { %v3370_v20 = vrot.slane %v3369_v0, 4  ;;  %v1824_v26 = vshll.u32 %v5226_v28, 16  ;;  %v3380_v42 = vrot.slane %v3379_v43, 4  ;;  %v1820_v4 = vrot.slane %v1818_v46, 4  ;;  %v5401_v13 = vld [vmem:[%s6465_s29 + $0x68] sm:$0x1] }
  0x99   : > { %v3387_v61 = vshrl.u32 %v5396_v9, 16  ;;  %v3390_v3 = vshll.u32 %v5396_v9, 16  ;;  %v1811_v23 = vor.u32 %v1810_v47, %v1807_v56  ;;  %v3396_v25 = vshll.u32 %v5397_v12, 16  ;;  %v7126_v43 = vld [vmem:[%s6465_s29 + $0x3c] sm:$0xf] }
  0x9a   : > { %v3375_v6 = vsel %vm6544_vm4, %v3370_v20, %v3374_v7  ;;  %v1826_v5 = vrot.slane %v1824_v26, 5  ;;  %v3385_v51 = vsel %vm6544_vm4, %v3380_v42, %v3384_v41  ;;  %v1821_v40 = vor.u32 %v1820_v4, %v1816_v37  ;;  %v7133_v20 = vld [vmem:[%s6465_s29 + $0x40] sm:$0xf] }
  0x9b   : > { %v3389_v50 = vrot.slane %v3387_v61, 4  ;;  %v3392_v31 = vrot.slane %v3390_v3, 5  ;;  %v5435_v14 = vcombine.low %v3375_v6, %v3385_v51  ;;  %v1812_v39 = vrot.slane %v1811_v23, 4 }
  0x9c   : > { %5807 = vmatmul.mubr.msk.bf16.vlgmr.msra.gmra.mrb[32].mxu1 %vm736_vm1, %v5269_v10  ;;  %v3398_v62 = vrot.slane %v3396_v25, 5  ;;  %v3400_v54 = vshrl.u32 %v5397_v12, 16  ;;  %v1822_v36 = vrot.slane %v1821_v40, 4  ;;  %v3406_v1 = vshll.u32 %v5398_v30, 16  ;;  %v5232_v30 = vld [vmem:[%s6465_s29 + $0x44] sm:$0x1] }
  0x9d   : > { %5839 = vmatpush3.bf16.msra.mxu1 %v2529_v44  ;;  %v3393_v22 = vor.u32 %v3392_v31, %v3389_v50  ;;  %v1829_v34 = vshrl.u32 %v5227_v33, 16  ;;  %5916 = vmatprep.mubr.msk.bf16.mxu0 %vm736_vm1, %v5435_v14  ;;  %v1817_v27 = vsel %vm6544_vm4, %v1812_v39, %v1816_v37  ;;  %v1832_v24 = vshll.u32 %v5227_v33, 16 }
  0x9e   : > { %v3402_v8 = vrot.slane %v3400_v54, 4  ;;  %v1838_v59 = vshll.u32 %v5228_v60, 16  ;;  %6208 = vmatprep.subr.msk.bf16.mxu1 %vm785_vm0, %v5332_v2  ;;  %v1827_v44 = vsel %vm6544_vm4, %v1822_v36, %v1826_v5  ;;  %v3408_v19 = vrot.slane %v3406_v1, 5  ;;  %v7149_v54 = vld [vmem:[%s6465_s29 + $0x70] sm:$0xf] }
  0x9f   : > { %v3394_v18 = vrot.slane %v3393_v22, 4  ;;  %v1831_v63 = vrot.slane %v1829_v34, 4  ;;  %v5270_v49 = vcombine.low %v1817_v27, %v1827_v44  ;;  %v1834_v15 = vrot.slane %v1832_v24, 5  ;;  %v7159_v44 = vld [vmem:[%s6465_s29 + $0x48] sm:$0xf] }
  0xa0   : > { %v3403_v58 = vor.u32 %v3402_v8, %v3398_v62  ;;  %v1840_v57 = vrot.slane %v1838_v59, 5  ;;  %v1842_v55 = vshrl.u32 %v5228_v60, 16  ;;  %v1848_v7 = vshll.u32 %v5229_v17, 16  ;;  %v7144_v60 = vld [vmem:[%s6465_s29 + $0x6c] sm:$0xf] }
  0xa1   : > { %v3399_v52 = vsel %vm6544_vm4, %v3394_v18, %v3398_v62  ;;  %v4039_v29 = vsel %vm785_vm0, %v6793_v35, 0  ;;  %5810 = vmatprep.mubr.msk.bf16.mxu1 %vm736_vm1, %v5270_v49  ;;  %v1835_v28 = vor.u32 %v1834_v15, %v1831_v63  ;;  %v3411_v38 = vshrl.u32 %v5399_v21, 16  ;;  %v5404_v17 = vld [vmem:[%s6465_s29 + $0x74] sm:$0x1] }
  0xa2   : > { %v3404_v41 = vrot.slane %v3403_v58, 4  ;;  %5941 = vmatpush3.bf16.msra.mxu0 %v4039_v29  ;;  %v3414_v0 = vshll.u32 %v5399_v21, 16  ;;  %v1844_v45 = vrot.slane %v1842_v55, 4  ;;  %v1850_v11 = vrot.slane %v1848_v7, 5 }
  0xa3   : > { %v3420_v9 = vshll.u32 %v5400_v53, 16  ;;  %v3424_v10 = vshrl.u32 %v5400_v53, 16  ;;  %6211 = vmatprep.subr.msk.bf16.mxu0 %vm785_vm0, %v7117_v32  ;;  %v1836_v56 = vrot.slane %v1835_v28, 4  ;;  %v3413_v46 = vrot.slane %v3411_v38, 4  ;;  %v7165_v53 = vld [vmem:[%s6465_s29 + $0x4c] sm:$0xf] }
  0xa4   : > { %v3409_v35 = vsel %vm6544_vm4, %v3404_v41, %v3408_v19  ;;  %v3416_v12 = vrot.slane %v3414_v0, 5  ;;  %v1845_v37 = vor.u32 %v1844_v45, %v1840_v57  ;;  %v3430_v3 = vshll.u32 %v5401_v13, 16  ;;  %v5235_v38 = vld [vmem:[%s6465_s29 + $0x50] sm:$0x1]  ;;  %v7174_v45 = vld [vmem:[%s6465_s29 + $0x78] sm:$0xf] }
  0xa5   : > { %v5436_v47 = vcombine.low %v3399_v52, %v3409_v35  ;;  %v3422_v26 = vrot.slane %v3420_v9, 5  ;;  %v3426_v42 = vrot.slane %v3424_v10, 4  ;;  %v1841_v4 = vsel %vm6544_vm4, %v1836_v56, %v1840_v57 }
  0xa6   : > { %v3417_v61 = vor.u32 %v3416_v12, %v3413_v46  ;;  %v1853_v6 = vshrl.u32 %v7126_v43, 16  ;;  %v1846_v23 = vrot.slane %v1845_v37, 4  ;;  %v1856_v25 = vshll.u32 %v7126_v43, 16  ;;  %v7180_v37 = vld [vmem:[%s6465_s29 + $0x7c] sm:$0xf] }
  0xa7   : > { %5917 = vmatmul.mubr.msk.bf16.gmra.mrb[40].mxu0 %vm736_vm1, %v5436_v47  ;;  %v3427_v5 = vor.u32 %v3426_v42, %v3422_v26  ;;  %v1862_v33 = vshll.u32 %v7133_v20, 16  ;;  %v3432_v40 = vrot.slane %v3430_v3, 5  ;;  %v1866_v31 = vshrl.u32 %v7133_v20, 16 }
  0xa8   : > { %v3418_v51 = vrot.slane %v3417_v61, 4  ;;  %v1855_v50 = vrot.slane %v1853_v6, 4  ;;  %v1851_v2 = vsel %vm6544_vm4, %v1846_v23, %v1850_v11  ;;  %v1858_v39 = vrot.slane %v1856_v25, 5 }
  0xa9   : > { %v3428_v14 = vrot.slane %v3427_v5, 4  ;;  %v1864_v62 = vrot.slane %v1862_v33, 5  ;;  %v5271_v36 = vcombine.low %v1841_v4, %v1851_v2  ;;  %v1868_v1 = vrot.slane %v1866_v31, 4  ;;  %v5407_v5 = vld [vmem:[%s6465_s29 + $0x80] sm:$0x1] }
  0xaa   : > { %v3423_v22 = vsel %vm6544_vm4, %v3418_v51, %v3422_v26  ;;  %v1872_v34 = vshll.u32 %v5232_v30, 16  ;;  %v1859_v8 = vor.u32 %v1858_v39, %v1855_v50  ;;  %v3435_v24 = vshrl.u32 %v7144_v60, 16  ;;  %v7191_v50 = vld [vmem:[%s6465_s29 + $0x54] sm:$0xf] }
  0xab   : > { %v3433_v27 = vsel %vm6544_vm4, %v3428_v14, %v3432_v40  ;;  %v3438_v59 = vshll.u32 %v7144_v60, 16  ;;  %5811 = vmatmul.mubr.msk.bf16.gmra.mrb[36].mxu1 %vm736_vm1, %v5271_v36  ;;  %v1869_v19 = vor.u32 %v1868_v1, %v1864_v62  ;;  %v3444_v21 = vshll.u32 %v7149_v54, 16 }
  0xac   : > { %v5437_v18 = vcombine.low %v3423_v22, %v3433_v27  ;;  %v1874_v63 = vrot.slane %v1872_v34, 5  ;;  %v1860_v49 = vrot.slane %v1859_v8, 4  ;;  %v3437_v58 = vrot.slane %v3435_v24, 4  ;;  %v5238_v24 = vld [vmem:[%s6465_s29 + $0x5c] sm:$0x1] }
  0xad   : > { %v3440_v15 = vrot.slane %v3438_v59, 5  ;;  %v3448_v57 = vshrl.u32 %v7149_v54, 16  ;;  %v1870_v52 = vrot.slane %v1869_v19, 4  ;;  %v3446_v55 = vrot.slane %v3444_v21, 5 }
  0xae   : > { %5920 = vmatprep.mubr.msk.bf16.mxu0 %vm736_vm1, %v5437_v18  ;;  %v3454_v7 = vshll.u32 %v5404_v17, 16  ;;  %v1877_v29 = vshrl.u32 %v7159_v44, 16  ;;  %v1865_v41 = vsel %vm6544_vm4, %v1860_v49, %v1864_v62  ;;  %v1880_v0 = vshll.u32 %v7159_v44, 16  ;;  %v7197_v62 = vld [vmem:[%s6465_s29 + $0x58] sm:$0xf] }
  0xaf   : > { %v3441_v28 = vor.u32 %v3440_v15, %v3437_v58  ;;  %v3450_v13 = vrot.slane %v3448_v57, 4  ;;  %v1875_v11 = vsel %vm6544_vm4, %v1870_v52, %v1874_v63  ;;  %v1886_v35 = vshll.u32 %v7165_v53, 16  ;;  %v7208_v52 = vld [vmem:[%s6465_s29 + $0x84] sm:$0xf] }
  0xb0   : > { %v3456_v9 = vrot.slane %v3454_v7, 5  ;;  %v1879_v10 = vrot.slane %v1877_v29, 4  ;;  %v5272_v56 = vcombine.low %v1865_v41, %v1875_v11  ;;  %v1882_v47 = vrot.slane %v1880_v0, 5 }
  0xb1   : > { %v3442_v46 = vrot.slane %v3441_v28, 4  ;;  %v3451_v12 = vor.u32 %v3450_v13, %v3446_v55  ;;  %v1888_v26 = vrot.slane %v1886_v35, 5  ;;  %v1890_v42 = vshrl.u32 %v7165_v53, 16  ;;  %v7213_v28 = vld [vmem:[%s6465_s29 + $0x88] sm:$0xf] }
  0xb2   : > { %v1896_v4 = vshll.u32 %v5235_v38, 16  ;;  %v3459_v61 = vshrl.u32 %v7174_v45, 16  ;;  %5814 = vmatprep.mubr.msk.bf16.mxu1 %vm736_vm1, %v5272_v56  ;;  %v1883_v23 = vor.u32 %v1882_v47, %v1879_v10  ;;  %v3462_v30 = vshll.u32 %v7174_v45, 16  ;;  %v5410_v35 = vld [vmem:[%s6465_s29 + $0x8c] sm:$0x1] }
  0xb3   : > { %v3447_v3 = vsel %vm6544_vm4, %v3442_v46, %v3446_v55  ;;  %v3452_v6 = vrot.slane %v3451_v12, 4  ;;  %v1892_v25 = vrot.slane %v1890_v42, 4  ;;  %v3468_v40 = vshll.u32 %v7180_v37, 16 }
  0xb4   : > { %v1898_v33 = vrot.slane %v1896_v4, 5  ;;  %v3461_v51 = vrot.slane %v3459_v61, 4  ;;  %v1884_v2 = vrot.slane %v1883_v23, 4  ;;  %v3464_v14 = vrot.slane %v3462_v30, 5  ;;  %v7226_v4 = vld [vmem:[%s6465_s29 + $0x60] sm:$0xf] }
  0xb5   : > { %v3457_v31 = vsel %vm6544_vm4, %v3452_v6, %v3456_v9  ;;  %v3472_v39 = vshrl.u32 %v7180_v37, 16  ;;  %v1893_v22 = vor.u32 %v1892_v25, %v1888_v26  ;;  %v3470_v1 = vrot.slane %v3468_v40, 5 }
  0xb6   : > { %v5438_v36 = vcombine.low %v3447_v3, %v3457_v31  ;;  %v3478_v34 = vshll.u32 %v5407_v5, 16  ;;  %v1889_v27 = vsel %vm6544_vm4, %v1884_v2, %v1888_v26  ;;  %v3465_v8 = vor.u32 %v3464_v14, %v3461_v51  ;;  %v7229_v5 = vld [vmem:[%s6465_s29 + $0x64] sm:$0xf]  ;;  %v5241_v2 = vld [vmem:[%s6465_s29 + $0x68] sm:$0x1] }
  0xb7   : > { %v3474_v17 = vrot.slane %v3472_v39, 4  ;;  %v1901_v59 = vshrl.u32 %v7191_v50, 16  ;;  %v1894_v18 = vrot.slane %v1893_v22, 4  ;;  %v1904_v63 = vshll.u32 %v7191_v50, 16 }
  0xb8   : > { %5921 = vmatmul.mubr.msk.bf16.gmra.mrb[44].mxu0 %vm736_vm1, %v5438_v36  ;;  %v3480_v19 = vrot.slane %v3478_v34, 5  ;;  %v1910_v21 = vshll.u32 %v7197_v62, 16  ;;  %v3466_v49 = vrot.slane %v3465_v8, 4  ;;  %v1914_v57 = vshrl.u32 %v7197_v62, 16 }
  0xb9   : > { %v3475_v58 = vor.u32 %v3474_v17, %v3470_v1  ;;  %v1903_v15 = vrot.slane %v1901_v59, 4  ;;  %v1899_v55 = vsel %vm6544_vm4, %v1894_v18, %v1898_v33  ;;  %v1906_v7 = vrot.slane %v1904_v63, 5  ;;  %v7244_v18 = vld [vmem:[%s6465_s29 + $0x94] sm:$0xf] }
  0xba   : > { %v1912_v29 = vrot.slane %v1910_v21, 5  ;;  %v1920_v41 = vshll.u32 %v5238_v24, 16  ;;  %v5273_v13 = vcombine.low %v1889_v27, %v1899_v55  ;;  %v3471_v38 = vsel %vm6544_vm4, %v3466_v49, %v3470_v1  ;;  %v7241_v27 = vld [vmem:[%s6465_s29 + $0x90] sm:$0xf] }
  0xbb   : > { %v3476_v0 = vrot.slane %v3475_v58, 4  ;;  %v1916_v11 = vrot.slane %v1914_v57, 4  ;;  %v1907_v9 = vor.u32 %v1906_v7, %v1903_v15  ;;  %v3483_v56 = vshrl.u32 %v7208_v52, 16  ;;  %v5413_v57 = vld [vmem:[%s6465_s29 + $0x98] sm:$0x1] }
  0xbc   : > { %v1922_v10 = vrot.slane %v1920_v41, 5  ;;  %v3486_v46 = vshll.u32 %v7208_v52, 16  ;;  %5815 = vmatmul.mubr.msk.bf16.gmra.mrb[40].mxu1 %vm736_vm1, %v5273_v13  ;;  %v3492_v26 = vshll.u32 %v7213_v28, 16  ;;  %v3496_v42 = vshrl.u32 %v7213_v28, 16 }
  0xbd   : > { %v3481_v12 = vsel %vm6544_vm4, %v3476_v0, %v3480_v19  ;;  %v1917_v47 = vor.u32 %v1916_v11, %v1912_v29  ;;  %v1908_v3 = vrot.slane %v1907_v9, 4  ;;  %v3485_v6 = vrot.slane %v3483_v56, 4  ;;  %v7257_v0 = vld [vmem:[%s6465_s29 + $0x6c] sm:$0xf]  ;;  %v7260_v56 = vld [vmem:[%s6465_s29 + $0x70] sm:$0xf] }
  0xbe   : > { %v5439_v61 = vcombine.low %v3471_v38, %v3481_v12  ;;  %v3488_v23 = vrot.slane %v3486_v46, 5  ;;  %v3494_v25 = vrot.slane %v3492_v26, 5  ;;  %v3498_v33 = vrot.slane %v3496_v42, 4 }
  0xbf   : > { %v1918_v30 = vrot.slane %v1917_v47, 4  ;;  %v3502_v51 = vshll.u32 %v5410_v35, 16  ;;  %v1913_v40 = vsel %vm6544_vm4, %v1908_v3, %v1912_v29  ;;  %v1925_v14 = vshrl.u32 %v7226_v4, 16  ;;  %v5244_v3 = vld [vmem:[%s6465_s29 + $0x74] sm:$0x1] }
  0xc0   : > { %5924 = vmatprep.mubr.msk.bf16.mxu0 %vm736_vm1, %v5439_v61  ;;  %v3489_v31 = vor.u32 %v3488_v23, %v3485_v6  ;;  %v1928_v39 = vshll.u32 %v7226_v4, 16  ;;  %v3499_v22 = vor.u32 %v3498_v33, %v3494_v25  ;;  %v1934_v34 = vshll.u32 %v7229_v5, 16 }
  0xc1   : > { %v1923_v36 = vsel %vm6544_vm4, %v1918_v30, %v1922_v10  ;;  %v3504_v1 = vrot.slane %v3502_v51, 5  ;;  %v1927_v24 = vrot.slane %v1925_v14, 4  ;;  %v1938_v21 = vshrl.u32 %v7229_v5, 16 }
  0xc2   : > { %v5274_v8 = vcombine.low %v1913_v40, %v1923_v36  ;;  %v3490_v17 = vrot.slane %v3489_v31, 4  ;;  %v1930_v59 = vrot.slane %v1928_v39, 5  ;;  %v3500_v19 = vrot.slane %v3499_v22, 4  ;;  %v7272_v39 = vld [vmem:[%s6465_s29 + $0x9c] sm:$0xf] }
  0xc3   : > { %v1936_v63 = vrot.slane %v1934_v34, 5  ;;  %v1944_v49 = vshll.u32 %v5241_v2, 16  ;;  %v3507_v55 = vshrl.u32 %v7241_v27, 16  ;;  %v3510_v7 = vshll.u32 %v7241_v27, 16 }
  0xc4   : > { %5818 = vmatprep.mubr.msk.bf16.mxu1 %vm736_vm1, %v5274_v8  ;;  %v3495_v58 = vsel %vm6544_vm4, %v3490_v17, %v3494_v25  ;;  %v1931_v15 = vor.u32 %v1930_v59, %v1927_v24  ;;  %v3505_v29 = vsel %vm6544_vm4, %v3500_v19, %v3504_v1  ;;  %v1940_v41 = vrot.slane %v1938_v21, 4  ;;  %v7277_v8 = vld [vmem:[%s6465_s29 + $0xa0] sm:$0xf] }
  0xc5   : > { %v1946_v13 = vrot.slane %v1944_v49, 5  ;;  %v3516_v38 = vshll.u32 %v7244_v18, 16  ;;  %v5440_v11 = vcombine.low %v3495_v58, %v3505_v29  ;;  %v3509_v10 = vrot.slane %v3507_v55, 4 }
  0xc6   : > { %v1932_v9 = vrot.slane %v1931_v15, 4  ;;  %v3512_v35 = vrot.slane %v3510_v7, 5  ;;  %v1941_v46 = vor.u32 %v1940_v41, %v1936_v63  ;;  %v3520_v47 = vshrl.u32 %v7244_v18, 16  ;;  %v7288_v41 = vld [vmem:[%s6465_s29 + $0x78] sm:$0xf] }
  0xc7   : > { %v3518_v12 = vrot.slane %v3516_v38, 5  ;;  %v3526_v26 = vshll.u32 %v5413_v57, 16  ;;  %5925 = vmatmul.mubr.msk.bf16.gmra.mrb[48].mxu0 %vm736_vm1, %v5440_v11  ;;  %v1949_v6 = vshrl.u32 %v7257_v0, 16  ;;  %v1952_v23 = vshll.u32 %v7257_v0, 16 }
  0xc8   : > { %v1937_v42 = vsel %vm6544_vm4, %v1932_v9, %v1936_v63  ;;  %v3513_v61 = vor.u32 %v3512_v35, %v3509_v10  ;;  %v1942_v30 = vrot.slane %v1941_v46, 4  ;;  %v3522_v25 = vrot.slane %v3520_v47, 4  ;;  %v5416_v63 = vld [vmem:[%s6465_s29 + $0xa4] sm:$0x1]  ;;  %v7293_v10 = vld [vmem:[%s6465_s29 + $0x7c] sm:$0xf] }
  0xc9   : > { %v3528_v33 = vrot.slane %v3526_v26, 5  ;;  %v1958_v51 = vshll.u32 %v7260_v56, 16  ;;  %v1951_v31 = vrot.slane %v1949_v6, 4  ;;  %v1954_v2 = vrot.slane %v1952_v23, 5 }
  0xca   : > { %v3514_v40 = vrot.slane %v3513_v61, 4  ;;  %v1962_v14 = vshrl.u32 %v7260_v56, 16  ;;  %v1947_v36 = vsel %vm6544_vm4, %v1942_v30, %v1946_v13  ;;  %v3523_v22 = vor.u32 %v3522_v25, %v3518_v12 }
  0xcb   : > { %v1960_v1 = vrot.slane %v1958_v51, 5  ;;  %v1968_v34 = vshll.u32 %v5244_v3, 16  ;;  %v5275_v17 = vcombine.low %v1937_v42, %v1947_v36  ;;  %v1955_v59 = vor.u32 %v1954_v2, %v1951_v31  ;;  %v5247_v3 = vld [vmem:[%s6465_s29 + $0x80] sm:$0x1]  ;;  %v7306_v51 = vld [vmem:[%s6465_s29 + $0xa8] sm:$0xf] }
  0xcc   : > { %v3519_v24 = vsel %vm6544_vm4, %v3514_v40, %v3518_v12  ;;  %v1964_v19 = vrot.slane %v1962_v14, 4  ;;  %v3524_v21 = vrot.slane %v3523_v22, 4  ;;  %v3531_v58 = vshrl.u32 %v7272_v39, 16  ;;  %v7309_v36 = vld [vmem:[%s6465_s29 + $0xac] sm:$0xf] }
  0xcd   : > { %v1970_v49 = vrot.slane %v1968_v34, 5  ;;  %v3534_v15 = vshll.u32 %v7272_v39, 16  ;;  %5819 = vmatmul.mubr.msk.bf16.gmra.mrb[44].mxu1 %vm736_vm1, %v5275_v17  ;;  %v1956_v57 = vrot.slane %v1955_v59, 4  ;;  %v3540_v7 = vshll.u32 %v7277_v8, 16 }
  0xce   : > { %v1965_v55 = vor.u32 %v1964_v19, %v1960_v1  ;;  %v3544_v29 = vshrl.u32 %v7277_v8, 16  ;;  %v3529_v13 = vsel %vm6544_vm4, %v3524_v21, %v3528_v33  ;;  %v3533_v38 = vrot.slane %v3531_v58, 4 }
  0xcf   : > { %v3536_v11 = vrot.slane %v3534_v15, 5  ;;  %v3550_v9 = vshll.u32 %v5416_v63, 16  ;;  %v5441_v35 = vcombine.low %v3519_v24, %v3529_v13  ;;  %v1961_v46 = vsel %vm6544_vm4, %v1956_v57, %v1960_v1  ;;  %v5419_v15 = vld [vmem:[%s6465_s29 + $0xb0] sm:$0x1] }
  0xd0   : > { %v1966_v12 = vrot.slane %v1965_v55, 4  ;;  %v3542_v47 = vrot.slane %v3540_v7, 5  ;;  %v3546_v42 = vrot.slane %v3544_v29, 4  ;;  %v1973_v6 = vshrl.u32 %v7288_v41, 16  ;;  %v7319_v55 = vld [vmem:[%s6465_s29 + $0x84] sm:$0xf] }
  0xd1   : > { %v3537_v26 = vor.u32 %v3536_v11, %v3533_v38  ;;  %v3552_v61 = vrot.slane %v3550_v9, 5  ;;  %5928 = vmatprep.mubr.msk.bf16.mxu0 %vm736_vm1, %v5441_v35  ;;  %v1976_v30 = vshll.u32 %v7288_v41, 16  ;;  %v1982_v25 = vshll.u32 %v7293_v10, 16  ;;  %v7325_v11 = vld [vmem:[%s6465_s29 + $0x88] sm:$0xf] }
  0xd2   : > { %v1971_v23 = vsel %vm6544_vm4, %v1966_v12, %v1970_v49  ;;  %v1986_v33 = vshrl.u32 %v7293_v10, 16  ;;  %v3547_v2 = vor.u32 %v3546_v42, %v3542_v47  ;;  %v1975_v14 = vrot.slane %v1973_v6, 4 }
  0xd3   : > { %v5276_v40 = vcombine.low %v1961_v46, %v1971_v23  ;;  %v3538_v31 = vrot.slane %v3537_v26, 4  ;;  %v1978_v22 = vrot.slane %v1976_v30, 5  ;;  %v1984_v1 = vrot.slane %v1982_v25, 5  ;;  %v5250_v23 = vld [vmem:[%s6465_s29 + $0x8c] sm:$0x1] }
  0xd4   : > { %v1988_v34 = vrot.slane %v1986_v33, 4  ;;  %v1992_v17 = vshll.u32 %v5247_v3, 16  ;;  %v3548_v59 = vrot.slane %v3547_v2, 4  ;;  %v3555_v19 = vshrl.u32 %v7306_v51, 16  ;;  %v7337_v33 = vld [vmem:[%s6465_s29 + $0xb4] sm:$0xf] }
  0xd5   : > { %5822 = vmatprep.mubr.msk.bf16.mxu1 %vm736_vm1, %v5276_v40  ;;  %v3543_v24 = vsel %vm6544_vm4, %v3538_v31, %v3542_v47  ;;  %v3558_v63 = vshll.u32 %v7306_v51, 16  ;;  %v1979_v21 = vor.u32 %v1978_v22, %v1975_v14  ;;  %v3564_v57 = vshll.u32 %v7309_v36, 16  ;;  %v7340_v22 = vld [vmem:[%s6465_s29 + $0xb8] sm:$0xf] }
  0xd6   : > { %v1989_v49 = vor.u32 %v1988_v34, %v1984_v1  ;;  %v1994_v58 = vrot.slane %v1992_v17, 5  ;;  %v3553_v7 = vsel %vm6544_vm4, %v3548_v59, %v3552_v61  ;;  %v3557_v29 = vrot.slane %v3555_v19, 4 }
  0xd7   : > { %v3560_v13 = vrot.slane %v3558_v63, 5  ;;  %v3568_v38 = vshrl.u32 %v7309_v36, 16  ;;  %v5442_v9 = vcombine.low %v3543_v24, %v3553_v7  ;;  %v1980_v35 = vrot.slane %v1979_v21, 4  ;;  %v5422_v21 = vld [vmem:[%s6465_s29 + $0xbc] sm:$0x1] }
  0xd8   : > { %v1990_v46 = vrot.slane %v1989_v49, 4  ;;  %v3566_v12 = vrot.slane %v3564_v57, 5  ;;  %v3574_v42 = vshll.u32 %v5419_v15, 16  ;;  %v1997_v3 = vshrl.u32 %v7319_v55, 16 }
  0xd9   : > { %v3561_v47 = vor.u32 %v3560_v13, %v3557_v29  ;;  %v3570_v26 = vrot.slane %v3568_v38, 4  ;;  %5929 = vmatmul.mubr.msk.bf16.gmra.mrb[52].mxu0 %vm736_vm1, %v5442_v9  ;;  %v1985_v61 = vsel %vm6544_vm4, %v1980_v35, %v1984_v1  ;;  %v2000_v30 = vshll.u32 %v7319_v55, 16  ;;  %v7351_v29 = vld [vmem:[%s6465_s29 + $0x90] sm:$0xf] }
  0xda   : > { %v1995_v6 = vsel %vm6544_vm4, %v1990_v46, %v1994_v58  ;;  %v2006_v25 = vshll.u32 %v7325_v11, 16  ;;  %v3576_v14 = vrot.slane %v3574_v42, 5  ;;  %v1999_v34 = vrot.slane %v1997_v3, 4  ;;  %v7357_v42 = vld [vmem:[%s6465_s29 + $0x94] sm:$0xf] }
  0xdb   : > { %v5277_v40 = vcombine.low %v1985_v61, %v1995_v6  ;;  %v3562_v31 = vrot.slane %v3561_v47, 4  ;;  %v3571_v2 = vor.u32 %v3570_v26, %v3566_v12  ;;  %v2002_v1 = vrot.slane %v2000_v30, 5 }
  0xdc   : > { %v2008_v17 = vrot.slane %v2006_v25, 5  ;;  %v2010_v24 = vshrl.u32 %v7325_v11, 16  ;;  %v2016_v63 = vshll.u32 %v5250_v23, 16  ;;  %v3579_v49 = vshrl.u32 %v7337_v33, 16 }
  0xdd   : > { %5823 = vmatmul.mubr.msk.bf16.gmra.mrb[48].mxu1 %vm736_vm1, %v5277_v40  ;;  %v3567_v59 = vsel %vm6544_vm4, %v3562_v31, %v3566_v12  ;;  %v3572_v19 = vrot.slane %v3571_v2, 4  ;;  %v2003_v58 = vor.u32 %v2002_v1, %v1999_v34  ;;  %v3582_v57 = vshll.u32 %v7337_v33, 16  ;;  %v5253_v31 = vld [vmem:[%s6465_s29 + $0x98] sm:$0x1] }
  0xde   : > { %v2012_v15 = vrot.slane %v2010_v24, 4  ;;  %v3588_v7 = vshll.u32 %v7340_v22, 16  ;;  %v2018_v38 = vrot.slane %v2016_v63, 5  ;;  %v3581_v9 = vrot.slane %v3579_v49, 4  ;;  %v7373_v49 = vld [vmem:[%s6465_s29 + $0xc4] sm:$0xf] }
  0xdf   : > { %v3577_v13 = vsel %vm6544_vm4, %v3572_v19, %v3576_v14  ;;  %v3592_v35 = vshrl.u32 %v7340_v22, 16  ;;  %v2004_v12 = vrot.slane %v2003_v58, 4  ;;  %v3584_v26 = vrot.slane %v3582_v57, 5 }
  0xe0   : > { %v5443_v46 = vcombine.low %v3567_v59, %v3577_v13  ;;  %v2013_v47 = vor.u32 %v2012_v15, %v2008_v17  ;;  %v3590_v3 = vrot.slane %v3588_v7, 5  ;;  %v3598_v6 = vshll.u32 %v5422_v21, 16  ;;  %v7367_v59 = vld [vmem:[%s6465_s29 + $0xc0] sm:$0xf] }
  0xe1   : > { %v3594_v61 = vrot.slane %v3592_v35, 4  ;;  %v2021_v23 = vshrl.u32 %v7351_v29, 16  ;;  %v2009_v30 = vsel %vm6544_vm4, %v2004_v12, %v2008_v17  ;;  %v3585_v40 = vor.u32 %v3584_v26, %v3581_v9 }
  0xe2   : > { %5932 = vmatprep.mubr.msk.bf16.mxu0 %vm736_vm1, %v5443_v46  ;;  %v2014_v25 = vrot.slane %v2013_v47, 4  ;;  %v2024_v2 = vshll.u32 %v7351_v29, 16  ;;  %v3600_v34 = vrot.slane %v3598_v6, 5  ;;  %v2030_v24 = vshll.u32 %v7357_v42, 16  ;;  %v5425_v46 = vld [vmem:[%s6465_s29 + $0xc8] sm:$0x1] }
  0xe3   : > { %v3595_v14 = vor.u32 %v3594_v61, %v3590_v3  ;;  %v2023_v1 = vrot.slane %v2021_v23, 4  ;;  %v3586_v63 = vrot.slane %v3585_v40, 4  ;;  %v2034_v17 = vshrl.u32 %v7357_v42, 16  ;;  %v7385_v6 = vld [vmem:[%s6465_s29 + $0x9c] sm:$0xf] }
  0xe4   : > { %v2019_v19 = vsel %vm6544_vm4, %v2014_v25, %v2018_v38  ;;  %v2026_v21 = vrot.slane %v2024_v2, 5  ;;  %v2032_v57 = vrot.slane %v2030_v24, 5  ;;  %v2040_v7 = vshll.u32 %v5253_v31, 16  ;;  %v7388_v40 = vld [vmem:[%s6465_s29 + $0xa0] sm:$0xf] }
  0xe5   : > { %v5278_v58 = vcombine.low %v2009_v30, %v2019_v19  ;;  %v3596_v15 = vrot.slane %v3595_v14, 4  ;;  %v3591_v13 = vsel %vm6544_vm4, %v3586_v63, %v3590_v3  ;;  %v2036_v35 = vrot.slane %v2034_v17, 4  ;;  %v5256_v19 = vld [vmem:[%s6465_s29 + $0xa4] sm:$0x1] }
  0xe6   : > { %v2027_v9 = vor.u32 %v2026_v21, %v2023_v1  ;;  %v3603_v38 = vshrl.u32 %v7367_v59, 16  ;;  %v2042_v47 = vrot.slane %v2040_v7, 5  ;;  %v3606_v26 = vshll.u32 %v7367_v59, 16 }
  0xe7   : > { %5826 = vmatprep.mubr.msk.bf16.mxu1 %vm736_vm1, %v5278_v58  ;;  %v3601_v12 = vsel %vm6544_vm4, %v3596_v15, %v3600_v34  ;;  %v3612_v61 = vshll.u32 %v7373_v49, 16  ;;  %v2037_v30 = vor.u32 %v2036_v35, %v2032_v57  ;;  %v3616_v14 = vshrl.u32 %v7373_v49, 16 }
  0xe8   : > { %v5444_v23 = vcombine.low %v3591_v13, %v3601_v12  ;;  %v2028_v3 = vrot.slane %v2027_v9, 4  ;;  %v3605_v25 = vrot.slane %v3603_v38, 4  ;;  %v3608_v31 = vrot.slane %v3606_v26, 5  ;;  %v7399_v13 = vld [vmem:[%s6465_s29 + $0xcc] sm:$0xf] }
  0xe9   : > { %v3614_v2 = vrot.slane %v3612_v61, 5  ;;  %v3622_v34 = vshll.u32 %v5425_v46, 16  ;;  %v2038_v24 = vrot.slane %v2037_v30, 4  ;;  %v2045_v63 = vshrl.u32 %v7385_v6, 16  ;;  %8446 = vst [vmem:[#allocation4_spill] sm:$0xff] %v7399_v13 }
  0xea   : > { %5933 = vmatmul.mubr.msk.bf16.gmra.mrb[56].mxu0 %vm736_vm1, %v5444_v23  ;;  %v2033_v1 = vsel %vm6544_vm4, %v2028_v3, %v2032_v57  ;;  %v2048_v21 = vshll.u32 %v7385_v6, 16  ;;  %v3609_v17 = vor.u32 %v3608_v31, %v3605_v25  ;;  %v3618_v58 = vrot.slane %v3616_v14, 4  ;;  %v7405_v38 = vld [vmem:[%s6465_s29 + $0xd0] sm:$0xf] }
  0xeb   : > { %v3624_v15 = vrot.slane %v3622_v34, 5  ;;  %v2054_v7 = vshll.u32 %v7388_v40, 16  ;;  %v2043_v9 = vsel %vm6544_vm4, %v2038_v24, %v2042_v47  ;;  %v2047_v35 = vrot.slane %v2045_v63, 4  ;;  %8447 = vst [vmem:[#allocation5_spill] sm:$0xff] %v7405_v38  ;;  %v7412_v34 = vld [vmem:[%s6465_s29 + $0xd4] sm:$0x1] }
  0xec   : > { %v2050_v46 = vrot.slane %v2048_v21, 5  ;;  %v2058_v57 = vshrl.u32 %v7388_v40, 16  ;;  %v5279_v12 = vcombine.low %v2033_v1, %v2043_v9  ;;  %v3610_v26 = vrot.slane %v3609_v17, 4  ;;  %8448 = vst [vmem:[#allocation6_spill] sm:$0xff] %v7412_v34 }
  0xed   : > { %v3619_v61 = vor.u32 %v3618_v58, %v3614_v2  ;;  %v2056_v23 = vrot.slane %v2054_v7, 5  ;;  %v2064_v25 = vshll.u32 %v5256_v19, 16  ;;  %v3627_v31 = vshrl.u32 %v7399_v13, 16  ;;  %v7417_v58 = vld [vmem:[%s6465_s29 + $0xa8] sm:$0xf] }
  0xee   : > { %v2051_v3 = vor.u32 %v2050_v46, %v2047_v35  ;;  %v2060_v30 = vrot.slane %v2058_v57, 4  ;;  %5827 = vmatmul.mubr.msk.bf16.gmra.mrb[52].mxu1 %vm736_vm1, %v5279_v12  ;;  %v3615_v47 = vsel %vm6544_vm4, %v3610_v26, %v3614_v2  ;;  %v3630_v1 = vshll.u32 %v7399_v13, 16  ;;  %8449 = vst [vmem:[#allocation7_spill] sm:$0xff] %v7417_v58  ;;  %v7423_v46 = vld [vmem:[%s6465_s29 + $0xac] sm:$0xf] }
  0xef   : > { %v3620_v14 = vrot.slane %v3619_v61, 4  ;;  %v3636_v24 = vshll.u32 %v7405_v38, 16  ;;  %v2066_v17 = vrot.slane %v2064_v25, 5  ;;  %v3629_v19 = vrot.slane %v3627_v31, 4  ;;  %8450 = vst [vmem:[#allocation8_spill] sm:$0xff] %v7423_v46 }
  0xf0   : > { %v2052_v63 = vrot.slane %v2051_v3, 4  ;;  %v2061_v21 = vor.u32 %v2060_v30, %v2056_v23  ;;  %v3632_v9 = vrot.slane %v3630_v1, 5  ;;  %v3640_v2 = vshrl.u32 %v7405_v38, 16  ;;  %v7429_v25 = vld [vmem:[%s6465_s29 + $0xb0] sm:$0x1] }
  0xf1   : > { %v3625_v7 = vsel %vm6544_vm4, %v3620_v14, %v3624_v15  ;;  %v3638_v35 = vrot.slane %v3636_v24, 5  ;;  %v3646_v61 = vshll.u32 %v7412_v34, 16  ;;  %8451 = vst [vmem:[#allocation9_spill] sm:$0xff] %v7429_v25  ;;  %v2069_v15 = vshrl.u32 %v7417_v58, 16  ;;  %v7439_v24 = vld [vmem:[%s6465_s29 + $0xb4] sm:$0xf] }
  0xf2   : > { %v5445_v57 = vcombine.low %v3615_v47, %v3625_v7  ;;  %v2057_v12 = vsel %vm6544_vm4, %v2052_v63, %v2056_v23  ;;  %v2062_v26 = vrot.slane %v2061_v21, 4  ;;  %v3633_v3 = vor.u32 %v3632_v9, %v3629_v19  ;;  %8452 = vst [vmem:[#allocation10_spill] sm:$0xff] %v7439_v24 }
  0xf3   : > { %v3642_v30 = vrot.slane %v3640_v2, 4  ;;  %v2072_v31 = vshll.u32 %v7417_v58, 16  ;;  %v3648_v14 = vrot.slane %v3646_v61, 5  ;;  %v2078_v23 = vshll.u32 %v7423_v46, 16  ;;  %v7449_v58 = vld [vmem:[%s6465_s29 + $0x18] sm:$0xf] }
  0xf4   : > { %5936 = vmatprep.mubr.msk.bf16.mxu0 %vm736_vm1, %v5445_v57  ;;  %v2067_v47 = vsel %vm6544_vm4, %v2062_v26, %v2066_v17  ;;  %v2082_v1 = vshrl.u32 %v7423_v46, 16  ;;  %v3634_v21 = vrot.slane %v3633_v3, 4  ;;  %v2071_v7 = vrot.slane %v2069_v15, 4  ;;  %v7443_v17 = vld [vmem:[%s6465_s29 + $0xb8] sm:$0xf] }
  0xf5   : > { %v5280_v63 = vcombine.low %v2057_v12, %v2067_v47  ;;  %v3643_v19 = vor.u32 %v3642_v30, %v3638_v35  ;;  %v2074_v9 = vrot.slane %v2072_v31, 5  ;;  %v2080_v2 = vrot.slane %v2078_v23, 5  ;;  %8453 = vst [vmem:[#allocation11_spill] sm:$0xff] %v7443_v17  ;;  %v7452_v12 = vld [vmem:[%s6465_s29 + $0x1c] sm:$0xf] }
  0xf6   : > { %v2084_v57 = vrot.slane %v2082_v1, 4  ;;  %v2088_v34 = vshll.u32 %v7429_v25, 16  ;;  %v3639_v26 = vsel %vm6544_vm4, %v3634_v21, %v3638_v35  ;;  %v5463_v3 = vcombine.low %v7449_v58, %v7452_v12  ;;  %v7458_v23 = vld [vmem:[%s6465_s29 + $0xbc] sm:$0x1]  ;;  %v7466_v25 = vld [vmem:[%s6465_s29 + $0xc0] sm:$0xf] }
  0xf7   : > { %5830 = vmatprep.mubr.msk.bf16.mxu1 %vm736_vm1, %v5280_v63  ;;  %v3644_v61 = vrot.slane %v3643_v19, 4  ;;  %v2093_v30 = vshrl.u32 %v7439_v24, 16  ;;  %v2075_v15 = vor.u32 %v2074_v9, %v2071_v7  ;;  %8454 = vst [vmem:[#allocation12_spill] sm:$0xff] %v7458_v23  ;;  %v2096_v1 = vshll.u32 %v7439_v24, 16  ;;  %8455 = vst [vmem:[#allocation13_spill] sm:$0xff] %v7466_v25 }
  0xf8   : > { %v2085_v31 = vor.u32 %v2084_v57, %v2080_v2  ;;  %v2090_v47 = vrot.slane %v2088_v34, 5  ;;  %v2102_v21 = vshll.u32 %v7443_v17, 16  ;;  %v2106_v19 = vshrl.u32 %v7443_v17, 16  ;;  %v7470_v24 = vld [vmem:[%s6465_s29 + $0xc4] sm:$0xf] }
  0xf9   : > { %v3649_v35 = vsel %vm6544_vm4, %v3644_v61, %v3648_v14  ;;  %v2095_v63 = vrot.slane %v2093_v30, 4  ;;  %v2076_v7 = vrot.slane %v2075_v15, 4  ;;  %v2098_v57 = vrot.slane %v2096_v1, 5  ;;  %8456 = vst [vmem:[#allocation14_spill] sm:$0xff] %v7470_v24  ;;  %v7478_v17 = vld [vmem:[%s6465_s29 + $0xc8] sm:$0x1] }
  0xfa   : > { %v5446_v46 = vcombine.low %v3639_v26, %v3649_v35  ;;  %v2086_v9 = vrot.slane %v2085_v31, 4  ;;  %v2104_v34 = vrot.slane %v2102_v21, 5  ;;  %v2108_v13 = vrot.slane %v2106_v19, 4  ;;  %8457 = vst [vmem:[#allocation15_spill] sm:$0xff] %v7478_v17 }
  0xfb   : > { %v2112_v38 = vshll.u32 %v7458_v23, 16  ;;  %v2081_v14 = vsel %vm6544_vm4, %v2076_v7, %v2080_v2  ;;  %v2099_v30 = vor.u32 %v2098_v57, %v2095_v63  ;;  %v2117_v26 = vshrl.u32 %v7466_v25, 16  ;;  %v7481_v15 = vpop.f32.mrb[0].mxu1 }
  0xfc   : > { %5937 = vmatmul.mubr.msk.bf16.gmra.mrb[60].mxu0 %vm736_vm1, %v5446_v46  ;;  %v2091_v61 = vsel %vm6544_vm4, %v2086_v9, %v2090_v47  ;;  %v2109_v1 = vor.u32 %v2108_v13, %v2104_v34  ;;  %v2120_v35 = vshll.u32 %v7466_v25, 16  ;;  %v7485_v2 = vpop.f32.mrb[1].mxu1  ;;  %v2126_v63 = vshll.u32 %v7470_v24, 16 }
  0xfd   : > { %v5281_v31 = vcombine.low %v2081_v14, %v2091_v61  ;;  %5942 = vmatprep.mubr.msk.bf16.mxu0 %vm736_vm1, %v5463_v3  ;;  %v2114_v46 = vrot.slane %v2112_v38, 5  ;;  %v2100_v21 = vrot.slane %v2099_v30, 4  ;;  %v2119_v47 = vrot.slane %v2117_v26, 4  ;;  %v7489_v7 = vpop.f32.mrb[2].mxu1  ;;  %v7498_v14 = vld [vmem:[%s6465_s29 + $0x24] sm:$0xf] }
  0xfe   : > { %v2130_v19 = vshrl.u32 %v7470_v24, 16  ;;  %v2110_v3 = vrot.slane %v2109_v1, 4  ;;  %v2122_v13 = vrot.slane %v2120_v35, 5  ;;  %v2136_v38 = vshll.u32 %v7478_v17, 16  ;;  %v7493_v9 = vpop.f32.mrb[3].mxu1  ;;  %8458 = vst [vmem:[#allocation16_spill] sm:$0xff] %v7498_v14 }
  0xff   : > { %5831 = vmatmul.mubr.msk.bf16.gmra.mrb[56].mxu1 %vm736_vm1, %v5281_v31  ;;  %v2105_v57 = vsel %vm6544_vm4, %v2100_v21, %v2104_v34  ;;  %v7501_v61 = vld [vmem:[%s6465_s29 + $0x28] sm:$0xf]  ;;  %v2128_v26 = vrot.slane %v2126_v63, 5  ;;  %v7508_v35 = vld [vmem:[%s6465_s29 + $0x30] sm:$0xf] }
 0x100   : > { %v5464_v30 = vcombine.low %v7498_v14, %v7501_v61  ;;  %v2132_v23 = vrot.slane %v2130_v19, 4  ;;  %v2115_v31 = vsel %vm6544_vm4, %v2110_v3, %v2114_v46  ;;  %v2123_v1 = vor.u32 %v2122_v13, %v2119_v47  ;;  %8459 = vst [vmem:[#allocation17_spill] sm:$0xff] %v7508_v35  ;;  %v7511_v17 = vld [vmem:[%s6465_s29 + $0x34] sm:$0xf]  ;;  %v7525_v19 = vld [vmem:[%s6465_s29 + $0xc] sm:$0xf] }
 0x101   : > { %8460 = vst [vmem:[#allocation18_spill] sm:$0xff] %v7511_v17  ;;  %v5465_v34 = vcombine.low %v7508_v35, %v7511_v17  ;;  %v5282_v21 = vcombine.low %v2105_v57, %v2115_v31  ;;  %v2138_v24 = vrot.slane %v2136_v38, 5  ;;  %v4429_v47 = vsel %vm785_vm0, %v7117_v32, 0  ;;  %8461 = vst [vmem:[#allocation19_spill] sm:$0xff] %v7525_v19  ;;  %v7528_v3 = vld [vmem:[%s6465_s29 + $0x10] sm:$0xf] }
 0x102   : > { %v2133_v25 = vor.u32 %v2132_v23, %v2128_v26  ;;  %v2124_v14 = vrot.slane %v2123_v1, 4  ;;  %8462 = vst [vmem:[#allocation20_spill] sm:$0xff] %v7528_v3  ;;  %v7537_v57 = vld [vmem:[%s6465_s29 + $0x3c] sm:$0xf]  ;;  %v7606_v17 = vld [vmem:[%s6465_s29 + $0x30] sm:$0xf] }
 0x103   : > { %5834 = vmatprep.mubr.msk.bf16.mxu1 %vm736_vm1, %v5282_v21  ;;  %8463 = vst [vmem:[#allocation21_spill] sm:$0xff] %v7537_v57  ;;  %v7563_v21 = vld [vmem:[%s6465_s29 + $0x1c] sm:$0xf]  ;;  %8474 = vst [vmem:[#allocation32_spill] sm:$0xff] %v7606_v17 }
 0x104   : > { %5943 = vmatmul.mubr.msk.bf16.vlgmr.msra.gmra.mrb[32].mxu0 %vm736_vm1, %v5464_v30  ;;  %v2134_v46 = vrot.slane %v2133_v25, 4  ;;  %v2129_v63 = vsel %vm6544_vm4, %v2124_v14, %v2128_v26  ;;  %v5300_v25 = vcombine.low %v7525_v19, %v7528_v3  ;;  %v7540_v14 = vld [vmem:[%s6465_s29 + $0x40] sm:$0xf]  ;;  %v7548_v30 = vld [vmem:[%s6465_s29 + $0x48] sm:$0xf]  ;;  %8468 = vst [vmem:[#allocation26_spill] sm:$0xff] %v7563_v21 }
 0x105   : > { %5946 = vmatprep.mubr.msk.bf16.mxu0 %vm736_vm1, %v5465_v34  ;;  %5975 = vmatpush3.bf16.msra.mxu0 %v4429_v47  ;;  %v7532_v32 = vpop.f32.mrb[4].mxu1  ;;  %8464 = vst [vmem:[#allocation22_spill] sm:$0xff] %v7540_v14  ;;  %v5466_v48 = vcombine.low %v7537_v57, %v7540_v14  ;;  %8465 = vst [vmem:[#allocation23_spill] sm:$0xff] %v7548_v30  ;;  %v7551_v26 = vld [vmem:[%s6465_s29 + $0x4c] sm:$0xf] }
 0x106   : > { %v2139_v23 = vsel %vm6544_vm4, %v2134_v46, %v2138_v24  ;;  %v7534_v38 = vpop.f32.mrb[5].mxu1  ;;  %8466 = vst [vmem:[#allocation24_spill] sm:$0xff] %v7551_v26  ;;  %v5467_v31 = vcombine.low %v7548_v30, %v7551_v26  ;;  %v7560_v34 = vld [vmem:[%s6465_s29 + $0x18] sm:$0xf]  ;;  %v6301_v30 = vld [vmem:[%s8401_s1 + $0xa] sm:$0x3] }
 0x107   : > { %v5283_v13 = vcombine.low %v2129_v63, %v2139_v23  ;;  %v7544_v24 = vpop.f32.mrb[6].mxu1  ;;  %8467 = vst [vmem:[#allocation25_spill] sm:$0xff] %v7560_v34  ;;  %v5301_v46 = vcombine.low %v7560_v34, %v7563_v21  ;;  %v7569_v63 = vld [vmem:[%s6465_s29 + $0x24] sm:$0xf]  ;;  %v7572_v23 = vld [vmem:[%s6465_s29 + $0x28] sm:$0xf] }
 0x108   : > { %v7555_v1 = vpop.f32.mrb[7].mxu1  ;;  %8469 = vst [vmem:[#allocation27_spill] sm:$0xff] %v7569_v63  ;;  %8470 = vst [vmem:[#allocation28_spill] sm:$0xff] %v7572_v23  ;;  %v2919_v34 = vsel %vm785_vm0, %v6301_v30, 0  ;;  %v7585_v57 = vld [vmem:[%s6465_s29 + $0x54] sm:$0xf] }
 0x109   : > { %5835 = vmatmul.mubr.msk.bf16.gmra.mrb[60].mxu1 %vm736_vm1, %v5283_v13  ;;  %8471 = vst [vmem:[#allocation29_spill] sm:$0xff] %v7585_v57  ;;  %v7588_v19 = vld [vmem:[%s6465_s29 + $0x58] sm:$0xf]  ;;  %v7596_v14 = vld [vmem:[%s6465_s29 + $0x60] sm:$0xf] }
 0x10a   : > { %5840 = vmatprep.mubr.msk.bf16.mxu1 %vm736_vm1, %v5300_v25  ;;  %v5302_v25 = vcombine.low %v7569_v63, %v7572_v23  ;;  %8472 = vst [vmem:[#allocation30_spill] sm:$0xff] %v7588_v19  ;;  %v5468_v63 = vcombine.low %v7585_v57, %v7588_v19  ;;  %8473 = vst [vmem:[#allocation31_spill] sm:$0xff] %v7596_v14  ;;  %v7599_v30 = vld [vmem:[%s6465_s29 + $0x64] sm:$0xf]  ;;  %v7609_v57 = vld [vmem:[%s6465_s29 + $0x34] sm:$0xf]  ;;  %v5304_v19 = vcombine.low %v7126_v43, %v7133_v20 }
 0x10b   : > { %v5469_v35 = vcombine.low %v7596_v14, %v7599_v30 }
 0x10c   : > { %5947 = vmatmul.mubr.msk.bf16.gmra.mrb[36].mxu0 %vm736_vm1, %v5466_v48  ;;  %v5774_v47 = vpop.f32.mrb[0].mxu0 }
 0x10d   : > { %5950 = vmatprep.mubr.msk.bf16.mxu0 %vm736_vm1, %v5467_v31  ;;  %v1508_v48 = vpop.f32.mrb[1].mxu0  ;;  %v6010_v43 = vadd.f32 %v5774_v47, %v7481_v15  ;;  %v5306_v15 = vcombine.low %v7191_v50, %v7197_v62  ;;  %v8476_v47 = vld [vmem:[#allocation18_spill] sm:$0xff] }
 0x10e   : > { %v7576_v13 = vpop.f32.mrb[8].mxu1  ;;  %v5775_v21 = vpop.f32.mrb[2].mxu0 }
 0x10f   : > { %v7582_v31 = vpop.f32.mrb[9].mxu1  ;;  %v1511_v26 = vpop.f32.mrb[3].mxu0  ;;  %1670 = vst.msk [vmem:[#allocation2 + $0x10] sm:$0xff] %vm1667_vm8, %v6010_v43  ;;  %v6309_v43 = vld [vmem:[%s6465_s29 + $0x2c] sm:$0x1] }
 0x110   : > { %v7592_v23 = vpop.f32.mrb[10].mxu1 }
 0x111   : > { %5841 = vmatmul.mubr.msk.bf16.vlgmr.msra.gmra.mrb[32].mxu1 %vm736_vm1, %v5301_v46  ;;  %v858_v3 = vpop.f32.mrb[11].mxu1  ;;  %v5303_v46 = vcombine.low %v7606_v17, %v7609_v57 }
 0x112   : > { %5873 = vmatpush3.bf16.msra.mxu1 %v2919_v34  ;;  %5844 = vmatprep.mubr.msk.bf16.mxu1 %vm736_vm1, %v5302_v25  ;;  %v5470_v34 = vcombine.low %v7144_v60, %v7149_v54  ;;  %v6011_v60 = vadd.f32 %v1508_v48, %v7485_v2  ;;  %v6012_v54 = vadd.f32 %v5775_v21, %v7489_v7  ;;  %v8479_v48 = vld [vmem:[#allocation16_spill] sm:$0xff] }
 0x113   : > { %v5472_v7 = vcombine.low %v7208_v52, %v7213_v28  ;;  %v5307_v52 = vcombine.low %v7226_v4, %v7229_v5  ;;  %v5308_v28 = vcombine.low %v7257_v0, %v7260_v56  ;;  %v5475_v4 = vcombine.low %v7306_v51, %v7309_v36 }
 0x114   : > { %5951 = vmatmul.mubr.msk.bf16.gmra.mrb[40].mxu0 %vm736_vm1, %v5468_v63  ;;  %v5471_v63 = vcombine.low %v7174_v45, %v7180_v37  ;;  %v5305_v45 = vcombine.low %v7159_v44, %v7165_v53  ;;  %1668 = vst.msk [vmem:[#allocation2] sm:$0xff] %vm1667_vm8, %v6011_v60  ;;  %1671 = vst.msk [vmem:[#allocation2 + $0x18] sm:$0xff] %vm1667_vm8, %v6012_v54  ;;  %v5473_v44 = vcombine.low %v7241_v27, %v7244_v18  ;;  %v8480_v60 = vld [vmem:[#allocation20_spill] sm:$0xff] }
 0x115   : > { %5954 = vmatprep.mubr.msk.bf16.mxu0 %vm736_vm1, %v5469_v35  ;;  %v5474_v27 = vcombine.low %v7272_v39, %v7277_v8  ;;  %v5309_v8 = vcombine.low %v7288_v41, %v7293_v10  ;;  %v5310_v51 = vcombine.low %v7319_v55, %v7325_v11  ;;  %v4222_v36 = vrot.slane %v7452_v12, 5  ;;  %v6308_v11 = vld [vmem:[%s6465_s29 + $0x20] sm:$0x1] }
 0x116   : > { %v7616_v16 = vpop.f32.mrb[12].mxu1  ;;  %v5477_v41 = vcombine.low %v7367_v59, %v7373_v49  ;;  %v5496_v10 = vrot.slane %v7449_v58, 9  ;;  %v4225_v12 = vrot.slane %v6308_v11, 5  ;;  %v2712_v54 = vrot.slane %v8480_v60, 5  ;;  %v6315_v60 = vld [vmem:[%s6465_s29 + $0x2c] sm:$0x1] }
 0x117   : > { %v7620_v25 = vpop.f32.mrb[13].mxu1  ;;  %v4224_v55 = vrot.slane %v4222_v36, 4 }
 0x118   : > { %v7625_v14 = vpop.f32.mrb[14].mxu1 }
 0x119   : > { %5845 = vmatmul.mubr.msk.bf16.gmra.mrb[36].mxu1 %vm736_vm1, %v5303_v46  ;;  %v7628_v35 = vpop.f32.mrb[15].mxu1  ;;  %v6013_v46 = vadd.f32 %v1511_v26, %v7493_v9  ;;  %v4226_v21 = vsel %vm6645_vm7, %v4224_v55, %v4225_v12  ;;  %v8491_v55 = vld [vmem:[#allocation28_spill] sm:$0xff] }
 0x11a   : > { %5848 = vmatprep.mubr.msk.bf16.mxu1 %vm736_vm1, %v5304_v19  ;;  %v2726_v11 = vrot.slane %v8491_v55, 5 }
 0x11b   : > { %v5778_v20 = vpop.f32.mrb[4].mxu0  ;;  %1669 = vst.msk [vmem:[#allocation2 + $0x8] sm:$0xff] %vm1667_vm8, %v6013_v46 }
 0x11c   : > { %5955 = vmatmul.mubr.msk.bf16.gmra.mrb[44].mxu0 %vm736_vm1, %v5470_v34  ;;  %v1524_v17 = vpop.f32.mrb[5].mxu0  ;;  %v6014_v53 = vadd.f32 %v5778_v20, %v7532_v32  ;;  %v4232_v20 = vrot.slane %v6309_v43, 5 }
 0x11d   : > { %5958 = vmatprep.mubr.msk.bf16.mxu0 %vm736_vm1, %v5471_v63  ;;  %v5779_v37 = vpop.f32.mrb[6].mxu0  ;;  %v6015_v50 = vadd.f32 %v1524_v17, %v7534_v38 }
 0x11e   : > { %v1527_v2 = vpop.f32.mrb[7].mxu0  ;;  %v6016_v62 = vadd.f32 %v5779_v37, %v7544_v24  ;;  %1674 = vst.msk [vmem:[#allocation2 + $0x30] sm:$0xff] %vm1667_vm8, %v6014_v53  ;;  %v5311_v24 = vcombine.low %v7351_v29, %v7357_v42  ;;  %v6310_v37 = vld [vmem:[%s6465_s29 + $0x38] sm:$0x1] }
 0x11f   : > { %v6017_v9 = vadd.f32 %v1527_v2, %v7555_v1  ;;  %1672 = vst.msk [vmem:[#allocation2 + $0x20] sm:$0xff] %vm1667_vm8, %v6015_v50  ;;  %v4223_v1 = vsel %vm6645_vm7, %v5496_v10, %v4222_v36  ;;  %v8485_v50 = vld [vmem:[#allocation11_spill] sm:$0xff] }
 0x120   : > { %1675 = vst.msk [vmem:[#allocation2 + $0x38] sm:$0xff] %vm1667_vm8, %v6016_v62  ;;  %v5512_v63 = vcombine.low %v4223_v1, %v4226_v21  ;;  %v8486_v62 = vld [vmem:[#allocation10_spill] sm:$0xff] }
 0x121   : > { %5849 = vmatmul.mubr.msk.bf16.gmra.mrb[40].mxu1 %vm736_vm1, %v5305_v45  ;;  %1673 = vst.msk [vmem:[#allocation2 + $0x28] sm:$0xff] %vm1667_vm8, %v6017_v9  ;;  %v5314_v9 = vcombine.low %v8486_v62, %v8485_v50 }
 0x122   : > { %5852 = vmatprep.mubr.msk.bf16.mxu1 %vm736_vm1, %v5306_v15  ;;  %v4239_v15 = vrot.slane %v6310_v37, 5  ;;  %v8496_v37 = vld [vmem:[#allocation29_spill] sm:$0xff] }
 0x124   : > { %5959 = vmatmul.mubr.msk.bf16.gmra.mrb[48].mxu0 %vm736_vm1, %v5472_v7  ;;  %v8483_v7 = vld [vmem:[#allocation8_spill] sm:$0xff] }
 0x125   : > { %5962 = vmatprep.mubr.msk.bf16.mxu0 %vm736_vm1, %v5473_v44  ;;  %v8484_v44 = vld [vmem:[#allocation7_spill] sm:$0xff] }
 0x126   : > { %v5313_v53 = vcombine.low %v8484_v44, %v8483_v7  ;;  %v8498_v44 = vld [vmem:[#allocation13_spill] sm:$0xff] }
 0x127   : > { %v5782_v18 = vpop.f32.mrb[8].mxu0 }
 0x128   : > { %v1540_v5 = vpop.f32.mrb[9].mxu0  ;;  %v6018_v0 = vadd.f32 %v5782_v18, %v7576_v13 }
 0x129   : > { %5853 = vmatmul.mubr.msk.bf16.gmra.mrb[44].mxu1 %vm736_vm1, %v5307_v52  ;;  %v5783_v17 = vpop.f32.mrb[10].mxu0  ;;  %v6019_v19 = vadd.f32 %v1540_v5, %v7582_v31  ;;  %v5497_v31 = vrot.slane %v8479_v48, 9  ;;  %v6314_v48 = vld [vmem:[%s6465_s29 + $0x20] sm:$0x1] }
 0x12a   : > { %5856 = vmatprep.mubr.msk.bf16.mxu1 %vm736_vm1, %v5308_v28  ;;  %v1543_v56 = vpop.f32.mrb[11].mxu0  ;;  %v6020_v32 = vadd.f32 %v5783_v17, %v7592_v23  ;;  %1678 = vst.msk [vmem:[#allocation2 + $0x50] sm:$0xff] %vm1667_vm8, %v6018_v0  ;;  %v4236_v23 = vrot.slane %v8476_v47, 5  ;;  %v8487_v28 = vld [vmem:[#allocation24_spill] sm:$0xff]  ;;  %v2714_v17 = vrot.slane %v2712_v54, 4 }
 0x12b   : > { %v6021_v39 = vadd.f32 %v1543_v56, %v858_v3  ;;  %1676 = vst.msk [vmem:[#allocation2 + $0x40] sm:$0xff] %vm1667_vm8, %v6019_v19  ;;  %v5476_v3 = vcombine.low %v7337_v33, %v7340_v22  ;;  %v5312_v33 = vcombine.low %v7385_v6, %v7388_v40  ;;  %v4229_v22 = vrot.slane %v7501_v61, 5  ;;  %v8478_v61 = vld [vmem:[#allocation4_spill] sm:$0xff]  ;;  %v6311_v0 = vld [vmem:[%s6465_s29 + $0x14] sm:$0x1] }
 0x12c   : > { %5963 = vmatmul.mubr.msk.bf16.gmra.mrb[52].mxu0 %vm736_vm1, %v5474_v27  ;;  %1679 = vst.msk [vmem:[#allocation2 + $0x58] sm:$0xff] %vm1667_vm8, %v6020_v32  ;;  %v4238_v45 = vrot.slane %v4236_v23, 4  ;;  %v4250_v27 = vrot.slane %v8487_v28, 5  ;;  %v2715_v56 = vrot.slane %v6311_v0, 5 }
 0x12d   : > { %5966 = vmatprep.mubr.msk.bf16.mxu0 %vm736_vm1, %v5475_v4  ;;  %1677 = vst.msk [vmem:[#allocation2 + $0x48] sm:$0xff] %vm1667_vm8, %v6021_v39  ;;  %v4230_v52 = vsel %vm6645_vm7, %v5497_v31, %v4229_v22  ;;  %v8488_v4 = vld [vmem:[#allocation19_spill] sm:$0xff]  ;;  %v8489_v39 = vld [vmem:[#allocation21_spill] sm:$0xff]  ;;  %v2722_v31 = vrot.slane %v6314_v48, 5 }
 0x12e   : > { %v5333_v5 = vrot.slane %v8488_v4, 9  ;;  %v4240_v32 = vsel %vm6645_vm7, %v4238_v45, %v4239_v15  ;;  %v2716_v47 = vsel %vm6645_vm7, %v2714_v17, %v2715_v56  ;;  %v5501_v15 = vrot.slane %v8496_v37, 9 }
 0x130   : > { %v2713_v21 = vsel %vm6645_vm7, %v5333_v5, %v2712_v54  ;;  %v2729_v54 = vrot.slane %v6315_v60, 5 }
 0x131   : > { %5857 = vmatmul.mubr.msk.bf16.gmra.mrb[48].mxu1 %vm736_vm1, %v5309_v8  ;;  %v5499_v8 = vrot.slane %v8489_v39, 9  ;;  %v5349_v4 = vcombine.low %v2713_v21, %v2716_v47  ;;  %v6321_v21 = vld [vmem:[%s6465_s29 + $0x70] sm:$0xf] }
 0x132   : > { %5860 = vmatprep.mubr.msk.bf16.mxu1 %vm736_vm1, %v5310_v51  ;;  %v8490_v51 = vld [vmem:[#allocation26_spill] sm:$0xff]  ;;  %v4271_v47 = vrot.slane %v6321_v21, 5 }
 0x133   : > { %v2719_v36 = vrot.slane %v8490_v51, 5 }
 0x134   : > { %5967 = vmatmul.mubr.msk.bf16.gmra.mrb[56].mxu0 %vm736_vm1, %v5476_v3  ;;  %v5786_v38 = vpop.f32.mrb[12].mxu0 }
 0x135   : > { %5970 = vmatprep.mubr.msk.bf16.mxu0 %vm736_vm1, %v5477_v41  ;;  %v6022_v59 = vadd.f32 %v5786_v38, %v7616_v16  ;;  %v1556_v26 = vpop.f32.mrb[13].mxu0  ;;  %v8477_v16 = vld [vmem:[#allocation5_spill] sm:$0xff]  ;;  %v6312_v41 = vld [vmem:[%s6465_s29 + $0x44] sm:$0x1] }
 0x136   : > { %v6023_v29 = vadd.f32 %v1556_v26, %v7620_v25  ;;  %v5787_v42 = vpop.f32.mrb[14].mxu0  ;;  %v5478_v13 = vcombine.low %v8478_v61, %v8477_v16  ;;  %v4231_v25 = vrot.slane %v4229_v22, 4  ;;  %v4246_v10 = vrot.slane %v6312_v41, 5  ;;  %v8492_v38 = vld [vmem:[#allocation23_spill] sm:$0xff]  ;;  %v6313_v22 = vld [vmem:[%s6465_s29 + $0x50] sm:$0x1] }
 0x137   : > { %1682 = vst.msk [vmem:[#allocation2 + $0x70] sm:$0xff] %vm1667_vm8, %v6022_v59  ;;  %v6024_v6 = vadd.f32 %v5787_v42, %v7625_v14  ;;  %v1559_v40 = vpop.f32.mrb[15].mxu0  ;;  %v8481_v14 = vld [vmem:[#allocation17_spill] sm:$0xff]  ;;  %v4253_v59 = vrot.slane %v6313_v22, 5  ;;  %v8500_v41 = vld [vmem:[#allocation31_spill] sm:$0xff] }
 0x138   : > { %1680 = vst.msk [vmem:[#allocation2 + $0x60] sm:$0xff] %vm1667_vm8, %v6023_v29  ;;  %v6025_v34 = vadd.f32 %v1559_v40, %v7628_v35  ;;  %v5498_v46 = vrot.slane %v8481_v14, 9  ;;  %v8482_v35 = vld [vmem:[#allocation22_spill] sm:$0xff]  ;;  %v4233_v18 = vsel %vm6645_vm7, %v4231_v25, %v4232_v20  ;;  %v8494_v40 = vld [vmem:[#allocation25_spill] sm:$0xff]  ;;  %v8495_v25 = vld [vmem:[#allocation27_spill] sm:$0xff]  ;;  %v2728_v20 = vrot.slane %v2726_v11, 4 }
 0x139   : > { %5861 = vmatmul.mubr.msk.bf16.gmra.mrb[52].mxu1 %vm736_vm1, %v5311_v24  ;;  %1683 = vst.msk [vmem:[#allocation2 + $0x78] sm:$0xff] %vm1667_vm8, %v6024_v6  ;;  %v4243_v2 = vrot.slane %v8482_v35, 5  ;;  %v5513_v12 = vcombine.low %v4230_v52, %v4233_v18  ;;  %v5500_v24 = vrot.slane %v8492_v38, 9  ;;  %v5334_v61 = vrot.slane %v8494_v40, 9  ;;  %v6316_v52 = vld [vmem:[%s6465_s29 + $0x5c] sm:$0x1] }
 0x13a   : > { %5864 = vmatprep.mubr.msk.bf16.mxu1 %vm736_vm1, %v5312_v33  ;;  %1681 = vst.msk [vmem:[#allocation2 + $0x68] sm:$0xff] %vm1667_vm8, %v6025_v34  ;;  %v4237_v19 = vsel %vm6645_vm7, %v5498_v46, %v4236_v23  ;;  %v4252_v33 = vrot.slane %v4250_v27, 4  ;;  %v8493_v23 = vld [vmem:[#allocation30_spill] sm:$0xff]  ;;  %v5335_v43 = vrot.slane %v8495_v25, 9  ;;  %v2733_v35 = vrot.slane %v7609_v57, 5 }
 0x13b   : > { %v4245_v3 = vrot.slane %v4243_v2, 4  ;;  %v5514_v1 = vcombine.low %v4237_v19, %v4240_v32  ;;  %v4257_v29 = vrot.slane %v8493_v23, 5  ;;  %v4244_v6 = vsel %vm6645_vm7, %v5499_v8, %v4243_v2  ;;  %v8497_v2 = vld [vmem:[#allocation14_spill] sm:$0xff]  ;;  %v8499_v19 = vld [vmem:[#allocation32_spill] sm:$0xff] }
 0x13c   : > { %5971 = vmatmul.mubr.msk.bf16.gmra.mrb[60].mxu0 %vm736_vm1, %v5478_v13  ;;  %v2721_v13 = vrot.slane %v2719_v36, 4  ;;  %v4251_v46 = vsel %vm6645_vm7, %v5500_v24, %v4250_v27  ;;  %v4254_v45 = vsel %vm6645_vm7, %v4252_v33, %v4253_v59  ;;  %v4260_v28 = vrot.slane %v6316_v52, 5  ;;  %v6317_v8 = vld [vmem:[%s6465_s29 + $0x38] sm:$0x1]  ;;  %v6319_v24 = vld [vmem:[%s6465_s29 + $0x40] sm:$0xf] }
 0x13d   : > { %5976 = vmatprep.mubr.msk.bf16.mxu0 %vm736_vm1, %v5512_v63  ;;  %v4247_v63 = vsel %vm6645_vm7, %v4245_v3, %v4246_v10  ;;  %v4264_v18 = vrot.slane %v7599_v30, 5  ;;  %v2720_v5 = vsel %vm6645_vm7, %v5334_v61, %v2719_v36  ;;  %v5516_v17 = vcombine.low %v4251_v46, %v4254_v45  ;;  %v6320_v59 = vld [vmem:[%s6465_s29 + $0x3c] sm:$0xf]  ;;  %v6325_v45 = vld [vmem:[%s6465_s29 + $0x4c] sm:$0xf] }
 0x13e   : > { %v5515_v27 = vcombine.low %v4244_v6, %v4247_v63  ;;  %v2723_v57 = vsel %vm6645_vm7, %v2721_v13, %v2722_v31  ;;  %v7786_v0 = vsel %vm6645_vm7, %v5335_v43, %v2726_v11  ;;  %v7790_v56 = vsel %vm6645_vm7, %v2728_v20, %v2729_v54  ;;  %v6318_v11 = vld [vmem:[%s6465_s29 + $0x68] sm:$0x1]  ;;  %v6322_v63 = vld [vmem:[%s6465_s29 + $0x7c] sm:$0xf]  ;;  %v6323_v20 = vld [vmem:[%s6465_s29 + $0x44] sm:$0x1] }
 0x13f   : > { %v7794_v30 = vsel %vm6645_vm7, %v5501_v15, %v4257_v29  ;;  %v5336_v32 = vrot.slane %v8499_v19, 9  ;;  %v2735_v39 = vrot.slane %v2733_v35, 4  ;;  %v2736_v51 = vrot.slane %v6317_v8, 5  ;;  %v6324_v54 = vld [vmem:[%s6465_s29 + $0x6c] sm:$0xf] }
 0x140   : > { %v7745_v26 = vpop.f32.mrb[16].mxu0  ;;  %v5502_v10 = vrot.slane %v8500_v41, 9  ;;  %v4266_v55 = vrot.slane %v4264_v18, 4  ;;  %v2740_v33 = vrot.slane %v6319_v24, 5  ;;  %v5351_v6 = vcombine.low %v7786_v0, %v7790_v56  ;;  %v6327_v52 = vld [vmem:[%s6465_s29 + $0x48] sm:$0xf] }
 0x141   : > { %5865 = vmatmul.mubr.msk.bf16.gmra.mrb[56].mxu1 %vm736_vm1, %v5313_v53  ;;  %v7753_v42 = vpop.f32.mrb[17].mxu0  ;;  %v5315_v53 = vcombine.low %v8498_v44, %v8497_v2  ;;  %v7824_v61 = vsel %vm6645_vm7, %v5336_v32, %v2733_v35  ;;  %v7829_v13 = vsel %vm6645_vm7, %v2735_v39, %v2736_v51  ;;  %v4278_v25 = vrot.slane %v6322_v63, 5  ;;  %v6331_v39 = vld [vmem:[%s6465_s29 + $0x80] sm:$0x1] }
 0x142   : > { %5868 = vmatprep.mubr.msk.bf16.mxu1 %vm736_vm1, %v5314_v9  ;;  %v7760_v34 = vpop.f32.mrb[18].mxu0  ;;  %v4259_v9 = vrot.slane %v4257_v29, 4  ;;  %v5350_v29 = vcombine.low %v2720_v5, %v2723_v57  ;;  %v4265_v48 = vsel %vm6645_vm7, %v5502_v10, %v4264_v18  ;;  %v2742_v43 = vrot.slane %v2740_v33, 4  ;;  %v6329_v57 = vld [vmem:[%s6465_s29 + $0x58] sm:$0xf] }
 0x143   : > { %v7766_v14 = vpop.f32.mrb[19].mxu0  ;;  %v2743_v60 = vrot.slane %v6323_v20, 5  ;;  %v5503_v46 = vrot.slane %v6324_v54, 9  ;;  %v2747_v37 = vrot.slane %v6325_v45, 5  ;;  %v4273_v35 = vrot.slane %v4271_v47, 4 }
 0x144   : > { %5977 = vmatmul.mubr.msk.bf16.vlgmr.msra.gmra.mrb[32].mxu0 %vm736_vm1, %v5513_v12  ;;  %v7803_v3 = vsel %vm6645_vm7, %v4259_v9, %v4260_v28  ;;  %v4267_v12 = vrot.slane %v6318_v11, 5  ;;  %v5338_v28 = vrot.slane %v6327_v52, 9  ;;  %v4280_v32 = vrot.slane %v4278_v25, 4 }
 0x145   : > { %5980 = vmatprep.mubr.msk.bf16.mxu0 %vm736_vm1, %v5514_v1  ;;  %v5337_v1 = vrot.slane %v6320_v59, 9  ;;  %v5517_v40 = vcombine.low %v7794_v30, %v7803_v3  ;;  %v6330_v30 = vld [vmem:[%s6465_s29 + $0x78] sm:$0xf]  ;;  %v4281_v8 = vrot.slane %v6331_v39, 5  ;;  %v7859_v10 = vsel %vm6645_vm7, %v5503_v46, %v4271_v47 }
 0x146   : > { %v4268_v31 = vsel %vm6645_vm7, %v4266_v55, %v4267_v12  ;;  %v5504_v19 = vrot.slane %v6330_v30, 9  ;;  %v2749_v55 = vrot.slane %v2747_v37, 4  ;;  %v6341_v30 = vld [vmem:[%s6465_s29 + $0x98] sm:$0x1] }
 0x147   : > { %v7841_v15 = vsel %vm6645_vm7, %v5337_v1, %v2740_v33  ;;  %v6332_v33 = vld [vmem:[%s6465_s29 + $0x54] sm:$0xf]  ;;  %v6333_v1 = vld [vmem:[%s6465_s29 + $0x88] sm:$0xf] }
 0x148   : > { %v7798_v36 = vpop.f32.mrb[20].mxu0  ;;  %v5339_v59 = vrot.slane %v6332_v33, 9  ;;  %v4285_v21 = vrot.slane %v6333_v1, 5 }
 0x149   : > { %5869 = vmatmul.mubr.msk.bf16.gmra.mrb[60].mxu1 %vm736_vm1, %v5315_v53  ;;  %v7807_v38 = vpop.f32.mrb[21].mxu0  ;;  %v6326_v53 = vld [vmem:[%s6465_s29 + $0x74] sm:$0x1] }
 0x14a   : > { %5874 = vmatprep.mubr.msk.bf16.mxu1 %vm736_vm1, %v5349_v4  ;;  %v7811_v22 = vpop.f32.mrb[22].mxu0  ;;  %v4274_v9 = vrot.slane %v6326_v53, 5  ;;  %v5518_v4 = vcombine.low %v4265_v48, %v4268_v31  ;;  %v6334_v48 = vld [vmem:[%s6465_s29 + $0x5c] sm:$0x1]  ;;  %v4287_v53 = vrot.slane %v4285_v21, 4 }
 0x14b   : > { %v7815_v23 = vpop.f32.mrb[23].mxu0  ;;  %v2757_v31 = vrot.slane %v6334_v48, 5 }
 0x14c   : > { %5981 = vmatmul.mubr.msk.bf16.gmra.mrb[36].mxu0 %vm736_vm1, %v5515_v27  ;;  %v6328_v27 = vld [vmem:[%s6465_s29 + $0x50] sm:$0x1]  ;;  %v7867_v24 = vsel %vm6645_vm7, %v4273_v35, %v4274_v9  ;;  %v6338_v9 = vld [vmem:[%s6465_s29 + $0x8c] sm:$0x1] }
 0x14d   : > { %5984 = vmatprep.mubr.msk.bf16.mxu0 %vm736_vm1, %v5516_v17  ;;  %v2750_v5 = vrot.slane %v6328_v27, 5  ;;  %v2754_v17 = vrot.slane %v6329_v57, 5  ;;  %v5519_v20 = vcombine.low %v7859_v10, %v7867_v24  ;;  %v4288_v52 = vrot.slane %v6338_v9, 5 }
 0x14f   : > { %v5756_v18 = vpop.f32.mrb[16].mxu1  ;;  %v7898_v54 = vsel %vm6645_vm7, %v2749_v55, %v2750_v5  ;;  %v7903_v45 = vsel %vm6645_vm7, %v5339_v59, %v2754_v17 }
 0x150   : > { %v6026_v0 = vadd.f32 %v7745_v26, %v5756_v18  ;;  %v1179_v56 = vpop.f32.mrb[17].mxu1  ;;  %v2744_v26 = vsel %vm6645_vm7, %v2742_v43, %v2743_v60  ;;  %v7894_v60 = vsel %vm6645_vm7, %v5338_v28, %v2747_v37 }
 0x151   : > { %5875 = vmatmul.mubr.msk.bf16.vlgmr.msra.gmra.mrb[32].mxu1 %vm736_vm1, %v5350_v29  ;;  %v6027_v51 = vadd.f32 %v7753_v42, %v1179_v56  ;;  %v5757_v3 = vpop.f32.mrb[18].mxu1  ;;  %v7852_v41 = vpop.f32.mrb[24].mxu0 }
 0x152   : > { %5878 = vmatprep.mubr.msk.bf16.mxu1 %vm736_vm1, %v5351_v6  ;;  %1686 = vst.msk [vmem:[#allocation2 + $0x90] sm:$0xff] %vm1667_vm8, %v6026_v0  ;;  %v6028_v11 = vadd.f32 %v7760_v34, %v5757_v3  ;;  %v1182_v12 = vpop.f32.mrb[19].mxu1  ;;  %v7863_v42 = vpop.f32.mrb[25].mxu0  ;;  %v5352_v34 = vcombine.low %v7824_v61, %v7829_v13  ;;  %v2756_v6 = vrot.slane %v2754_v17, 4  ;;  %v4282_v61 = vsel %vm6645_vm7, %v4280_v32, %v4281_v8  ;;  %v6335_v13 = vld [vmem:[%s6465_s29 + $0x94] sm:$0xf] }
 0x153   : > { %1684 = vst.msk [vmem:[#allocation2 + $0x80] sm:$0xff] %vm1667_vm8, %v6027_v51  ;;  %v6029_v47 = vadd.f32 %v7766_v14, %v1182_v12  ;;  %v7873_v29 = vpop.f32.mrb[26].mxu0  ;;  %v5353_v14 = vcombine.low %v7841_v15, %v2744_v26  ;;  %v4292_v43 = vrot.slane %v6335_v13, 5  ;;  %v6337_v15 = vld [vmem:[%s6465_s29 + $0x84] sm:$0xf] }
 0x154   : > { %5985 = vmatmul.mubr.msk.bf16.gmra.mrb[40].mxu0 %vm736_vm1, %v5517_v40  ;;  %1687 = vst.msk [vmem:[#allocation2 + $0x98] sm:$0xff] %vm1667_vm8, %v6028_v11  ;;  %v7880_v63 = vpop.f32.mrb[27].mxu0  ;;  %v4279_v40 = vsel %vm6645_vm7, %v5504_v19, %v4278_v25  ;;  %v6336_v25 = vld [vmem:[%s6465_s29 + $0x64] sm:$0xf]  ;;  %v5505_v35 = vrot.slane %v6337_v15, 9  ;;  %v7909_v28 = vsel %vm6645_vm7, %v2756_v6, %v2757_v31  ;;  %v4295_v19 = vrot.slane %v6341_v30, 5 }
 0x155   : > { %5988 = vmatprep.mubr.msk.bf16.mxu0 %vm736_vm1, %v5518_v4  ;;  %1685 = vst.msk [vmem:[#allocation2 + $0x88] sm:$0xff] %vm1667_vm8, %v6029_v47  ;;  %v2761_v46 = vrot.slane %v6336_v25, 5  ;;  %v5520_v37 = vcombine.low %v4279_v40, %v4282_v61  ;;  %v6339_v4 = vld [vmem:[%s6465_s29 + $0x60] sm:$0xf]  ;;  %v6340_v17 = vld [vmem:[%s6465_s29 + $0x90] sm:$0xf]  ;;  %v5355_v1 = vcombine.low %v7903_v45, %v7909_v28 }
 0x156   : > { %v5340_v27 = vrot.slane %v6339_v4, 9  ;;  %v5506_v0 = vrot.slane %v6340_v17, 9  ;;  %v4294_v56 = vrot.slane %v4292_v43, 4  ;;  %v6342_v3 = vld [vmem:[%s6465_s29 + $0x68] sm:$0x1]  ;;  %v7927_v11 = vsel %vm6645_vm7, %v5505_v35, %v4285_v21 }
 0x157   : > { %v5760_v18 = vpop.f32.mrb[20].mxu1  ;;  %v2763_v51 = vrot.slane %v2761_v46, 4  ;;  %v6343_v12 = vld [vmem:[%s6465_s29 + $0x70] sm:$0xf]  ;;  %v6344_v21 = vld [vmem:[%s6465_s29 + $0xa0] sm:$0xf] }
 0x158   : > { %v6030_v5 = vadd.f32 %v7798_v36, %v5760_v18  ;;  %v1195_v57 = vpop.f32.mrb[21].mxu1  ;;  %v2764_v36 = vrot.slane %v6342_v3, 5  ;;  %v2768_v24 = vrot.slane %v6343_v12, 5  ;;  %v4299_v47 = vrot.slane %v6344_v21, 5  ;;  %v6345_v31 = vld [vmem:[%s6465_s29 + $0xac] sm:$0xf] }
 0x159   : > { %5879 = vmatmul.mubr.msk.bf16.gmra.mrb[36].mxu1 %vm736_vm1, %v5352_v34  ;;  %v6031_v32 = vadd.f32 %v7807_v38, %v1195_v57  ;;  %v5761_v39 = vpop.f32.mrb[22].mxu1  ;;  %v7917_v8 = vpop.f32.mrb[28].mxu0  ;;  %v7931_v38 = vsel %vm6645_vm7, %v4287_v53, %v4288_v52  ;;  %v4293_v6 = vsel %vm6645_vm7, %v5506_v0, %v4292_v43  ;;  %v4296_v48 = vsel %vm6645_vm7, %v4294_v56, %v4295_v19  ;;  %v6346_v13 = vld [vmem:[%s6465_s29 + $0x6c] sm:$0xf]  ;;  %v6348_v25 = vld [vmem:[%s6465_s29 + $0x9c] sm:$0xf] }
 0x15a   : > { %5882 = vmatprep.mubr.msk.bf16.mxu1 %vm736_vm1, %v5353_v14  ;;  %1690 = vst.msk [vmem:[#allocation2 + $0xb0] sm:$0xff] %vm1667_vm8, %v6030_v5  ;;  %v6032_v26 = vadd.f32 %v7811_v22, %v5761_v39  ;;  %v1198_v10 = vpop.f32.mrb[23].mxu1  ;;  %v7923_v55 = vpop.f32.mrb[29].mxu0  ;;  %v5354_v22 = vcombine.low %v7894_v60, %v7898_v54  ;;  %v4306_v14 = vrot.slane %v6345_v31, 5  ;;  %v5521_v40 = vcombine.low %v7927_v11, %v7931_v38  ;;  %v6347_v60 = vld [vmem:[%s6465_s29 + $0x74] sm:$0x1] }
 0x15b   : > { %1688 = vst.msk [vmem:[#allocation2 + $0xa0] sm:$0xff] %vm1667_vm8, %v6031_v32  ;;  %v6033_v33 = vadd.f32 %v7815_v23, %v1198_v10  ;;  %v7936_v59 = vpop.f32.mrb[30].mxu0  ;;  %v7950_v23 = vsel %vm6645_vm7, %v5340_v27, %v2761_v46  ;;  %v7962_v61 = vsel %vm6645_vm7, %v2763_v51, %v2764_v36  ;;  %v2771_v43 = vrot.slane %v6347_v60, 5  ;;  %v6349_v45 = vld [vmem:[%s6465_s29 + $0xa4] sm:$0x1] }
 0x15c   : > { %5989 = vmatmul.mubr.msk.bf16.gmra.mrb[44].mxu0 %vm736_vm1, %v5519_v20  ;;  %1691 = vst.msk [vmem:[#allocation2 + $0xb8] sm:$0xff] %vm1667_vm8, %v6032_v26  ;;  %v7945_v34 = vpop.f32.mrb[31].mxu0  ;;  %v5341_v20 = vrot.slane %v6346_v13, 9  ;;  %v2770_v54 = vrot.slane %v2768_v24, 4  ;;  %v5507_v46 = vrot.slane %v6348_v25, 9  ;;  %v4302_v15 = vrot.slane %v6349_v45, 5 }
 0x15d   : > { %5992 = vmatprep.mubr.msk.bf16.mxu0 %vm736_vm1, %v5520_v37  ;;  %1689 = vst.msk [vmem:[#allocation2 + $0xa8] sm:$0xff] %vm1667_vm8, %v6033_v33  ;;  %v6350_v35 = vld [vmem:[%s6465_s29 + $0x7c] sm:$0xf]  ;;  %v5522_v52 = vcombine.low %v4293_v6, %v4296_v48  ;;  %v4301_v18 = vrot.slane %v4299_v47, 4  ;;  %v6351_v37 = vld [vmem:[%s6465_s29 + $0x88] sm:$0xf]  ;;  %v5356_v21 = vcombine.low %v7950_v23, %v7962_v61 }
 0x15e   : > { %v2775_v53 = vrot.slane %v6350_v35, 5  ;;  %v2782_v28 = vrot.slane %v6351_v37, 5  ;;  %v6352_v5 = vld [vmem:[%s6465_s29 + $0xa8] sm:$0xf]  ;;  %v4308_v17 = vrot.slane %v4306_v14, 4  ;;  %v2769_v32 = vsel %vm6645_vm7, %v5341_v20, %v2768_v24 }
 0x15f   : > { %v5764_v9 = vpop.f32.mrb[24].mxu1  ;;  %v5508_v57 = vrot.slane %v6352_v5, 9  ;;  %v6353_v0 = vld [vmem:[%s6465_s29 + $0xb0] sm:$0x1]  ;;  %v6354_v39 = vld [vmem:[%s6465_s29 + $0x78] sm:$0xf]  ;;  %v2772_v10 = vsel %vm6645_vm7, %v2770_v54, %v2771_v43  ;;  %v4300_v24 = vsel %vm6645_vm7, %v5507_v46, %v4299_v47 }
 0x160   : > { %v6034_v4 = vadd.f32 %v7852_v41, %v5764_v9  ;;  %v1211_v27 = vpop.f32.mrb[25].mxu1  ;;  %v4309_v56 = vrot.slane %v6353_v0, 5  ;;  %v5342_v51 = vrot.slane %v6354_v39, 9  ;;  %v6355_v41 = vld [vmem:[%s6465_s29 + $0x80] sm:$0x1]  ;;  %v2784_v33 = vrot.slane %v2782_v28, 4 }
 0x161   : > { %5883 = vmatmul.mubr.msk.bf16.gmra.mrb[40].mxu1 %vm736_vm1, %v5354_v22  ;;  %v6035_v30 = vadd.f32 %v7863_v42, %v1211_v27  ;;  %v5765_v19 = vpop.f32.mrb[26].mxu1  ;;  %v2778_v3 = vrot.slane %v6355_v41, 5  ;;  %v2777_v42 = vrot.slane %v2775_v53, 4  ;;  %v6356_v11 = vld [vmem:[%s6465_s29 + $0x84] sm:$0xf]  ;;  %v5357_v31 = vcombine.low %v2769_v32, %v2772_v10 }
 0x162   : > { %5886 = vmatprep.mubr.msk.bf16.mxu1 %vm736_vm1, %v5355_v1  ;;  %1694 = vst.msk [vmem:[#allocation2 + $0xd0] sm:$0xff] %vm1667_vm8, %v6034_v4  ;;  %v6036_v36 = vadd.f32 %v7873_v29, %v5765_v19  ;;  %v1214_v26 = vpop.f32.mrb[27].mxu1  ;;  %v5343_v38 = vrot.slane %v6356_v11, 9  ;;  %v4303_v29 = vsel %vm6645_vm7, %v4301_v18, %v4302_v15  ;;  %v6357_v22 = vld [vmem:[%s6465_s29 + $0x8c] sm:$0x1]  ;;  %v4310_v47 = vsel %vm6645_vm7, %v4308_v17, %v4309_v56 }
 0x163   : > { %1692 = vst.msk [vmem:[#allocation2 + $0xc0] sm:$0xff] %vm1667_vm8, %v6035_v30  ;;  %v6037_v12 = vadd.f32 %v7880_v63, %v1214_v26  ;;  %v2785_v1 = vrot.slane %v6357_v22, 5  ;;  %v4307_v63 = vsel %vm6645_vm7, %v5508_v57, %v4306_v14  ;;  %v6358_v6 = vld [vmem:[%s6465_s29 + $0xb8] sm:$0xf]  ;;  %v5523_v13 = vcombine.low %v4300_v24, %v4303_v29  ;;  %v6359_v54 = vld [vmem:[%s6465_s29 + $0xb4] sm:$0xf] }
 0x164   : > { %5993 = vmatmul.mubr.msk.bf16.gmra.mrb[48].mxu0 %vm736_vm1, %v5521_v40  ;;  %1695 = vst.msk [vmem:[#allocation2 + $0xd8] sm:$0xff] %vm1667_vm8, %v6036_v36  ;;  %v4313_v48 = vrot.slane %v6358_v6, 5  ;;  %v4320_v40 = vrot.slane %v7373_v49, 5  ;;  %v2776_v23 = vsel %vm6645_vm7, %v5342_v51, %v2775_v53  ;;  %v2779_v61 = vsel %vm6645_vm7, %v2777_v42, %v2778_v3  ;;  %v6360_v15 = vld [vmem:[%s6465_s29 + $0xbc] sm:$0x1] }
 0x165   : > { %5996 = vmatprep.mubr.msk.bf16.mxu0 %vm736_vm1, %v5522_v52  ;;  %1693 = vst.msk [vmem:[#allocation2 + $0xc8] sm:$0xff] %vm1667_vm8, %v6037_v12  ;;  %v2783_v14 = vsel %vm6645_vm7, %v5343_v38, %v2782_v28  ;;  %v5524_v60 = vcombine.low %v4307_v63, %v4310_v47  ;;  %v2786_v43 = vsel %vm6645_vm7, %v2784_v33, %v2785_v1  ;;  %v5509_v49 = vrot.slane %v6359_v54, 9  ;;  %v6361_v53 = vld [vmem:[%s6465_s29 + $0x94] sm:$0xf]  ;;  %v6362_v37 = vld [vmem:[%s6465_s29 + $0xc0] sm:$0xf] }
 0x166   : > { %v4315_v45 = vrot.slane %v4313_v48, 4  ;;  %v4316_v35 = vrot.slane %v6360_v15, 5  ;;  %v2789_v9 = vrot.slane %v6361_v53, 5  ;;  %v5510_v28 = vrot.slane %v6362_v37, 9  ;;  %v6363_v27 = vld [vmem:[%s6465_s29 + $0xc8] sm:$0x1] }
 0x167   : > { %v5768_v20 = vpop.f32.mrb[28].mxu1  ;;  %v4322_v4 = vrot.slane %v4320_v40, 4  ;;  %v6364_v17 = vld [vmem:[%s6465_s29 + $0xa0] sm:$0xf]  ;;  %v5358_v56 = vcombine.low %v2776_v23, %v2779_v61  ;;  %v6365_v30 = vld [vmem:[%s6465_s29 + $0x90] sm:$0xf]  ;;  %v4314_v32 = vsel %vm6645_vm7, %v5509_v49, %v4313_v48 }
 0x168   : > { %v6038_v25 = vadd.f32 %v7917_v8, %v5768_v20  ;;  %v1227_v46 = vpop.f32.mrb[29].mxu1  ;;  %v4323_v8 = vrot.slane %v6363_v27, 5  ;;  %v2796_v0 = vrot.slane %v6364_v17, 5  ;;  %v5344_v19 = vrot.slane %v6365_v30, 9  ;;  %v6366_v41 = vld [vmem:[%s6465_s29 + $0x98] sm:$0x1] }
 0x169   : > { %5887 = vmatmul.mubr.msk.bf16.gmra.mrb[44].mxu1 %vm736_vm1, %v5356_v21  ;;  %v6039_v52 = vadd.f32 %v7923_v55, %v1227_v46  ;;  %v5769_v18 = vpop.f32.mrb[30].mxu1  ;;  %v4317_v39 = vsel %vm6645_vm7, %v4315_v45, %v4316_v35  ;;  %v2791_v51 = vrot.slane %v2789_v9, 4  ;;  %v2792_v3 = vrot.slane %v6366_v41, 5  ;;  %v6367_v10 = vld [vmem:[%s6465_s29 + $0x9c] sm:$0xf] }
 0x16a   : > { %5890 = vmatprep.mubr.msk.bf16.mxu1 %vm736_vm1, %v5357_v31  ;;  %1698 = vst.msk [vmem:[#allocation2 + $0xf0] sm:$0xff] %vm1667_vm8, %v6038_v25  ;;  %v6040_v5 = vadd.f32 %v7936_v59, %v5769_v18  ;;  %v1230_v57 = vpop.f32.mrb[31].mxu1  ;;  %v5359_v59 = vcombine.low %v2783_v14, %v2786_v43  ;;  %v4321_v36 = vsel %vm6645_vm7, %v5510_v28, %v4320_v40  ;;  %v5345_v42 = vrot.slane %v6367_v10, 9  ;;  %v6368_v38 = vld [vmem:[%s6465_s29 + $0xa4] sm:$0x1]  ;;  %v8501_v1 = vld [vmem:[#allocation6_spill] sm:$0xff] }
 0x16b   : > { %1696 = vst.msk [vmem:[#allocation2 + $0xe0] sm:$0xff] %vm1667_vm8, %v6039_v52  ;;  %v6041_v55 = vadd.f32 %v7945_v34, %v1230_v57  ;;  %v4327_v34 = vrot.slane %v8477_v16, 5  ;;  %v4324_v26 = vsel %vm6645_vm7, %v4322_v4, %v4323_v8  ;;  %v2798_v11 = vrot.slane %v2796_v0, 4  ;;  %v6369_v29 = vld [vmem:[%s6465_s29 + $0xcc] sm:$0xf]  ;;  %v8502_v43 = vld [vmem:[#allocation9_spill] sm:$0xff] }
 0x16c   : > { %5997 = vmatmul.mubr.msk.bf16.gmra.mrb[52].mxu0 %vm736_vm1, %v5523_v13  ;;  %1699 = vst.msk [vmem:[#allocation2 + $0xf8] sm:$0xff] %vm1667_vm8, %v6040_v5  ;;  %v2799_v12 = vrot.slane %v6368_v38, 5  ;;  %v5525_v24 = vcombine.low %v4314_v32, %v4317_v39  ;;  %v5526_v16 = vcombine.low %v4321_v36, %v4324_v26  ;;  %v5511_v33 = vrot.slane %v6369_v29, 9  ;;  %v6370_v14 = vld [vmem:[%s6465_s29 + $0xa8] sm:$0xf]  ;;  %v8504_v4 = vld [vmem:[#allocation15_spill] sm:$0xff] }
 0x16d   : > { %6000 = vmatprep.mubr.msk.bf16.mxu0 %vm736_vm1, %v5524_v60  ;;  %1697 = vst.msk [vmem:[#allocation2 + $0xe8] sm:$0xff] %vm1667_vm8, %v6041_v55  ;;  %v4329_v22 = vrot.slane %v4327_v34, 4  ;;  %v4330_v21 = vrot.slane %v8501_v1, 5  ;;  %v2790_v63 = vsel %vm6645_vm7, %v5344_v19, %v2789_v9  ;;  %v2793_v47 = vsel %vm6645_vm7, %v2791_v51, %v2792_v3  ;;  %v8503_v25 = vld [vmem:[#allocation12_spill] sm:$0xff]  ;;  %v3116_v32 = vld [vmem:[#allocation2 + $0x10] sm:$0xff]  ;;  %v3117_v3 = vld [vmem:[#allocation2 + $0x18] sm:$0xff] }
 0x16e   : > { %v2803_v6 = vrot.slane %v8483_v7, 5  ;;  %v2797_v48 = vsel %vm6645_vm7, %v5345_v42, %v2796_v0  ;;  %v2800_v31 = vsel %vm6645_vm7, %v2798_v11, %v2799_v12  ;;  %v2810_v40 = vrot.slane %v8485_v50, 5  ;;  %v3115_v10 = vld [vmem:[#allocation2 + $0x8] sm:$0xff]  ;;  %v3120_v29 = vld [vmem:[#allocation2 + $0x30] sm:$0xff]  ;;  %v3118_v1 = vld [vmem:[#allocation2 + $0x20] sm:$0xff] }
 0x16f   : > { %v5360_v13 = vcombine.low %v2790_v63, %v2793_v47  ;;  %v4328_v23 = vsel %vm6645_vm7, %v5511_v33, %v4327_v34  ;;  %v4331_v61 = vsel %vm6645_vm7, %v4329_v22, %v4330_v21  ;;  %v5361_v7 = vcombine.low %v2797_v48, %v2800_v31  ;;  %v3114_v34 = vld [vmem:[#allocation2] sm:$0xff] }
 0x170   : > { %v5346_v20 = vrot.slane %v6370_v14, 9  ;;  %v2805_v60 = vrot.slane %v2803_v6, 4  ;;  %v2806_v54 = vrot.slane %v8502_v43, 5  ;;  %v5347_v49 = vrot.slane %v8486_v62, 9 }
 0x171   : > { %5891 = vmatmul.mubr.msk.bf16.gmra.mrb[48].mxu1 %vm736_vm1, %v5358_v56  ;;  %v2812_v50 = vrot.slane %v2810_v40, 4  ;;  %v2813_v46 = vrot.slane %v8503_v25, 5  ;;  %v5527_v45 = vcombine.low %v4328_v23, %v4331_v61  ;;  %v2817_v53 = vrot.slane %v8497_v2, 5  ;;  %v3119_v23 = vld [vmem:[#allocation2 + $0x28] sm:$0xff] }
 0x172   : > { %5894 = vmatprep.mubr.msk.bf16.mxu1 %vm736_vm1, %v5359_v59  ;;  %v2804_v15 = vsel %vm6645_vm7, %v5346_v20, %v2803_v6  ;;  %v2807_v35 = vsel %vm6645_vm7, %v2805_v60, %v2806_v54  ;;  %v2811_v9 = vsel %vm6645_vm7, %v5347_v49, %v2810_v40  ;;  %v5348_v37 = vrot.slane %v8498_v44, 9  ;;  %v3121_v6 = vld [vmem:[#allocation2 + $0x38] sm:$0xff] }
 0x173   : > { %v2814_v62 = vsel %vm6645_vm7, %v2812_v50, %v2813_v46  ;;  %v5362_v52 = vcombine.low %v2804_v15, %v2807_v35  ;;  %v2819_v28 = vrot.slane %v2817_v53, 4  ;;  %v2820_v27 = vrot.slane %v8504_v4, 5 }
 0x174   : > { %6001 = vmatmul.mubr.msk.bf16.gmra.mrb[56].mxu0 %vm736_vm1, %v5525_v24  ;;  %v5363_v18 = vcombine.low %v2811_v9, %v2814_v62  ;;  %v2818_v2 = vsel %vm6645_vm7, %v5348_v37, %v2817_v53  ;;  %v3122_v53 = vld [vmem:[#allocation2 + $0x40] sm:$0xff]  ;;  %v3125_v37 = vld [vmem:[#allocation2 + $0x58] sm:$0xff] }
 0x175   : > { %6004 = vmatprep.mubr.msk.bf16.mxu0 %vm736_vm1, %v5526_v16  ;;  %v2821_v8 = vsel %vm6645_vm7, %v2819_v28, %v2820_v27  ;;  %v8127_v9 = vld [vmem:[%s8402_s2] ss:$0 sm:$0xff] }
 0x176   : > { %v5364_v5 = vcombine.low %v2818_v2, %v2821_v8  ;;  %v3123_v8 = vld [vmem:[#allocation2 + $0x48] sm:$0xff] }
 0x179   : > { %5895 = vmatmul.mubr.msk.bf16.gmra.mrb[52].mxu1 %vm736_vm1, %v5360_v13 }
 0x17a   : > { %5898 = vmatprep.mubr.msk.bf16.mxu1 %vm736_vm1, %v5361_v7 }
 0x17c   : > { %6005 = vmatmul.mubr.msk.bf16.gmra.mrb[60].mxu0 %vm736_vm1, %v5527_v45  ;;  %v3124_v45 = vld [vmem:[#allocation2 + $0x50] sm:$0xff] }
 0x181   : > { %5899 = vmatmul.mubr.msk.bf16.gmra.mrb[56].mxu1 %vm736_vm1, %v5362_v52 }
 0x182   : > { %5902 = vmatprep.mubr.msk.bf16.mxu1 %vm736_vm1, %v5363_v18 }
 0x189   : > { %5903 = vmatmul.mubr.msk.bf16.gmra.mrb[60].mxu1 %vm736_vm1, %v5364_v5 }
 0x217   : > { %v5978_v57 = vpop.f32.mrb[32].mxu0 }
 0x218   : > { %v4465_v17 = vpop.f32.mrb[33].mxu0 }
 0x219   : > { %v5979_v0 = vpop.f32.mrb[34].mxu0 }
 0x21a   : > { %v4468_v44 = vpop.f32.mrb[35].mxu0 }
 0x21f   : > { %v8088_v55 = vpop.f32.mrb[36].mxu0 }
 0x220   : > { %v8090_v56 = vpop.f32.mrb[37].mxu0 }
 0x221   : > { %v8092_v30 = vpop.f32.mrb[38].mxu0 }
 0x222   : > { %v8094_v19 = vpop.f32.mrb[39].mxu0 }
 0x224   : > { %v5876_v59 = vpop.f32.mrb[32].mxu1 }
 0x225   : > { %v3148_v39 = vadd.f32 %v5876_v59, %v3116_v32  ;;  %v2955_v58 = vpop.f32.mrb[33].mxu1 }
 0x226   : > { %v3146_v51 = vadd.f32 %v3114_v34, %v2955_v58  ;;  %v5877_v41 = vpop.f32.mrb[34].mxu1 }
 0x227   : > { %3180 = vst.msk [vmem:[#allocation2 + $0x10] sm:$0xff] %vm1667_vm8, %v3148_v39  ;;  %v3149_v36 = vadd.f32 %v5877_v41, %v3117_v3  ;;  %v2958_v26 = vpop.f32.mrb[35].mxu1  ;;  %v8097_v42 = vpop.f32.mrb[40].mxu0 }
 0x228   : > { %3178 = vst.msk [vmem:[#allocation2] sm:$0xff] %vm1667_vm8, %v3146_v51  ;;  %v3147_v11 = vadd.f32 %v3115_v10, %v2958_v26  ;;  %v8100_v38 = vpop.f32.mrb[41].mxu0 }
 0x229   : > { %3181 = vst.msk [vmem:[#allocation2 + $0x18] sm:$0xff] %vm1667_vm8, %v3149_v36  ;;  %v8103_v12 = vpop.f32.mrb[42].mxu0 }
 0x22a   : > { %3179 = vst.msk [vmem:[#allocation2 + $0x8] sm:$0xff] %vm1667_vm8, %v3147_v11  ;;  %v8106_v24 = vpop.f32.mrb[43].mxu0 }
 0x22c   : > { %v5880_v16 = vpop.f32.mrb[36].mxu1 }
 0x22d   : > { %v3152_v33 = vadd.f32 %v5880_v16, %v3120_v29  ;;  %v2971_v22 = vpop.f32.mrb[37].mxu1 }
 0x22e   : > { %v4626_v21 = vld [vmem:[#allocation2 + $0x10] sm:$0xff]  ;;  %v3150_v63 = vadd.f32 %v3118_v1, %v2971_v22  ;;  %v5881_v47 = vpop.f32.mrb[38].mxu1 }
 0x22f   : > { %v4658_v48 = vadd.f32 %v5978_v57, %v4626_v21  ;;  %v4624_v31 = vld [vmem:[#allocation2] sm:$0xff]  ;;  %3184 = vst.msk [vmem:[#allocation2 + $0x30] sm:$0xff] %vm1667_vm8, %v3152_v33  ;;  %v3153_v40 = vadd.f32 %v5881_v47, %v3121_v6  ;;  %v2974_v13 = vpop.f32.mrb[39].mxu1  ;;  %v8109_v61 = vpop.f32.mrb[44].mxu0  ;;  %v3128_v33 = vld [vmem:[#allocation2 + $0x70] sm:$0xff] }
 0x230   : > { %v4656_v7 = vadd.f32 %v4624_v31, %v4465_v17  ;;  %v4627_v14 = vld [vmem:[#allocation2 + $0x18] sm:$0xff]  ;;  %3182 = vst.msk [vmem:[#allocation2 + $0x20] sm:$0xff] %vm1667_vm8, %v3150_v63  ;;  %v3151_v20 = vadd.f32 %v3119_v23, %v2974_v13  ;;  %v8112_v60 = vpop.f32.mrb[45].mxu0  ;;  %v8136_v17 = vld [vmem:[%s8402_s2 + $0x1] ss:$0 sm:$0xff] }
 0x231   : > { %4690 = vst.msk [vmem:[#allocation2 + $0x10] sm:$0xff] %vm1667_vm8, %v4658_v48  ;;  %v4659_v43 = vadd.f32 %v5979_v0, %v4627_v14  ;;  %v4625_v54 = vld [vmem:[#allocation2 + $0x8] sm:$0xff]  ;;  %3185 = vst.msk [vmem:[#allocation2 + $0x38] sm:$0xff] %vm1667_vm8, %v3153_v40  ;;  %v8116_v49 = vpop.f32.mrb[46].mxu0  ;;  %v3126_v63 = vld [vmem:[#allocation2 + $0x60] sm:$0xff] }
 0x232   : > { %4688 = vst.msk [vmem:[#allocation2] sm:$0xff] %vm1667_vm8, %v4656_v7  ;;  %v4657_v50 = vadd.f32 %v4625_v54, %v4468_v44  ;;  %3183 = vst.msk [vmem:[#allocation2 + $0x28] sm:$0xff] %vm1667_vm8, %v3151_v20  ;;  %v8120_v25 = vpop.f32.mrb[47].mxu0  ;;  %v3129_v13 = vld [vmem:[#allocation2 + $0x78] sm:$0xff] }
 0x233   : > { %4691 = vst.msk [vmem:[#allocation2 + $0x18] sm:$0xff] %vm1667_vm8, %v4659_v43 }
 0x234   : > { %4689 = vst.msk [vmem:[#allocation2 + $0x8] sm:$0xff] %vm1667_vm8, %v4657_v50  ;;  %v5884_v46 = vpop.f32.mrb[40].mxu1 }
 0x235   : > { %v3156_v15 = vadd.f32 %v5884_v46, %v3124_v45  ;;  %v2987_v35 = vpop.f32.mrb[41].mxu1 }
 0x236   : > { %v4630_v62 = vld [vmem:[#allocation2 + $0x30] sm:$0xff]  ;;  %v3154_v52 = vadd.f32 %v3122_v53, %v2987_v35  ;;  %v5885_v18 = vpop.f32.mrb[42].mxu1 }
 0x237   : > { %v4662_v28 = vadd.f32 %v8088_v55, %v4630_v62  ;;  %v4628_v4 = vld [vmem:[#allocation2 + $0x20] sm:$0xff]  ;;  %3188 = vst.msk [vmem:[#allocation2 + $0x50] sm:$0xff] %vm1667_vm8, %v3156_v15  ;;  %v3157_v27 = vadd.f32 %v5885_v18, %v3125_v37  ;;  %v2990_v2 = vpop.f32.mrb[43].mxu1  ;;  %v8131_v5 = vpop.f32.mrb[48].mxu0 }
 0x238   : > { %v4722_v57 = vld [vmem:[#allocation2 + $0x10] sm:$0xff]  ;;  %v4660_v0 = vadd.f32 %v4628_v4, %v8090_v56  ;;  %v4631_v44 = vld [vmem:[#allocation2 + $0x38] sm:$0xff]  ;;  %3186 = vst.msk [vmem:[#allocation2 + $0x40] sm:$0xff] %vm1667_vm8, %v3154_v52  ;;  %v3155_v55 = vadd.f32 %v3123_v8, %v2990_v2  ;;  %v8140_v59 = vpop.f32.mrb[49].mxu0 }
 0x239   : > { %v4759_v32 = vmul.f32 %v8127_v9, %v4722_v57  ;;  %v4720_v39 = vld [vmem:[#allocation2] sm:$0xff]  ;;  %4694 = vst.msk [vmem:[#allocation2 + $0x30] sm:$0xff] %vm1667_vm8, %v4662_v28  ;;  %v4663_v58 = vadd.f32 %v8092_v30, %v4631_v44  ;;  %v4629_v34 = vld [vmem:[#allocation2 + $0x28] sm:$0xff]  ;;  %3189 = vst.msk [vmem:[#allocation2 + $0x58] sm:$0xff] %vm1667_vm8, %v3157_v27  ;;  %v8146_v51 = vpop.f32.mrb[50].mxu0 }
 0x23a   : > { %v4757_v56 = vmul.f32 %v8127_v9, %v4720_v39  ;;  %v4723_v41 = vld [vmem:[#allocation2 + $0x18] sm:$0xff]  ;;  %4692 = vst.msk [vmem:[#allocation2 + $0x20] sm:$0xff] %vm1667_vm8, %v4660_v0  ;;  %v4661_v3 = vadd.f32 %v4629_v34, %v8094_v19  ;;  %3187 = vst.msk [vmem:[#allocation2 + $0x48] sm:$0xff] %vm1667_vm8, %v3155_v55  ;;  %v8153_v36 = vpop.f32.mrb[51].mxu0  ;;  %v3132_v34 = vld [vmem:[#allocation2 + $0x90] sm:$0xff] }
 0x23b   : > { %v4796_v26 = vadd.f32 %v8136_v17, %v4759_v32  ;;  %v4760_v30 = vmul.f32 %v8127_v9, %v4723_v41  ;;  %v4721_v10 = vld [vmem:[#allocation2 + $0x8] sm:$0xff]  ;;  %4695 = vst.msk [vmem:[#allocation2 + $0x38] sm:$0xff] %vm1667_vm8, %v4663_v58 }
 0x23c   : > { %v4794_v11 = vadd.f32 %v8136_v17, %v4757_v56  ;;  %v4758_v16 = vmul.f32 %v8127_v9, %v4721_v10  ;;  %4693 = vst.msk [vmem:[#allocation2 + $0x28] sm:$0xff] %vm1667_vm8, %v4661_v3  ;;  %v5888_v29 = vpop.f32.mrb[44].mxu1 }
 0x23d   : > { %vm4828_vm9 = vcmp.gt.f32.partialorder %v4796_v26, 0.0  ;;  %v4860_v19 = vmul.f32 0.01, %v4796_v26  ;;  %v4797_v22 = vadd.f32 %v8136_v17, %v4760_v30  ;;  %v3160_v1 = vadd.f32 %v5888_v29, %v3128_v33  ;;  %v3003_v21 = vpop.f32.mrb[45].mxu1  ;;  %v3130_v30 = vld [vmem:[#allocation2 + $0x80] sm:$0xff] }
 0x23e   : > { %vm4826_vm10 = vcmp.gt.f32.partialorder %v4794_v11, 0.0  ;;  %v4858_v47 = vmul.f32 0.01, %v4794_v11  ;;  %v4795_v6 = vadd.f32 %v8136_v17, %v4758_v16  ;;  %v4634_v48 = vld [vmem:[#allocation2 + $0x50] sm:$0xff]  ;;  %v3158_v31 = vadd.f32 %v3126_v63, %v3003_v21  ;;  %v5889_v40 = vpop.f32.mrb[46].mxu1 }
 0x23f   : > { %v4892_v23 = vsel %vm4828_vm9, %v4796_v26, %v4860_v19  ;;  %vm4829_vm11 = vcmp.gt.f32.partialorder %v4797_v22, 0.0  ;;  %v4861_v7 = vmul.f32 0.01, %v4797_v22  ;;  %v4666_v14 = vadd.f32 %v8097_v42, %v4634_v48  ;;  %v4632_v20 = vld [vmem:[#allocation2 + $0x40] sm:$0xff]  ;;  %3192 = vst.msk [vmem:[#allocation2 + $0x70] sm:$0xff] %vm1667_vm8, %v3160_v1  ;;  %v3006_v43 = vpop.f32.mrb[47].mxu1 }
 0x240   : > { %v8170_v54 = vpop.f32.mrb[52].mxu0  ;;  %4924 = vst.msk [vmem:[%s8164_s23 + $0x10] sm:$0xff] %vm1667_vm8, %v4892_v23  ;;  %v4890_v50 = vsel %vm4826_vm10, %v4794_v11, %v4858_v47  ;;  %vm4827_vm12 = vcmp.gt.f32.partialorder %v4795_v6, 0.0  ;;  %v4859_v46 = vmul.f32 0.01, %v4795_v6  ;;  %v4726_v45 = vld [vmem:[#allocation2 + $0x30] sm:$0xff]  ;;  %v4664_v15 = vadd.f32 %v4632_v20, %v8100_v38 }
 0x241   : > { %v4635_v35 = vld [vmem:[#allocation2 + $0x58] sm:$0xff]  ;;  %3190 = vst.msk [vmem:[#allocation2 + $0x60] sm:$0xff] %vm1667_vm8, %v3158_v31  ;;  %v8177_v42 = vpop.f32.mrb[53].mxu0  ;;  %4922 = vst.msk [vmem:[%s8164_s23] sm:$0xff] %vm1667_vm8, %v4890_v50  ;;  %v4893_v53 = vsel %vm4829_vm11, %v4797_v22, %v4861_v7  ;;  %v4763_v62 = vmul.f32 %v8127_v9, %v4726_v45  ;;  %v4724_v52 = vld [vmem:[#allocation2 + $0x20] sm:$0xff]  ;;  %v3161_v28 = vadd.f32 %v5889_v40, %v3129_v13 }
 0x242   : > { %4698 = vst.msk [vmem:[#allocation2 + $0x50] sm:$0xff] %vm1667_vm8, %v4666_v14  ;;  %v4667_v18 = vadd.f32 %v8103_v12, %v4635_v35  ;;  %v4633_v37 = vld [vmem:[#allocation2 + $0x48] sm:$0xff]  ;;  %v8185_v4 = vpop.f32.mrb[54].mxu0  ;;  %4925 = vst.msk [vmem:[%s8164_s23 + $0x18] sm:$0xff] %vm1667_vm8, %v4893_v53  ;;  %v4891_v27 = vsel %vm4827_vm12, %v4795_v6, %v4859_v46  ;;  %v4761_v2 = vmul.f32 %v8127_v9, %v4724_v52  ;;  %v4727_v8 = vld [vmem:[#allocation2 + $0x38] sm:$0xff] }
 0x243   : > { %v3127_v38 = vld [vmem:[#allocation2 + $0x68] sm:$0xff]  ;;  %4696 = vst.msk [vmem:[#allocation2 + $0x40] sm:$0xff] %vm1667_vm8, %v4664_v15  ;;  %v4665_v57 = vadd.f32 %v4633_v37, %v8106_v24  ;;  %v8193_v44 = vpop.f32.mrb[55].mxu0  ;;  %4923 = vst.msk [vmem:[%s8164_s23 + $0x8] sm:$0xff] %vm1667_vm8, %v4891_v27  ;;  %v4800_v12 = vadd.f32 %v8136_v17, %v4763_v62  ;;  %v4764_v55 = vmul.f32 %v8127_v9, %v4727_v8  ;;  %v3133_v19 = vld [vmem:[#allocation2 + $0x98] sm:$0xff] }
 0x244   : > { %v3159_v0 = vadd.f32 %v3127_v38, %v3006_v43  ;;  %v4725_v32 = vld [vmem:[#allocation2 + $0x28] sm:$0xff]  ;;  %4699 = vst.msk [vmem:[#allocation2 + $0x58] sm:$0xff] %vm1667_vm8, %v4667_v18  ;;  %3193 = vst.msk [vmem:[#allocation2 + $0x78] sm:$0xff] %vm1667_vm8, %v3161_v28  ;;  %v4798_v39 = vadd.f32 %v8136_v17, %v4761_v2  ;;  %v5892_v24 = vpop.f32.mrb[48].mxu1 }
 0x245   : > { %v4762_v58 = vmul.f32 %v8127_v9, %v4725_v32  ;;  %4697 = vst.msk [vmem:[#allocation2 + $0x48] sm:$0xff] %vm1667_vm8, %v4665_v57  ;;  %vm4832_vm13 = vcmp.gt.f32.partialorder %v4800_v12, 0.0  ;;  %v4864_v56 = vmul.f32 0.01, %v4800_v12  ;;  %v4801_v41 = vadd.f32 %v8136_v17, %v4764_v55  ;;  %v3019_v26 = vpop.f32.mrb[49].mxu1  ;;  %v3131_v23 = vld [vmem:[#allocation2 + $0x88] sm:$0xff] }
 0x246   : > { %3191 = vst.msk [vmem:[#allocation2 + $0x68] sm:$0xff] %vm1667_vm8, %v3159_v0  ;;  %v3164_v3 = vadd.f32 %v5892_v24, %v3132_v34  ;;  %vm4830_vm14 = vcmp.gt.f32.partialorder %v4798_v39, 0.0  ;;  %v4862_v10 = vmul.f32 0.01, %v4798_v39  ;;  %v4638_v16 = vld [vmem:[#allocation2 + $0x70] sm:$0xff]  ;;  %v3162_v29 = vadd.f32 %v3130_v30, %v3019_v26  ;;  %v5893_v33 = vpop.f32.mrb[50].mxu1 }
 0x247   : > { %v4799_v11 = vadd.f32 %v8136_v17, %v4762_v58  ;;  %v4896_v22 = vsel %vm4832_vm13, %v4800_v12, %v4864_v56  ;;  %vm4833_vm15 = vcmp.gt.f32.partialorder %v4801_v41, 0.0  ;;  %v4865_v1 = vmul.f32 0.01, %v4801_v41  ;;  %v3022_v47 = vpop.f32.mrb[51].mxu1  ;;  %v8209_v6 = vpop.f32.mrb[56].mxu0  ;;  %v3136_v57 = vld [vmem:[#allocation2 + $0xb0] sm:$0xff] }
 0x248   : > { %v4670_v21 = vadd.f32 %v8109_v61, %v4638_v16  ;;  %v4636_v63 = vld [vmem:[#allocation2 + $0x60] sm:$0xff]  ;;  %3196 = vst.msk [vmem:[#allocation2 + $0x90] sm:$0xff] %vm1667_vm8, %v3164_v3  ;;  %4928 = vst.msk [vmem:[%s8164_s23 + $0x30] sm:$0xff] %vm1667_vm8, %v4896_v22  ;;  %v4894_v48 = vsel %vm4830_vm14, %v4798_v39, %v4862_v10  ;;  %v8216_v61 = vpop.f32.mrb[57].mxu0  ;;  %v3165_v43 = vadd.f32 %v5893_v33, %v3133_v19  ;;  %v3137_v56 = vld [vmem:[#allocation2 + $0xb8] sm:$0xff] }
 0x249   : > { %vm4831_vm0 = vcmp.gt.f32.partialorder %v4799_v11, 0.0  ;;  %v4863_v31 = vmul.f32 0.01, %v4799_v11  ;;  %v4730_v40 = vld [vmem:[#allocation2 + $0x50] sm:$0xff]  ;;  %v4668_v13 = vadd.f32 %v4636_v63, %v8112_v60  ;;  %3194 = vst.msk [vmem:[#allocation2 + $0x80] sm:$0xff] %vm1667_vm8, %v3162_v29  ;;  %4926 = vst.msk [vmem:[%s8164_s23 + $0x20] sm:$0xff] %vm1667_vm8, %v4894_v48  ;;  %v4897_v7 = vsel %vm4833_vm15, %v4801_v41, %v4865_v1 }
 0x24a   : > { %v4767_v14 = vmul.f32 %v8127_v9, %v4730_v40  ;;  %v4728_v20 = vld [vmem:[#allocation2 + $0x40] sm:$0xff]  ;;  %4702 = vst.msk [vmem:[#allocation2 + $0x70] sm:$0xff] %vm1667_vm8, %v4670_v21  ;;  %v3163_v50 = vadd.f32 %v3131_v23, %v3022_v47  ;;  %v8223_v46 = vpop.f32.mrb[58].mxu0  ;;  %4929 = vst.msk [vmem:[%s8164_s23 + $0x38] sm:$0xff] %vm1667_vm8, %v4897_v7  ;;  %v3135_v22 = vld [vmem:[#allocation2 + $0xa8] sm:$0xff] }
 0x24b   : > { %v4895_v60 = vsel %vm4831_vm0, %v4799_v11, %v4863_v31  ;;  %v4765_v45 = vmul.f32 %v8127_v9, %v4728_v20  ;;  %v4731_v15 = vld [vmem:[#allocation2 + $0x58] sm:$0xff]  ;;  %4700 = vst.msk [vmem:[#allocation2 + $0x60] sm:$0xff] %vm1667_vm8, %v4668_v13  ;;  %v8230_v53 = vpop.f32.mrb[59].mxu0  ;;  %3197 = vst.msk [vmem:[#allocation2 + $0x98] sm:$0xff] %vm1667_vm8, %v3165_v43  ;;  %v3134_v32 = vld [vmem:[#allocation2 + $0xa0] sm:$0xff] }
 0x24c   : > { %v4639_v35 = vld [vmem:[#allocation2 + $0x78] sm:$0xff]  ;;  %4927 = vst.msk [vmem:[%s8164_s23 + $0x28] sm:$0xff] %vm1667_vm8, %v4895_v60  ;;  %v4804_v62 = vadd.f32 %v8136_v17, %v4767_v14  ;;  %v4768_v52 = vmul.f32 %v8127_v9, %v4731_v15  ;;  %v4729_v18 = vld [vmem:[#allocation2 + $0x48] sm:$0xff]  ;;  %3195 = vst.msk [vmem:[#allocation2 + $0x88] sm:$0xff] %vm1667_vm8, %v3163_v50  ;;  %v5896_v8 = vpop.f32.mrb[52].mxu1 }
 0x24d   : > { %v4671_v37 = vadd.f32 %v8116_v49, %v4639_v35  ;;  %v4637_v28 = vld [vmem:[#allocation2 + $0x68] sm:$0xff]  ;;  %v4802_v38 = vadd.f32 %v8136_v17, %v4765_v45  ;;  %v4766_v27 = vmul.f32 %v8127_v9, %v4729_v18  ;;  %v3168_v49 = vadd.f32 %v5896_v8, %v3136_v57  ;;  %v3035_v55 = vpop.f32.mrb[53].mxu1  ;;  %v3140_v15 = vld [vmem:[#allocation2 + $0xd0] sm:$0xff]  ;;  %v3138_v18 = vld [vmem:[#allocation2 + $0xc0] sm:$0xff] }
 0x24e   : > { %v4669_v2 = vadd.f32 %v4637_v28, %v8120_v25  ;;  %vm4836_vm1 = vcmp.gt.f32.partialorder %v4804_v62, 0.0  ;;  %v4868_v0 = vmul.f32 0.01, %v4804_v62  ;;  %v4805_v12 = vadd.f32 %v8136_v17, %v4768_v52  ;;  %v5897_v34 = vpop.f32.mrb[54].mxu1  ;;  %v3141_v8 = vld [vmem:[#allocation2 + $0xd8] sm:$0xff] }
 0x24f   : > { %4703 = vst.msk [vmem:[#allocation2 + $0x78] sm:$0xff] %vm1667_vm8, %v4671_v37  ;;  %vm4834_vm2 = vcmp.gt.f32.partialorder %v4802_v38, 0.0  ;;  %v4866_v39 = vmul.f32 0.01, %v4802_v38  ;;  %v4803_v58 = vadd.f32 %v8136_v17, %v4766_v27  ;;  %v4642_v24 = vld [vmem:[#allocation2 + $0x90] sm:$0xff]  ;;  %v3166_v25 = vadd.f32 %v3134_v32, %v3035_v55  ;;  %3200 = vst.msk [vmem:[#allocation2 + $0xb0] sm:$0xff] %vm1667_vm8, %v3168_v49 }
 0x250   : > { %4701 = vst.msk [vmem:[#allocation2 + $0x68] sm:$0xff] %vm1667_vm8, %v4669_v2  ;;  %v4900_v41 = vsel %vm4836_vm1, %v4804_v62, %v4868_v0  ;;  %vm4837_vm3 = vcmp.gt.f32.partialorder %v4805_v12, 0.0  ;;  %v4869_v3 = vmul.f32 0.01, %v4805_v12  ;;  %v4674_v26 = vadd.f32 %v8131_v5, %v4642_v24  ;;  %v4640_v30 = vld [vmem:[#allocation2 + $0x80] sm:$0xff]  ;;  %v3038_v10 = vpop.f32.mrb[55].mxu1 }
 0x251   : > { %v8248_v11 = vpop.f32.mrb[60].mxu0  ;;  %4932 = vst.msk [vmem:[%s8164_s23 + $0x50] sm:$0xff] %vm1667_vm8, %v4900_v41  ;;  %v4898_v16 = vsel %vm4834_vm2, %v4802_v38, %v4866_v39  ;;  %vm4835_vm4 = vcmp.gt.f32.partialorder %v4803_v58, 0.0  ;;  %v4867_v29 = vmul.f32 0.01, %v4803_v58  ;;  %v4734_v33 = vld [vmem:[#allocation2 + $0x70] sm:$0xff]  ;;  %v4672_v19 = vadd.f32 %v4640_v30, %v8140_v59 }
 0x252   : > { %3198 = vst.msk [vmem:[#allocation2 + $0xa0] sm:$0xff] %vm1667_vm8, %v3166_v25  ;;  %v8255_v5 = vpop.f32.mrb[61].mxu0  ;;  %4930 = vst.msk [vmem:[%s8164_s23 + $0x40] sm:$0xff] %vm1667_vm8, %v4898_v16  ;;  %v4901_v1 = vsel %vm4837_vm3, %v4805_v12, %v4869_v3  ;;  %v4771_v21 = vmul.f32 %v8127_v9, %v4734_v33  ;;  %v4732_v63 = vld [vmem:[#allocation2 + $0x60] sm:$0xff]  ;;  %v3169_v47 = vadd.f32 %v5897_v34, %v3137_v56  ;;  %v4643_v13 = vld [vmem:[#allocation2 + $0x98] sm:$0xff] }
 0x253   : > { %4706 = vst.msk [vmem:[#allocation2 + $0x90] sm:$0xff] %vm1667_vm8, %v4674_v26  ;;  %v3167_v48 = vadd.f32 %v3135_v22, %v3038_v10  ;;  %v8262_v31 = vpop.f32.mrb[62].mxu0  ;;  %4933 = vst.msk [vmem:[%s8164_s23 + $0x58] sm:$0xff] %vm1667_vm8, %v4901_v1  ;;  %v4899_v59 = vsel %vm4835_vm4, %v4803_v58, %v4867_v29  ;;  %v4769_v40 = vmul.f32 %v8127_v9, %v4732_v63  ;;  %v4641_v23 = vld [vmem:[#allocation2 + $0x88] sm:$0xff] }
 0x254   : > { %4704 = vst.msk [vmem:[#allocation2 + $0x80] sm:$0xff] %vm1667_vm8, %v4672_v19  ;;  %v8269_v7 = vpop.f32.mrb[63].mxu0  ;;  %4931 = vst.msk [vmem:[%s8164_s23 + $0x48] sm:$0xff] %vm1667_vm8, %v4899_v59  ;;  %v4808_v14 = vadd.f32 %v8136_v17, %v4771_v21  ;;  %v4675_v20 = vadd.f32 %v8146_v51, %v4643_v13  ;;  %v4673_v43 = vadd.f32 %v4641_v23, %v8153_v36  ;;  %v5900_v45 = vpop.f32.mrb[56].mxu1  ;;  %v3139_v39 = vld [vmem:[#allocation2 + $0xc8] sm:$0xff]  ;;  %v3142_v13 = vld [vmem:[#allocation2 + $0xe0] sm:$0xff] }
 0x255   : > { %3201 = vst.msk [vmem:[#allocation2 + $0xb8] sm:$0xff] %vm1667_vm8, %v3169_v47  ;;  %3199 = vst.msk [vmem:[#allocation2 + $0xa8] sm:$0xff] %vm1667_vm8, %v3167_v48  ;;  %v4806_v50 = vadd.f32 %v8136_v17, %v4769_v40  ;;  %v3172_v51 = vadd.f32 %v5900_v45, %v3140_v15  ;;  %v3051_v36 = vpop.f32.mrb[57].mxu1 }
 0x256   : > { %v4735_v60 = vld [vmem:[#allocation2 + $0x78] sm:$0xff]  ;;  %vm4840_vm5 = vcmp.gt.f32.partialorder %v4808_v14, 0.0  ;;  %v4872_v35 = vmul.f32 0.01, %v4808_v14  ;;  %4707 = vst.msk [vmem:[#allocation2 + $0x98] sm:$0xff] %vm1667_vm8, %v4675_v20  ;;  %4705 = vst.msk [vmem:[#allocation2 + $0x88] sm:$0xff] %vm1667_vm8, %v4673_v43  ;;  %v3170_v27 = vadd.f32 %v3138_v18, %v3051_v36 }
 0x257   : > { %v4772_v62 = vmul.f32 %v8127_v9, %v4735_v60  ;;  %v4733_v52 = vld [vmem:[#allocation2 + $0x68] sm:$0xff]  ;;  %vm4838_vm6 = vcmp.gt.f32.partialorder %v4806_v50, 0.0  ;;  %v4870_v37 = vmul.f32 0.01, %v4806_v50  ;;  %v4646_v38 = vld [vmem:[#allocation2 + $0xb0] sm:$0xff]  ;;  %v5901_v2 = vpop.f32.mrb[58].mxu1 }
 0x258   : > { %v4770_v28 = vmul.f32 %v8127_v9, %v4733_v52  ;;  %v4904_v57 = vsel %vm4840_vm5, %v4808_v14, %v4872_v35  ;;  %v4678_v12 = vadd.f32 %v8170_v54, %v4646_v38  ;;  %3204 = vst.msk [vmem:[#allocation2 + $0xd0] sm:$0xff] %vm1667_vm8, %v3172_v51  ;;  %v3173_v55 = vadd.f32 %v5901_v2, %v3141_v8  ;;  %v3054_v32 = vpop.f32.mrb[59].mxu1  ;;  %v3145_v52 = vld [vmem:[#allocation2 + $0xf8] sm:$0xff]  ;;  %v3143_v36 = vld [vmem:[#allocation2 + $0xe8] sm:$0xff] }
 0x259   : > { %v4809_v0 = vadd.f32 %v8136_v17, %v4772_v62  ;;  %v4644_v49 = vld [vmem:[#allocation2 + $0xa0] sm:$0xff]  ;;  %4936 = vst.msk [vmem:[%s8164_s23 + $0x70] sm:$0xff] %vm1667_vm8, %v4904_v57  ;;  %v4902_v58 = vsel %vm4838_vm6, %v4806_v50, %v4870_v37  ;;  %3202 = vst.msk [vmem:[#allocation2 + $0xc0] sm:$0xff] %vm1667_vm8, %v3170_v27  ;;  %v3171_v56 = vadd.f32 %v3139_v39, %v3054_v32 }
 0x25a   : > { %v4807_v24 = vadd.f32 %v8136_v17, %v4770_v28  ;;  %v4738_v25 = vld [vmem:[#allocation2 + $0x90] sm:$0xff]  ;;  %v4676_v34 = vadd.f32 %v4644_v49, %v8177_v42  ;;  %4934 = vst.msk [vmem:[%s8164_s23 + $0x60] sm:$0xff] %vm1667_vm8, %v4902_v58  ;;  %4710 = vst.msk [vmem:[#allocation2 + $0xb0] sm:$0xff] %vm1667_vm8, %v4678_v12 }
 0x25b   : > { %vm4841_vm7 = vcmp.gt.f32.partialorder %v4809_v0, 0.0  ;;  %v4873_v54 = vmul.f32 0.01, %v4809_v0  ;;  %v4775_v41 = vmul.f32 %v8127_v9, %v4738_v25  ;;  %v4736_v3 = vld [vmem:[#allocation2 + $0x80] sm:$0xff]  ;;  %3205 = vst.msk [vmem:[#allocation2 + $0xd8] sm:$0xff] %vm1667_vm8, %v3173_v55  ;;  %3203 = vst.msk [vmem:[#allocation2 + $0xc8] sm:$0xff] %vm1667_vm8, %v3171_v56 }
 0x25c   : > { %vm4839_vm9 = vcmp.gt.f32.partialorder %v4807_v24, 0.0  ;;  %v4871_v26 = vmul.f32 0.01, %v4807_v24  ;;  %v4773_v42 = vmul.f32 %v8127_v9, %v4736_v3  ;;  %4708 = vst.msk [vmem:[#allocation2 + $0xa0] sm:$0xff] %vm1667_vm8, %v4676_v34  ;;  %v4647_v30 = vld [vmem:[#allocation2 + $0xb8] sm:$0xff]  ;;  %v4645_v10 = vld [vmem:[#allocation2 + $0xa8] sm:$0xff] }
 0x25d   : > { %v4905_v16 = vsel %vm4841_vm7, %v4809_v0, %v4873_v54  ;;  %v4812_v29 = vadd.f32 %v8136_v17, %v4775_v41  ;;  %v4679_v33 = vadd.f32 %v8185_v4, %v4647_v30  ;;  %v4677_v19 = vadd.f32 %v4645_v10, %v8193_v44  ;;  %v4739_v21 = vld [vmem:[#allocation2 + $0x98] sm:$0xff]  ;;  %v4737_v63 = vld [vmem:[#allocation2 + $0x88] sm:$0xff]  ;;  %v5904_v47 = vpop.f32.mrb[60].mxu1  ;;  %v3144_v4 = vld [vmem:[#allocation2 + $0xf0] sm:$0xff] }
 0x25e   : > { %4937 = vst.msk [vmem:[%s8164_s23 + $0x78] sm:$0xff] %vm1667_vm8, %v4905_v16  ;;  %v4903_v22 = vsel %vm4839_vm9, %v4807_v24, %v4871_v26  ;;  %v4810_v1 = vadd.f32 %v8136_v17, %v4773_v42  ;;  %v4776_v59 = vmul.f32 %v8127_v9, %v4739_v21  ;;  %v4774_v40 = vmul.f32 %v8127_v9, %v4737_v63  ;;  %v3067_v44 = vpop.f32.mrb[61].mxu1 }
 0x25f   : > { %4935 = vst.msk [vmem:[%s8164_s23 + $0x68] sm:$0xff] %vm1667_vm8, %v4903_v22  ;;  %vm4844_vm10 = vcmp.gt.f32.partialorder %v4812_v29, 0.0  ;;  %v4876_v48 = vmul.f32 0.01, %v4812_v29  ;;  %4711 = vst.msk [vmem:[#allocation2 + $0xb8] sm:$0xff] %vm1667_vm8, %v4679_v33  ;;  %v4650_v14 = vld [vmem:[#allocation2 + $0xd0] sm:$0xff]  ;;  %v3176_v20 = vadd.f32 %v5904_v47, %v3144_v4  ;;  %v3174_v43 = vadd.f32 %v3142_v13, %v3067_v44 }
 0x260   : > { %4709 = vst.msk [vmem:[#allocation2 + $0xa8] sm:$0xff] %vm1667_vm8, %v4677_v19  ;;  %vm4842_vm11 = vcmp.gt.f32.partialorder %v4810_v1, 0.0  ;;  %v4874_v23 = vmul.f32 0.01, %v4810_v1  ;;  %v5905_v50 = vpop.f32.mrb[62].mxu1  ;;  %v4813_v45 = vadd.f32 %v8136_v17, %v4776_v59  ;;  %v4811_v15 = vadd.f32 %v8136_v17, %v4774_v40  ;;  %v4648_v62 = vld [vmem:[#allocation2 + $0xc0] sm:$0xff] }
 0x261   : > { %v4908_v60 = vsel %vm4844_vm10, %v4812_v29, %v4876_v48  ;;  %v4682_v35 = vadd.f32 %v8209_v6, %v4650_v14  ;;  %v3070_v51 = vpop.f32.mrb[63].mxu1  ;;  %v4742_v37 = vld [vmem:[#allocation2 + $0xb0] sm:$0xff]  ;;  %v4680_v28 = vadd.f32 %v4648_v62, %v8216_v61  ;;  %3208 = vst.msk [vmem:[#allocation2 + $0xf0] sm:$0xff] %vm1667_vm8, %v3176_v20  ;;  %3206 = vst.msk [vmem:[#allocation2 + $0xe0] sm:$0xff] %vm1667_vm8, %v3174_v43 }
 0x262   : > { %4940 = vst.msk [vmem:[%s8164_s23 + $0x90] sm:$0xff] %vm1667_vm8, %v4908_v60  ;;  %v4906_v18 = vsel %vm4842_vm11, %v4810_v1, %v4874_v23  ;;  %v4651_v38 = vld [vmem:[#allocation2 + $0xd8] sm:$0xff]  ;;  %v3177_v27 = vadd.f32 %v5905_v50, %v3145_v52  ;;  %v3175_v2 = vadd.f32 %v3143_v36, %v3070_v51  ;;  %vm4845_vm12 = vcmp.gt.f32.partialorder %v4813_v45, 0.0  ;;  %v4649_v12 = vld [vmem:[#allocation2 + $0xc8] sm:$0xff] }
 0x263   : > { %4938 = vst.msk [vmem:[%s8164_s23 + $0x80] sm:$0xff] %vm1667_vm8, %v4906_v18  ;;  %v4877_v6 = vmul.f32 0.01, %v4813_v45  ;;  %vm4843_vm13 = vcmp.gt.f32.partialorder %v4811_v15, 0.0  ;;  %v4875_v8 = vmul.f32 0.01, %v4811_v15  ;;  %v4779_v57 = vmul.f32 %v8127_v9, %v4742_v37 }
 0x264   : > { %4714 = vst.msk [vmem:[#allocation2 + $0xd0] sm:$0xff] %vm1667_vm8, %v4682_v35  ;;  %v4740_v61 = vld [vmem:[#allocation2 + $0xa0] sm:$0xff]  ;;  %4712 = vst.msk [vmem:[#allocation2 + $0xc0] sm:$0xff] %vm1667_vm8, %v4680_v28  ;;  %v4683_v0 = vadd.f32 %v8223_v46, %v4651_v38  ;;  %v4681_v39 = vadd.f32 %v4649_v12, %v8230_v53 }
 0x265   : > { %3209 = vst.msk [vmem:[#allocation2 + $0xf8] sm:$0xff] %vm1667_vm8, %v3177_v27  ;;  %3207 = vst.msk [vmem:[#allocation2 + $0xe8] sm:$0xff] %vm1667_vm8, %v3175_v2  ;;  %v4909_v49 = vsel %vm4845_vm12, %v4813_v45, %v4877_v6  ;;  %v4907_v55 = vsel %vm4843_vm13, %v4811_v15, %v4875_v8  ;;  %v4777_v32 = vmul.f32 %v8127_v9, %v4740_v61 }
 0x266   : > { %4941 = vst.msk [vmem:[%s8164_s23 + $0x98] sm:$0xff] %vm1667_vm8, %v4909_v49  ;;  %4939 = vst.msk [vmem:[%s8164_s23 + $0x88] sm:$0xff] %vm1667_vm8, %v4907_v55  ;;  %v4816_v58 = vadd.f32 %v8136_v17, %v4779_v57  ;;  %v4743_v24 = vld [vmem:[#allocation2 + $0xb8] sm:$0xff] }
 0x267   : > { %v4741_v25 = vld [vmem:[#allocation2 + $0xa8] sm:$0xff]  ;;  %4715 = vst.msk [vmem:[#allocation2 + $0xd8] sm:$0xff] %vm1667_vm8, %v4683_v0  ;;  %v4814_v46 = vadd.f32 %v8136_v17, %v4777_v32  ;;  %v4780_v34 = vmul.f32 %v8127_v9, %v4743_v24  ;;  %4713 = vst.msk [vmem:[#allocation2 + $0xc8] sm:$0xff] %vm1667_vm8, %v4681_v39 }
 0x268   : > { %v4778_v56 = vmul.f32 %v8127_v9, %v4741_v25  ;;  %vm4848_vm14 = vcmp.gt.f32.partialorder %v4816_v58, 0.0  ;;  %v4880_v53 = vmul.f32 0.01, %v4816_v58  ;;  %v4654_v26 = vld [vmem:[#allocation2 + $0xf0] sm:$0xff]  ;;  %v4652_v42 = vld [vmem:[#allocation2 + $0xe0] sm:$0xff] }
 0x269   : > { %vm4846_vm15 = vcmp.gt.f32.partialorder %v4814_v46, 0.0  ;;  %v4878_v54 = vmul.f32 0.01, %v4814_v46  ;;  %v4817_v41 = vadd.f32 %v8136_v17, %v4780_v34  ;;  %v4686_v16 = vadd.f32 %v8248_v11, %v4654_v26 }
 0x26a   : > { %v4815_v3 = vadd.f32 %v8136_v17, %v4778_v56  ;;  %v4912_v30 = vsel %vm4848_vm14, %v4816_v58, %v4880_v53  ;;  %v4684_v29 = vadd.f32 %v4652_v42, %v8255_v5 }
 0x26b   : > { %v4746_v10 = vld [vmem:[#allocation2 + $0xd0] sm:$0xff]  ;;  %4944 = vst.msk [vmem:[%s8164_s23 + $0xb0] sm:$0xff] %vm1667_vm8, %v4912_v30  ;;  %v4910_v33 = vsel %vm4846_vm15, %v4814_v46, %v4878_v54  ;;  %vm4849_vm0 = vcmp.gt.f32.partialorder %v4817_v41, 0.0  ;;  %v4881_v19 = vmul.f32 0.01, %v4817_v41  ;;  %v4744_v22 = vld [vmem:[#allocation2 + $0xc0] sm:$0xff] }
 0x26c   : > { %vm4847_vm1 = vcmp.gt.f32.partialorder %v4815_v3, 0.0  ;;  %v4655_v1 = vld [vmem:[#allocation2 + $0xf8] sm:$0xff]  ;;  %4942 = vst.msk [vmem:[%s8164_s23 + $0xa0] sm:$0xff] %vm1667_vm8, %v4910_v33  ;;  %v4879_v21 = vmul.f32 0.01, %v4815_v3  ;;  %v4783_v63 = vmul.f32 %v8127_v9, %v4746_v10  ;;  %v4781_v47 = vmul.f32 %v8127_v9, %v4744_v22  ;;  %4718 = vst.msk [vmem:[#allocation2 + $0xf0] sm:$0xff] %vm1667_vm8, %v4686_v16 }
 0x26d   : > { %4716 = vst.msk [vmem:[#allocation2 + $0xe0] sm:$0xff] %vm1667_vm8, %v4684_v29  ;;  %v4687_v11 = vadd.f32 %v8262_v31, %v4655_v1  ;;  %v4653_v5 = vld [vmem:[#allocation2 + $0xe8] sm:$0xff]  ;;  %v4913_v48 = vsel %vm4849_vm0, %v4817_v41, %v4881_v19 }
 0x26e   : > { %v4747_v59 = vld [vmem:[#allocation2 + $0xd8] sm:$0xff]  ;;  %v4685_v40 = vadd.f32 %v4653_v5, %v8269_v7  ;;  %4945 = vst.msk [vmem:[%s8164_s23 + $0xb8] sm:$0xff] %vm1667_vm8, %v4913_v48  ;;  %v4911_v4 = vsel %vm4847_vm1, %v4815_v3, %v4879_v21  ;;  %v4820_v44 = vadd.f32 %v8136_v17, %v4783_v63  ;;  %v4818_v13 = vadd.f32 %v8136_v17, %v4781_v47  ;;  %v4745_v14 = vld [vmem:[#allocation2 + $0xc8] sm:$0xff] }
 0x26f   : > { %v4784_v23 = vmul.f32 %v8127_v9, %v4747_v59  ;;  %4719 = vst.msk [vmem:[#allocation2 + $0xf8] sm:$0xff] %vm1667_vm8, %v4687_v11  ;;  %4943 = vst.msk [vmem:[%s8164_s23 + $0xa8] sm:$0xff] %vm1667_vm8, %v4911_v4  ;;  %v4782_v31 = vmul.f32 %v8127_v9, %v4745_v14 }
 0x270   : > { %4717 = vst.msk [vmem:[#allocation2 + $0xe8] sm:$0xff] %vm1667_vm8, %v4685_v40  ;;  %vm4852_vm2 = vcmp.gt.f32.partialorder %v4820_v44, 0.0  ;;  %v4884_v7 = vmul.f32 0.01, %v4820_v44  ;;  %vm4850_vm3 = vcmp.gt.f32.partialorder %v4818_v13, 0.0 }
 0x271   : > { %v4882_v20 = vmul.f32 0.01, %v4818_v13  ;;  %v4821_v43 = vadd.f32 %v8136_v17, %v4784_v23  ;;  %v4819_v50 = vadd.f32 %v8136_v17, %v4782_v31 }
 0x272   : > { %v4916_v60 = vsel %vm4852_vm2, %v4820_v44, %v4884_v7 }
 0x273   : > { %v4914_v45 = vsel %vm4850_vm3, %v4818_v13, %v4882_v20  ;;  %4948 = vst.msk [vmem:[%s8164_s23 + $0xd0] sm:$0xff] %vm1667_vm8, %v4916_v60  ;;  %vm4853_vm4 = vcmp.gt.f32.partialorder %v4821_v43, 0.0  ;;  %v4885_v15 = vmul.f32 0.01, %v4821_v43  ;;  %vm4851_vm5 = vcmp.gt.f32.partialorder %v4819_v50, 0.0  ;;  %v4750_v62 = vld [vmem:[#allocation2 + $0xf0] sm:$0xff] }
 0x274   : > { %4946 = vst.msk [vmem:[%s8164_s23 + $0xc0] sm:$0xff] %vm1667_vm8, %v4914_v45  ;;  %v4883_v35 = vmul.f32 0.01, %v4819_v50  ;;  %v4748_v52 = vld [vmem:[#allocation2 + $0xe0] sm:$0xff]  ;;  %v4787_v18 = vmul.f32 %v8127_v9, %v4750_v62 }
 0x275   : > { %v4917_v51 = vsel %vm4853_vm4, %v4821_v43, %v4885_v15  ;;  %v4785_v37 = vmul.f32 %v8127_v9, %v4748_v52 }
 0x276   : > { %v4915_v36 = vsel %vm4851_vm5, %v4819_v50, %v4883_v35  ;;  %v4751_v28 = vld [vmem:[#allocation2 + $0xf8] sm:$0xff]  ;;  %4949 = vst.msk [vmem:[%s8164_s23 + $0xd8] sm:$0xff] %vm1667_vm8, %v4917_v51  ;;  %v4824_v2 = vadd.f32 %v8136_v17, %v4787_v18 }
 0x277   : > { %4947 = vst.msk [vmem:[%s8164_s23 + $0xc8] sm:$0xff] %vm1667_vm8, %v4915_v36  ;;  %v4788_v38 = vmul.f32 %v8127_v9, %v4751_v28  ;;  %v4749_v27 = vld [vmem:[#allocation2 + $0xe8] sm:$0xff]  ;;  %v4822_v6 = vadd.f32 %v8136_v17, %v4785_v37 }
 0x278   : > { %v4786_v8 = vmul.f32 %v8127_v9, %v4749_v27  ;;  %vm4856_vm6 = vcmp.gt.f32.partialorder %v4824_v2, 0.0  ;;  %v4888_v61 = vmul.f32 0.01, %v4824_v2 }
 0x279   : > { %v4825_v57 = vadd.f32 %v8136_v17, %v4788_v38  ;;  %vm4854_vm7 = vcmp.gt.f32.partialorder %v4822_v6, 0.0  ;;  %v4886_v0 = vmul.f32 0.01, %v4822_v6 }
 0x27a   : > { %v4823_v49 = vadd.f32 %v8136_v17, %v4786_v8  ;;  %v4920_v55 = vsel %vm4856_vm6, %v4824_v2, %v4888_v61 }
 0x27b   : > { %vm4857_vm9 = vcmp.gt.f32.partialorder %v4825_v57, 0.0  ;;  %v4889_v12 = vmul.f32 0.01, %v4825_v57  ;;  %v4918_v32 = vsel %vm4854_vm7, %v4822_v6, %v4886_v0  ;;  %4952 = vst.msk [vmem:[%s8164_s23 + $0xf0] sm:$0xff] %vm1667_vm8, %v4920_v55 }
 0x27c   : > { %4950 = vst.msk [vmem:[%s8164_s23 + $0xe0] sm:$0xff] %vm1667_vm8, %v4918_v32  ;;  %vm4855_vm10 = vcmp.gt.f32.partialorder %v4823_v49, 0.0  ;;  %v4887_v9 = vmul.f32 0.01, %v4823_v49 }
 0x27d   : > { %v4921_v39 = vsel %vm4857_vm9, %v4825_v57, %v4889_v12 }
 0x27e   : > { %4953 = vst.msk [vmem:[%s8164_s23 + $0xf8] sm:$0xff] %vm1667_vm8, %v4921_v39  ;;  %v4919_v58 = vsel %vm4855_vm10, %v4823_v49, %v4887_v9 }
 0x27f   : > { %4951 = vst.msk [vmem:[%s8164_s23 + $0xe8] sm:$0xff] %vm1667_vm8, %v4919_v58 }
 0x280 PF: > { %s13_s14 = sadd.s32 1, %s6393_s14   ;;  %s8505_s12 = smov %s6389_s13 }
 0x281   : > { %p10_p5 = scmp.ge.s32.totalorder %s13_s14, 4   ;;  %s8506_s13 = smov %s8508_s15 }
 0x283   :  { %12 = sbr.rel (!%p10_p5) target bundleno = 2 (0x2), region = 79 }

</bundles_post_ra>
